<compile_context>
chip_gen: v7x
topology: tpu7x:2x2x1
jax: 0.10.0
libtpu: 0.0.40
codegen_flags: <defaults>
</compile_context>

<pallas_src>
import numpy as np
import jax
import jax.numpy as jnp
from jax import lax
from jax.experimental import pallas as pl
from jax.experimental.pallas import tpu as pltpu

_BN_EPS = 1e-5


# ------------------------------ fused kernel -------------------------------- #

def _make_inception_kernel(H, W, Cin, C, nb, kws, use_bottleneck):
    """Builds the fused Inception forward kernel for one image per grid step."""
    assert len(kws) == 3
    pad_ls = [(kw - 1) // 2 for kw in kws]
    pad_rs = [(kw - 1) - p for kw, p in zip(kws, pad_ls)]
    PL = max([1] + pad_ls)          # >=1 so the maxpool window can reuse the pad
    PR = max([1] + pad_rs)
    HW = H * W

    def body(x_ref, dw_refs, pw_ref, sc_ref, sh_ref, o_ref,
             bdw_ref=None, bpw_ref=None, bsc_ref=None, bsh_ref=None):
        x = x_ref[0].astype(jnp.float32)                    # (H, W, Cin)

        if use_bottleneck:
            # SeparableConv2d 1x1: per-channel scale, then pointwise matmul.
            xb = (x * bdw_ref[0]).reshape(HW, Cin)          # (HW, Cin) f32
            y = jnp.dot(xb.astype(jnp.bfloat16), bpw_ref[...],
                        preferred_element_type=jnp.float32)  # (HW, C)
            y = jnp.maximum(y * bsc_ref[...] + bsh_ref[...], 0.0)
            z3 = y.reshape(H, W, C)                         # bottleneck output (VMEM)
        else:
            z3 = x                                          # (H, W, C), C == Cin

        # Replicate ('same') padding built in VMEM: W pad (PL, PR), H pad (0, 1).
        left = jnp.broadcast_to(z3[:, :1, :], (H, PL, C))
        right = jnp.broadcast_to(z3[:, W - 1:, :], (H, PR, C))
        zw = jnp.concatenate([left, z3, right], axis=1)     # (H, W+PL+PR, C)
        zp = jnp.concatenate([zw, zw[H - 1:H]], axis=0)     # (H+1, W+PL+PR, C)

        acts = []
        # Three SeparableConv2d branches with depthwise kernel (2, kw).
        for b, kw in enumerate(kws):
            off = PL - pad_ls[b]
            dw_ref = dw_refs[b]                             # (2*kw, C), idx = i*kw + j
            acc = jnp.zeros((H, W, C), jnp.float32)
            for j in range(kw):
                col = zp[:, off + j: off + j + W, :]        # one column shift per j
                acc = acc + col[0:H] * dw_ref[j] + col[1:H + 1] * dw_ref[kw + j]
            acts.append(acc.reshape(HW, C))

        # max_pool2d(kernel=(1,3), stride=1, padding=(0,1)): replicate-padded
        # columns give the same result as -inf padding for this window.
        mp = jnp.maximum(
            jnp.maximum(zp[0:H, PL - 1:PL - 1 + W, :], zp[0:H, PL:PL + W, :]),
            zp[0:H, PL + 1:PL + 1 + W, :])
        acts.append(mp.reshape(HW, C))

        # One stacked (block-diagonal) pointwise matmul for all four branches:
        # (4*nb, 4*C) . (HW, 4*C)^T -> (4*nb, HW)   (lane-dense output block).
        a = jnp.concatenate(acts, axis=1).astype(jnp.bfloat16)      # (HW, 4*C)
        out = lax.dot_general(pw_ref[...], a, (((1,), (1,)), ((), ())),
                              preferred_element_type=jnp.float32)    # (4*nb, HW)
        out = jnp.maximum(out * sc_ref[...] + sh_ref[...], 0.0)      # folded BN + ReLU
        o_ref[0] = out.astype(o_ref.dtype)

    if use_bottleneck:
        def kernel(x_ref, bdw_ref, bpw_ref, bsc_ref, bsh_ref,
                   dw0_ref, dw1_ref, dw2_ref, pw_ref, sc_ref, sh_ref, o_ref):
            body(x_ref, (dw0_ref, dw1_ref, dw2_ref), pw_ref, sc_ref, sh_ref, o_ref,
                 bdw_ref, bpw_ref, bsc_ref, bsh_ref)
    else:
        def kernel(x_ref, dw0_ref, dw1_ref, dw2_ref, pw_ref, sc_ref, sh_ref, o_ref):
            body(x_ref, (dw0_ref, dw1_ref, dw2_ref), pw_ref, sc_ref, sh_ref, o_ref)

    return kernel


# ------------------------------ parameters ---------------------------------- #

def _bn_params(key, c):
    kg, kb, km, kv = jax.random.split(key, 4)
    return {"gamma": jax.random.normal(kg, (c,), jnp.float32) * 0.1 + 1.0,
            "beta": jax.random.normal(kb, (c,), jnp.float32) * 0.1,
            "mean": jax.random.normal(km, (c,), jnp.float32) * 0.1,
            "var": jax.random.uniform(kv, (c,), jnp.float32, minval=0.5, maxval=1.5)}


def _fold_bn(bn):
    scale = bn["gamma"] * lax.rsqrt(bn["var"] + _BN_EPS)
    shift = bn["beta"] - bn["mean"] * scale
    return scale, shift


def init_params(key, in_channels, nb_filters, use_bottleneck=True,
                bottleneck_size=32, kernel_size=8):
    keys = iter(jax.random.split(key, 32))
    use_bn = bool(use_bottleneck and in_channels > bottleneck_size)
    params = {"use_bottleneck": use_bn}
    c = in_channels
    if use_bn:
        params["bottleneck"] = {
            "dw": jax.random.normal(next(keys), (1, in_channels), jnp.float32) * 0.2,
            "pw": jax.random.normal(next(keys), (in_channels, bottleneck_size),
                                    jnp.float32) * 0.2,
            "bn": _bn_params(next(keys), bottleneck_size),
        }
        c = bottleneck_size
    kws = [kernel_size // (2 ** i) for i in range(3)]        # widths of the (2, kw) kernels
    params["kernel_widths"] = kws
    params["convs"] = [{
        "dw": jax.random.normal(next(keys), (2 * kw, c), jnp.float32) * 0.2,  # (2, kw, c) flat
        "pw": jax.random.normal(next(keys), (c, nb_filters), jnp.float32) * 0.2,
        "bn": _bn_params(next(keys), nb_filters),
    } for kw in kws]
    params["conv1x1"] = {
        "pw": jax.random.normal(next(keys), (c, nb_filters), jnp.float32) * 0.2,
        "bn": _bn_params(next(keys), nb_filters),
    }
    return params


# -------------------------- Pallas-backed forward --------------------------- #

def inception_forward(x_nchw, params):
    N, Cin, H, W = x_nchw.shape
    nb = params["convs"][0]["pw"].shape[1]
    kws = params["kernel_widths"]
    use_bn = params["use_bottleneck"]

    # NHWC presentation for the in-kernel elementwise / tap stages (per-channel
    # weight broadcasts land on the lane axis); the OUTPUT comes back NCHW-flat
    # directly from the kernel, so no output transpose is needed.
    x = jnp.transpose(x_nchw, (0, 2, 3, 1))

    weights = []
    if use_bn:
        b = params["bottleneck"]
        bsc, bsh = _fold_bn(b["bn"])
        weights += [b["dw"],
                    b["pw"].astype(jnp.bfloat16),
                    bsc.reshape(1, -1), bsh.reshape(1, -1)]
        C = b["pw"].shape[1]
    else:
        C = Cin

    # Depthwise kernels per branch.
    dws = [p["dw"] for p in params["convs"]]

    # Block-diagonal stacked pointwise weights -> one MXU matmul per image.
    pws = [p["pw"] for p in params["convs"]] + [params["conv1x1"]["pw"]]
    w_all = jnp.zeros((4 * nb, 4 * C), jnp.float32)
    for i, p in enumerate(pws):
        w_all = w_all.at[i * nb:(i + 1) * nb, i * C:(i + 1) * C].set(p.T)
    w_all = w_all.astype(jnp.bfloat16)

    bns = [p["bn"] for p in params["convs"]] + [params["conv1x1"]["bn"]]
    folded = [_fold_bn(bn) for bn in bns]
    sc_all = jnp.concatenate([s for s, _ in folded]).reshape(4 * nb, 1)
    sh_all = jnp.concatenate([s for _, s in folded]).reshape(4 * nb, 1)

    weights += dws + [w_all, sc_all, sh_all]

    kernel = _make_inception_kernel(H, W, Cin, C, nb, kws, use_bn)

    in_specs = [pl.BlockSpec((1, H, W, Cin), lambda n: (n, 0, 0, 0))]
    in_specs += [pl.BlockSpec(w.shape, lambda n: (0, 0)) for w in weights]

    out = pl.pallas_call(
        kernel,
        out_shape=jax.ShapeDtypeStruct((N, 4 * nb, H * W), x_nchw.dtype),
        grid=(N,),
        in_specs=in_specs,
        out_specs=pl.BlockSpec((1, 4 * nb, H * W), lambda n: (n, 0, 0)),
        compiler_params=pltpu.CompilerParams(dimension_semantics=("parallel",)),
    )(x, *weights)

    # Free reshape (contiguous split of the trailing dim): NCHW out, no transpose.
    return out.reshape(N, 4 * nb, H, W)


# ---------------------------- pure-JAX reference ----------------------------- #

def ref_forward(x_nchw, params):
    x = jnp.transpose(x_nchw, (0, 2, 3, 1)).astype(jnp.float32)   # NHWC

    def bn_relu(y, bn):
        scale, shift = _fold_bn(bn)
        return jnp.maximum(y * scale + shift, 0.0)

    def pw_matmul(a, w):   # same bf16 MXU inputs / f32 accumulation as the kernel
        return jnp.matmul(a.astype(jnp.bfloat16), w.astype(jnp.bfloat16),
                          preferred_element_type=jnp.float32)

    if params["use_bottleneck"]:
        b = params["bottleneck"]
        x = bn_relu(pw_matmul(x * b["dw"][0], b["pw"]), b["bn"])

    N, H, W, C = x.shape
    outs = []
    for kw, p in zip(params["kernel_widths"], params["convs"]):
        pad_l = (kw - 1) // 2
        pad_r = (kw - 1) - pad_l
        xp = jnp.pad(x, ((0, 0), (0, 1), (pad_l, pad_r), (0, 0)), mode="edge")
        dw = p["dw"]                                   # (2*kw, C), idx = i*kw + j
        acc = jnp.zeros_like(x)
        for j in range(kw):
            col = xp[:, :, j:j + W, :]
            acc = acc + col[:, 0:H] * dw[j] + col[:, 1:H + 1] * dw[kw + j]
        outs.append(bn_relu(pw_matmul(acc, p["pw"]), p["bn"]))

    xp = jnp.pad(x, ((0, 0), (0, 0), (1, 1), (0, 0)), constant_values=-jnp.inf)
    mp = jnp.maximum(jnp.maximum(xp[:, :, 0:W], xp[:, :, 1:W + 1]), xp[:, :, 2:W + 2])
    c1 = params["conv1x1"]
    outs.append(bn_relu(pw_matmul(mp, c1["pw"]), c1["bn"]))

    out = jnp.concatenate(outs, axis=-1)               # channel concat
    return jnp.transpose(out, (0, 3, 1, 2))            # NHWC -> NCHW


# ----------------------------------- main ------------------------------------ #

if __name__ == "__main__":
    key = jax.random.PRNGKey(0)
    kx, kp, kx2, kp2 = jax.random.split(key, 4)

    N, H, W = 2, 8, 16
    nb_filters, kernel_size = 8, 8        # depthwise kernel widths (8, 4, 2)

    # Case 1: in_channels > bottleneck_size -> bottleneck path exercised.
    Cin = 40
    x = jax.random.normal(kx, (N, Cin, H, W), jnp.float32)
    params = init_params(kp, Cin, nb_filters, use_bottleneck=True,
                         bottleneck_size=32, kernel_size=kernel_size)
    out = jax.block_until_ready(inception_forward(x, params))
    ref = jax.block_until_ready(ref_forward(x, params))
    assert out.shape == (N, 4 * nb_filters, H, W), out.shape
    np.testing.assert_allclose(np.asarray(out), np.asarray(ref), rtol=1e-3, atol=1e-3)

    # Case 2: in_channels <= bottleneck_size -> bottleneck disabled.
    Cin2 = 16
    x2 = jax.random.normal(kx2, (N, Cin2, H, W), jnp.float32)
    params2 = init_params(kp2, Cin2, nb_filters, use_bottleneck=True,
                          bottleneck_size=32, kernel_size=kernel_size)
    out2 = jax.block_until_ready(inception_forward(x2, params2))
    ref2 = jax.block_until_ready(ref_forward(x2, params2))
    assert out2.shape == (N, 4 * nb_filters, H, W), out2.shape
    np.testing.assert_allclose(np.asarray(out2), np.asarray(ref2), rtol=1e-3, atol=1e-3)

    print("KERNEL_OK")
</pallas_src>

<mosaic_0001>
module attributes {stable_mosaic.version = 11 : i64} {
  func.func @kernel(%arg0: i32, %arg1: memref<1x8x16x40xf32, #tpu.memory_space<vmem>>, %arg2: memref<1x40xf32, #tpu.memory_space<vmem>>, %arg3: memref<40x32xbf16, #tpu.memory_space<vmem>>, %arg4: memref<1x32xf32, #tpu.memory_space<vmem>>, %arg5: memref<1x32xf32, #tpu.memory_space<vmem>>, %arg6: memref<16x32xf32, #tpu.memory_space<vmem>>, %arg7: memref<8x32xf32, #tpu.memory_space<vmem>>, %arg8: memref<4x32xf32, #tpu.memory_space<vmem>>, %arg9: memref<32x128xbf16, #tpu.memory_space<vmem>>, %arg10: memref<32x1xf32, #tpu.memory_space<vmem>>, %arg11: memref<32x1xf32, #tpu.memory_space<vmem>>, %arg12: memref<1x32x128xf32, #tpu.memory_space<vmem>>) attributes {dimension_semantics = [#tpu.dimension_semantics<parallel>], iteration_bounds = array<i64: 2>, scalar_prefetch = 0 : i64, scratch_operands = 0 : i64, tpu.core_type = #tpu.core_type<tc>, window_params = [{transform_indices = @transform_0, window_bounds = array<i64: 1, 8, 16, 40>}, {pipeline_mode = #tpu.pipeline_mode<synchronous>, transform_indices = @transform_1, window_bounds = array<i64: 1, 40>}, {pipeline_mode = #tpu.pipeline_mode<synchronous>, transform_indices = @transform_2, window_bounds = array<i64: 40, 32>}, {pipeline_mode = #tpu.pipeline_mode<synchronous>, transform_indices = @transform_3, window_bounds = array<i64: 1, 32>}, {pipeline_mode = #tpu.pipeline_mode<synchronous>, transform_indices = @transform_4, window_bounds = array<i64: 1, 32>}, {pipeline_mode = #tpu.pipeline_mode<synchronous>, transform_indices = @transform_5, window_bounds = array<i64: 16, 32>}, {pipeline_mode = #tpu.pipeline_mode<synchronous>, transform_indices = @transform_6, window_bounds = array<i64: 8, 32>}, {pipeline_mode = #tpu.pipeline_mode<synchronous>, transform_indices = @transform_7, window_bounds = array<i64: 4, 32>}, {pipeline_mode = #tpu.pipeline_mode<synchronous>, transform_indices = @transform_8, window_bounds = array<i64: 32, 128>}, {pipeline_mode = #tpu.pipeline_mode<synchronous>, transform_indices = @transform_9, window_bounds = array<i64: 32, 1>}, {pipeline_mode = #tpu.pipeline_mode<synchronous>, transform_indices = @transform_10, window_bounds = array<i64: 32, 1>}, {transform_indices = @transform_11, window_bounds = array<i64: 1, 32, 128>}]} {
    %c0 = arith.constant 0 : index
    %c0_0 = arith.constant 0 : index
    %c0_1 = arith.constant 0 : index
    %c0_2 = arith.constant 0 : index
    %0 = vector.load %arg1[%c0, %c0_0, %c0_1, %c0_2] : memref<1x8x16x40xf32, #tpu.memory_space<vmem>>, vector<1x8x16x40xf32>
    %1 = vector.shape_cast %0 : vector<1x8x16x40xf32> to vector<8x16x40xf32>
    %c0_3 = arith.constant 0 : index
    %c0_4 = arith.constant 0 : index
    %2 = vector.load %arg2[%c0_3, %c0_4] : memref<1x40xf32, #tpu.memory_space<vmem>>, vector<1x40xf32>
    %3 = vector.shape_cast %2 : vector<1x40xf32> to vector<40xf32>
    %4 = vector.shape_cast %3 : vector<40xf32> to vector<1x1x40xf32>
    %5 = vector.broadcast %4 : vector<1x1x40xf32> to vector<8x16x40xf32>
    %6 = arith.mulf %1, %5 : vector<8x16x40xf32>
    %7 = vector.shape_cast %6 : vector<8x16x40xf32> to vector<128x40xf32>
    %8 = arith.truncf %7 : vector<128x40xf32> to vector<128x40xbf16>
    %c0_5 = arith.constant 0 : index
    %c0_6 = arith.constant 0 : index
    %9 = vector.load %arg3[%c0_5, %c0_6] : memref<40x32xbf16, #tpu.memory_space<vmem>>, vector<40x32xbf16>
    %cst = arith.constant dense<0.000000e+00> : vector<128x32xf32>
    %10 = tpu.matmul %8, %9, %cst {dimension_numbers = #tpu.dot_dimension_numbers<[1], [0], [0], [1], [0, 0, 1, 1], [], []>} : vector<128x40xbf16>, vector<40x32xbf16>, vector<128x32xf32> -> vector<128x32xf32>
    %c0_7 = arith.constant 0 : index
    %c0_8 = arith.constant 0 : index
    %11 = vector.load %arg4[%c0_7, %c0_8] : memref<1x32xf32, #tpu.memory_space<vmem>>, vector<1x32xf32>
    %12 = vector.broadcast %11 : vector<1x32xf32> to vector<128x32xf32>
    %13 = arith.mulf %10, %12 : vector<128x32xf32>
    %c0_9 = arith.constant 0 : index
    %c0_10 = arith.constant 0 : index
    %14 = vector.load %arg5[%c0_9, %c0_10] : memref<1x32xf32, #tpu.memory_space<vmem>>, vector<1x32xf32>
    %15 = vector.broadcast %14 : vector<1x32xf32> to vector<128x32xf32>
    %16 = arith.addf %13, %15 : vector<128x32xf32>
    %cst_11 = arith.constant 0.000000e+00 : f32
    %17 = vector.broadcast %cst_11 : f32 to vector<128x32xf32>
    %18 = arith.maximumf %16, %17 : vector<128x32xf32>
    %19 = vector.shape_cast %18 : vector<128x32xf32> to vector<8x16x32xf32>
    %20 = vector.extract_strided_slice %19 {offsets = [0, 0, 0], sizes = [8, 1, 32], strides = [1, 1, 1]} : vector<8x16x32xf32> to vector<8x1x32xf32>
    %21 = vector.shape_cast %20 : vector<8x1x32xf32> to vector<8x1x32xf32>
    %22 = vector.broadcast %21 : vector<8x1x32xf32> to vector<8x3x32xf32>
    %23 = vector.extract_strided_slice %19 {offsets = [0, 15, 0], sizes = [8, 1, 32], strides = [1, 1, 1]} : vector<8x16x32xf32> to vector<8x1x32xf32>
    %24 = vector.shape_cast %23 : vector<8x1x32xf32> to vector<8x1x32xf32>
    %25 = vector.broadcast %24 : vector<8x1x32xf32> to vector<8x4x32xf32>
    %26 = tpu.concatenate %22, %19, %25 in 1 : vector<8x3x32xf32>, vector<8x16x32xf32>, vector<8x4x32xf32> -> vector<8x23x32xf32>
    %27 = vector.extract_strided_slice %26 {offsets = [7, 0, 0], sizes = [1, 23, 32], strides = [1, 1, 1]} : vector<8x23x32xf32> to vector<1x23x32xf32>
    %28 = tpu.concatenate %26, %27 in 0 : vector<8x23x32xf32>, vector<1x23x32xf32> -> vector<9x23x32xf32>
    %cst_12 = arith.constant 0.000000e+00 : f32
    %29 = vector.broadcast %cst_12 : f32 to vector<8x16x32xf32>
    %30 = vector.extract_strided_slice %28 {offsets = [0, 0, 0], sizes = [9, 16, 32], strides = [1, 1, 1]} : vector<9x23x32xf32> to vector<9x16x32xf32>
    %31 = vector.extract_strided_slice %30 {offsets = [0, 0, 0], sizes = [8, 16, 32], strides = [1, 1, 1]} : vector<9x16x32xf32> to vector<8x16x32xf32>
    %c0_13 = arith.constant 0 : index
    %c0_14 = arith.constant 0 : index
    %32 = vector.load %arg6[%c0_13, %c0_14] : memref<16x32xf32, #tpu.memory_space<vmem>>, vector<1x32xf32>
    %33 = vector.shape_cast %32 : vector<1x32xf32> to vector<32xf32>
    %34 = vector.shape_cast %33 : vector<32xf32> to vector<1x1x32xf32>
    %35 = vector.broadcast %34 : vector<1x1x32xf32> to vector<8x16x32xf32>
    %36 = arith.mulf %31, %35 : vector<8x16x32xf32>
    %37 = arith.addf %29, %36 : vector<8x16x32xf32>
    %38 = vector.extract_strided_slice %30 {offsets = [1, 0, 0], sizes = [8, 16, 32], strides = [1, 1, 1]} : vector<9x16x32xf32> to vector<8x16x32xf32>
    %c8 = arith.constant 8 : index
    %c0_15 = arith.constant 0 : index
    %39 = vector.load %arg6[%c8, %c0_15] : memref<16x32xf32, #tpu.memory_space<vmem>>, vector<1x32xf32>
    %40 = vector.shape_cast %39 : vector<1x32xf32> to vector<32xf32>
    %41 = vector.shape_cast %40 : vector<32xf32> to vector<1x1x32xf32>
    %42 = vector.broadcast %41 : vector<1x1x32xf32> to vector<8x16x32xf32>
    %43 = arith.mulf %38, %42 : vector<8x16x32xf32>
    %44 = arith.addf %37, %43 : vector<8x16x32xf32>
    %45 = vector.extract_strided_slice %28 {offsets = [0, 1, 0], sizes = [9, 16, 32], strides = [1, 1, 1]} : vector<9x23x32xf32> to vector<9x16x32xf32>
    %46 = vector.extract_strided_slice %45 {offsets = [0, 0, 0], sizes = [8, 16, 32], strides = [1, 1, 1]} : vector<9x16x32xf32> to vector<8x16x32xf32>
    %c1 = arith.constant 1 : index
    %c0_16 = arith.constant 0 : index
    %47 = vector.load %arg6[%c1, %c0_16] : memref<16x32xf32, #tpu.memory_space<vmem>>, vector<1x32xf32>
    %48 = vector.shape_cast %47 : vector<1x32xf32> to vector<32xf32>
    %49 = vector.shape_cast %48 : vector<32xf32> to vector<1x1x32xf32>
    %50 = vector.broadcast %49 : vector<1x1x32xf32> to vector<8x16x32xf32>
    %51 = arith.mulf %46, %50 : vector<8x16x32xf32>
    %52 = arith.addf %44, %51 : vector<8x16x32xf32>
    %53 = vector.extract_strided_slice %45 {offsets = [1, 0, 0], sizes = [8, 16, 32], strides = [1, 1, 1]} : vector<9x16x32xf32> to vector<8x16x32xf32>
    %c9 = arith.constant 9 : index
    %c0_17 = arith.constant 0 : index
    %54 = vector.load %arg6[%c9, %c0_17] : memref<16x32xf32, #tpu.memory_space<vmem>>, vector<1x32xf32>
    %55 = vector.shape_cast %54 : vector<1x32xf32> to vector<32xf32>
    %56 = vector.shape_cast %55 : vector<32xf32> to vector<1x1x32xf32>
    %57 = vector.broadcast %56 : vector<1x1x32xf32> to vector<8x16x32xf32>
    %58 = arith.mulf %53, %57 : vector<8x16x32xf32>
    %59 = arith.addf %52, %58 : vector<8x16x32xf32>
    %60 = vector.extract_strided_slice %28 {offsets = [0, 2, 0], sizes = [9, 16, 32], strides = [1, 1, 1]} : vector<9x23x32xf32> to vector<9x16x32xf32>
    %61 = vector.extract_strided_slice %60 {offsets = [0, 0, 0], sizes = [8, 16, 32], strides = [1, 1, 1]} : vector<9x16x32xf32> to vector<8x16x32xf32>
    %c2 = arith.constant 2 : index
    %c0_18 = arith.constant 0 : index
    %62 = vector.load %arg6[%c2, %c0_18] : memref<16x32xf32, #tpu.memory_space<vmem>>, vector<1x32xf32>
    %63 = vector.shape_cast %62 : vector<1x32xf32> to vector<32xf32>
    %64 = vector.shape_cast %63 : vector<32xf32> to vector<1x1x32xf32>
    %65 = vector.broadcast %64 : vector<1x1x32xf32> to vector<8x16x32xf32>
    %66 = arith.mulf %61, %65 : vector<8x16x32xf32>
    %67 = arith.addf %59, %66 : vector<8x16x32xf32>
    %68 = vector.extract_strided_slice %60 {offsets = [1, 0, 0], sizes = [8, 16, 32], strides = [1, 1, 1]} : vector<9x16x32xf32> to vector<8x16x32xf32>
    %c10 = arith.constant 10 : index
    %c0_19 = arith.constant 0 : index
    %69 = vector.load %arg6[%c10, %c0_19] : memref<16x32xf32, #tpu.memory_space<vmem>>, vector<1x32xf32>
    %70 = vector.shape_cast %69 : vector<1x32xf32> to vector<32xf32>
    %71 = vector.shape_cast %70 : vector<32xf32> to vector<1x1x32xf32>
    %72 = vector.broadcast %71 : vector<1x1x32xf32> to vector<8x16x32xf32>
    %73 = arith.mulf %68, %72 : vector<8x16x32xf32>
    %74 = arith.addf %67, %73 : vector<8x16x32xf32>
    %75 = vector.extract_strided_slice %28 {offsets = [0, 3, 0], sizes = [9, 16, 32], strides = [1, 1, 1]} : vector<9x23x32xf32> to vector<9x16x32xf32>
    %76 = vector.extract_strided_slice %75 {offsets = [0, 0, 0], sizes = [8, 16, 32], strides = [1, 1, 1]} : vector<9x16x32xf32> to vector<8x16x32xf32>
    %c3 = arith.constant 3 : index
    %c0_20 = arith.constant 0 : index
    %77 = vector.load %arg6[%c3, %c0_20] : memref<16x32xf32, #tpu.memory_space<vmem>>, vector<1x32xf32>
    %78 = vector.shape_cast %77 : vector<1x32xf32> to vector<32xf32>
    %79 = vector.shape_cast %78 : vector<32xf32> to vector<1x1x32xf32>
    %80 = vector.broadcast %79 : vector<1x1x32xf32> to vector<8x16x32xf32>
    %81 = arith.mulf %76, %80 : vector<8x16x32xf32>
    %82 = arith.addf %74, %81 : vector<8x16x32xf32>
    %83 = vector.extract_strided_slice %75 {offsets = [1, 0, 0], sizes = [8, 16, 32], strides = [1, 1, 1]} : vector<9x16x32xf32> to vector<8x16x32xf32>
    %c11 = arith.constant 11 : index
    %c0_21 = arith.constant 0 : index
    %84 = vector.load %arg6[%c11, %c0_21] : memref<16x32xf32, #tpu.memory_space<vmem>>, vector<1x32xf32>
    %85 = vector.shape_cast %84 : vector<1x32xf32> to vector<32xf32>
    %86 = vector.shape_cast %85 : vector<32xf32> to vector<1x1x32xf32>
    %87 = vector.broadcast %86 : vector<1x1x32xf32> to vector<8x16x32xf32>
    %88 = arith.mulf %83, %87 : vector<8x16x32xf32>
    %89 = arith.addf %82, %88 : vector<8x16x32xf32>
    %90 = vector.extract_strided_slice %28 {offsets = [0, 4, 0], sizes = [9, 16, 32], strides = [1, 1, 1]} : vector<9x23x32xf32> to vector<9x16x32xf32>
    %91 = vector.extract_strided_slice %90 {offsets = [0, 0, 0], sizes = [8, 16, 32], strides = [1, 1, 1]} : vector<9x16x32xf32> to vector<8x16x32xf32>
    %c4 = arith.constant 4 : index
    %c0_22 = arith.constant 0 : index
    %92 = vector.load %arg6[%c4, %c0_22] : memref<16x32xf32, #tpu.memory_space<vmem>>, vector<1x32xf32>
    %93 = vector.shape_cast %92 : vector<1x32xf32> to vector<32xf32>
    %94 = vector.shape_cast %93 : vector<32xf32> to vector<1x1x32xf32>
    %95 = vector.broadcast %94 : vector<1x1x32xf32> to vector<8x16x32xf32>
    %96 = arith.mulf %91, %95 : vector<8x16x32xf32>
    %97 = arith.addf %89, %96 : vector<8x16x32xf32>
    %98 = vector.extract_strided_slice %90 {offsets = [1, 0, 0], sizes = [8, 16, 32], strides = [1, 1, 1]} : vector<9x16x32xf32> to vector<8x16x32xf32>
    %c12 = arith.constant 12 : index
    %c0_23 = arith.constant 0 : index
    %99 = vector.load %arg6[%c12, %c0_23] : memref<16x32xf32, #tpu.memory_space<vmem>>, vector<1x32xf32>
    %100 = vector.shape_cast %99 : vector<1x32xf32> to vector<32xf32>
    %101 = vector.shape_cast %100 : vector<32xf32> to vector<1x1x32xf32>
    %102 = vector.broadcast %101 : vector<1x1x32xf32> to vector<8x16x32xf32>
    %103 = arith.mulf %98, %102 : vector<8x16x32xf32>
    %104 = arith.addf %97, %103 : vector<8x16x32xf32>
    %105 = vector.extract_strided_slice %28 {offsets = [0, 5, 0], sizes = [9, 16, 32], strides = [1, 1, 1]} : vector<9x23x32xf32> to vector<9x16x32xf32>
    %106 = vector.extract_strided_slice %105 {offsets = [0, 0, 0], sizes = [8, 16, 32], strides = [1, 1, 1]} : vector<9x16x32xf32> to vector<8x16x32xf32>
    %c5 = arith.constant 5 : index
    %c0_24 = arith.constant 0 : index
    %107 = vector.load %arg6[%c5, %c0_24] : memref<16x32xf32, #tpu.memory_space<vmem>>, vector<1x32xf32>
    %108 = vector.shape_cast %107 : vector<1x32xf32> to vector<32xf32>
    %109 = vector.shape_cast %108 : vector<32xf32> to vector<1x1x32xf32>
    %110 = vector.broadcast %109 : vector<1x1x32xf32> to vector<8x16x32xf32>
    %111 = arith.mulf %106, %110 : vector<8x16x32xf32>
    %112 = arith.addf %104, %111 : vector<8x16x32xf32>
    %113 = vector.extract_strided_slice %105 {offsets = [1, 0, 0], sizes = [8, 16, 32], strides = [1, 1, 1]} : vector<9x16x32xf32> to vector<8x16x32xf32>
    %c13 = arith.constant 13 : index
    %c0_25 = arith.constant 0 : index
    %114 = vector.load %arg6[%c13, %c0_25] : memref<16x32xf32, #tpu.memory_space<vmem>>, vector<1x32xf32>
    %115 = vector.shape_cast %114 : vector<1x32xf32> to vector<32xf32>
    %116 = vector.shape_cast %115 : vector<32xf32> to vector<1x1x32xf32>
    %117 = vector.broadcast %116 : vector<1x1x32xf32> to vector<8x16x32xf32>
    %118 = arith.mulf %113, %117 : vector<8x16x32xf32>
    %119 = arith.addf %112, %118 : vector<8x16x32xf32>
    %120 = vector.extract_strided_slice %28 {offsets = [0, 6, 0], sizes = [9, 16, 32], strides = [1, 1, 1]} : vector<9x23x32xf32> to vector<9x16x32xf32>
    %121 = vector.extract_strided_slice %120 {offsets = [0, 0, 0], sizes = [8, 16, 32], strides = [1, 1, 1]} : vector<9x16x32xf32> to vector<8x16x32xf32>
    %c6 = arith.constant 6 : index
    %c0_26 = arith.constant 0 : index
    %122 = vector.load %arg6[%c6, %c0_26] : memref<16x32xf32, #tpu.memory_space<vmem>>, vector<1x32xf32>
    %123 = vector.shape_cast %122 : vector<1x32xf32> to vector<32xf32>
    %124 = vector.shape_cast %123 : vector<32xf32> to vector<1x1x32xf32>
    %125 = vector.broadcast %124 : vector<1x1x32xf32> to vector<8x16x32xf32>
    %126 = arith.mulf %121, %125 : vector<8x16x32xf32>
    %127 = arith.addf %119, %126 : vector<8x16x32xf32>
    %128 = vector.extract_strided_slice %120 {offsets = [1, 0, 0], sizes = [8, 16, 32], strides = [1, 1, 1]} : vector<9x16x32xf32> to vector<8x16x32xf32>
    %c14 = arith.constant 14 : index
    %c0_27 = arith.constant 0 : index
    %129 = vector.load %arg6[%c14, %c0_27] : memref<16x32xf32, #tpu.memory_space<vmem>>, vector<1x32xf32>
    %130 = vector.shape_cast %129 : vector<1x32xf32> to vector<32xf32>
    %131 = vector.shape_cast %130 : vector<32xf32> to vector<1x1x32xf32>
    %132 = vector.broadcast %131 : vector<1x1x32xf32> to vector<8x16x32xf32>
    %133 = arith.mulf %128, %132 : vector<8x16x32xf32>
    %134 = arith.addf %127, %133 : vector<8x16x32xf32>
    %135 = vector.extract_strided_slice %28 {offsets = [0, 7, 0], sizes = [9, 16, 32], strides = [1, 1, 1]} : vector<9x23x32xf32> to vector<9x16x32xf32>
    %136 = vector.extract_strided_slice %135 {offsets = [0, 0, 0], sizes = [8, 16, 32], strides = [1, 1, 1]} : vector<9x16x32xf32> to vector<8x16x32xf32>
    %c7 = arith.constant 7 : index
    %c0_28 = arith.constant 0 : index
    %137 = vector.load %arg6[%c7, %c0_28] : memref<16x32xf32, #tpu.memory_space<vmem>>, vector<1x32xf32>
    %138 = vector.shape_cast %137 : vector<1x32xf32> to vector<32xf32>
    %139 = vector.shape_cast %138 : vector<32xf32> to vector<1x1x32xf32>
    %140 = vector.broadcast %139 : vector<1x1x32xf32> to vector<8x16x32xf32>
    %141 = arith.mulf %136, %140 : vector<8x16x32xf32>
    %142 = arith.addf %134, %141 : vector<8x16x32xf32>
    %143 = vector.extract_strided_slice %135 {offsets = [1, 0, 0], sizes = [8, 16, 32], strides = [1, 1, 1]} : vector<9x16x32xf32> to vector<8x16x32xf32>
    %c15 = arith.constant 15 : index
    %c0_29 = arith.constant 0 : index
    %144 = vector.load %arg6[%c15, %c0_29] : memref<16x32xf32, #tpu.memory_space<vmem>>, vector<1x32xf32>
    %145 = vector.shape_cast %144 : vector<1x32xf32> to vector<32xf32>
    %146 = vector.shape_cast %145 : vector<32xf32> to vector<1x1x32xf32>
    %147 = vector.broadcast %146 : vector<1x1x32xf32> to vector<8x16x32xf32>
    %148 = arith.mulf %143, %147 : vector<8x16x32xf32>
    %149 = arith.addf %142, %148 : vector<8x16x32xf32>
    %150 = vector.shape_cast %149 : vector<8x16x32xf32> to vector<128x32xf32>
    %cst_30 = arith.constant 0.000000e+00 : f32
    %151 = vector.broadcast %cst_30 : f32 to vector<8x16x32xf32>
    %152 = vector.extract_strided_slice %28 {offsets = [0, 2, 0], sizes = [9, 16, 32], strides = [1, 1, 1]} : vector<9x23x32xf32> to vector<9x16x32xf32>
    %153 = vector.extract_strided_slice %152 {offsets = [0, 0, 0], sizes = [8, 16, 32], strides = [1, 1, 1]} : vector<9x16x32xf32> to vector<8x16x32xf32>
    %c0_31 = arith.constant 0 : index
    %c0_32 = arith.constant 0 : index
    %154 = vector.load %arg7[%c0_31, %c0_32] : memref<8x32xf32, #tpu.memory_space<vmem>>, vector<1x32xf32>
    %155 = vector.shape_cast %154 : vector<1x32xf32> to vector<32xf32>
    %156 = vector.shape_cast %155 : vector<32xf32> to vector<1x1x32xf32>
    %157 = vector.broadcast %156 : vector<1x1x32xf32> to vector<8x16x32xf32>
    %158 = arith.mulf %153, %157 : vector<8x16x32xf32>
    %159 = arith.addf %151, %158 : vector<8x16x32xf32>
    %160 = vector.extract_strided_slice %152 {offsets = [1, 0, 0], sizes = [8, 16, 32], strides = [1, 1, 1]} : vector<9x16x32xf32> to vector<8x16x32xf32>
    %c4_33 = arith.constant 4 : index
    %c0_34 = arith.constant 0 : index
    %161 = vector.load %arg7[%c4_33, %c0_34] : memref<8x32xf32, #tpu.memory_space<vmem>>, vector<1x32xf32>
    %162 = vector.shape_cast %161 : vector<1x32xf32> to vector<32xf32>
    %163 = vector.shape_cast %162 : vector<32xf32> to vector<1x1x32xf32>
    %164 = vector.broadcast %163 : vector<1x1x32xf32> to vector<8x16x32xf32>
    %165 = arith.mulf %160, %164 : vector<8x16x32xf32>
    %166 = arith.addf %159, %165 : vector<8x16x32xf32>
    %167 = vector.extract_strided_slice %28 {offsets = [0, 3, 0], sizes = [9, 16, 32], strides = [1, 1, 1]} : vector<9x23x32xf32> to vector<9x16x32xf32>
    %168 = vector.extract_strided_slice %167 {offsets = [0, 0, 0], sizes = [8, 16, 32], strides = [1, 1, 1]} : vector<9x16x32xf32> to vector<8x16x32xf32>
    %c1_35 = arith.constant 1 : index
    %c0_36 = arith.constant 0 : index
    %169 = vector.load %arg7[%c1_35, %c0_36] : memref<8x32xf32, #tpu.memory_space<vmem>>, vector<1x32xf32>
    %170 = vector.shape_cast %169 : vector<1x32xf32> to vector<32xf32>
    %171 = vector.shape_cast %170 : vector<32xf32> to vector<1x1x32xf32>
    %172 = vector.broadcast %171 : vector<1x1x32xf32> to vector<8x16x32xf32>
    %173 = arith.mulf %168, %172 : vector<8x16x32xf32>
    %174 = arith.addf %166, %173 : vector<8x16x32xf32>
    %175 = vector.extract_strided_slice %167 {offsets = [1, 0, 0], sizes = [8, 16, 32], strides = [1, 1, 1]} : vector<9x16x32xf32> to vector<8x16x32xf32>
    %c5_37 = arith.constant 5 : index
    %c0_38 = arith.constant 0 : index
    %176 = vector.load %arg7[%c5_37, %c0_38] : memref<8x32xf32, #tpu.memory_space<vmem>>, vector<1x32xf32>
    %177 = vector.shape_cast %176 : vector<1x32xf32> to vector<32xf32>
    %178 = vector.shape_cast %177 : vector<32xf32> to vector<1x1x32xf32>
    %179 = vector.broadcast %178 : vector<1x1x32xf32> to vector<8x16x32xf32>
    %180 = arith.mulf %175, %179 : vector<8x16x32xf32>
    %181 = arith.addf %174, %180 : vector<8x16x32xf32>
    %182 = vector.extract_strided_slice %28 {offsets = [0, 4, 0], sizes = [9, 16, 32], strides = [1, 1, 1]} : vector<9x23x32xf32> to vector<9x16x32xf32>
    %183 = vector.extract_strided_slice %182 {offsets = [0, 0, 0], sizes = [8, 16, 32], strides = [1, 1, 1]} : vector<9x16x32xf32> to vector<8x16x32xf32>
    %c2_39 = arith.constant 2 : index
    %c0_40 = arith.constant 0 : index
    %184 = vector.load %arg7[%c2_39, %c0_40] : memref<8x32xf32, #tpu.memory_space<vmem>>, vector<1x32xf32>
    %185 = vector.shape_cast %184 : vector<1x32xf32> to vector<32xf32>
    %186 = vector.shape_cast %185 : vector<32xf32> to vector<1x1x32xf32>
    %187 = vector.broadcast %186 : vector<1x1x32xf32> to vector<8x16x32xf32>
    %188 = arith.mulf %183, %187 : vector<8x16x32xf32>
    %189 = arith.addf %181, %188 : vector<8x16x32xf32>
    %190 = vector.extract_strided_slice %182 {offsets = [1, 0, 0], sizes = [8, 16, 32], strides = [1, 1, 1]} : vector<9x16x32xf32> to vector<8x16x32xf32>
    %c6_41 = arith.constant 6 : index
    %c0_42 = arith.constant 0 : index
    %191 = vector.load %arg7[%c6_41, %c0_42] : memref<8x32xf32, #tpu.memory_space<vmem>>, vector<1x32xf32>
    %192 = vector.shape_cast %191 : vector<1x32xf32> to vector<32xf32>
    %193 = vector.shape_cast %192 : vector<32xf32> to vector<1x1x32xf32>
    %194 = vector.broadcast %193 : vector<1x1x32xf32> to vector<8x16x32xf32>
    %195 = arith.mulf %190, %194 : vector<8x16x32xf32>
    %196 = arith.addf %189, %195 : vector<8x16x32xf32>
    %197 = vector.extract_strided_slice %28 {offsets = [0, 5, 0], sizes = [9, 16, 32], strides = [1, 1, 1]} : vector<9x23x32xf32> to vector<9x16x32xf32>
    %198 = vector.extract_strided_slice %197 {offsets = [0, 0, 0], sizes = [8, 16, 32], strides = [1, 1, 1]} : vector<9x16x32xf32> to vector<8x16x32xf32>
    %c3_43 = arith.constant 3 : index
    %c0_44 = arith.constant 0 : index
    %199 = vector.load %arg7[%c3_43, %c0_44] : memref<8x32xf32, #tpu.memory_space<vmem>>, vector<1x32xf32>
    %200 = vector.shape_cast %199 : vector<1x32xf32> to vector<32xf32>
    %201 = vector.shape_cast %200 : vector<32xf32> to vector<1x1x32xf32>
    %202 = vector.broadcast %201 : vector<1x1x32xf32> to vector<8x16x32xf32>
    %203 = arith.mulf %198, %202 : vector<8x16x32xf32>
    %204 = arith.addf %196, %203 : vector<8x16x32xf32>
    %205 = vector.extract_strided_slice %197 {offsets = [1, 0, 0], sizes = [8, 16, 32], strides = [1, 1, 1]} : vector<9x16x32xf32> to vector<8x16x32xf32>
    %c7_45 = arith.constant 7 : index
    %c0_46 = arith.constant 0 : index
    %206 = vector.load %arg7[%c7_45, %c0_46] : memref<8x32xf32, #tpu.memory_space<vmem>>, vector<1x32xf32>
    %207 = vector.shape_cast %206 : vector<1x32xf32> to vector<32xf32>
    %208 = vector.shape_cast %207 : vector<32xf32> to vector<1x1x32xf32>
    %209 = vector.broadcast %208 : vector<1x1x32xf32> to vector<8x16x32xf32>
    %210 = arith.mulf %205, %209 : vector<8x16x32xf32>
    %211 = arith.addf %204, %210 : vector<8x16x32xf32>
    %212 = vector.shape_cast %211 : vector<8x16x32xf32> to vector<128x32xf32>
    %cst_47 = arith.constant 0.000000e+00 : f32
    %213 = vector.broadcast %cst_47 : f32 to vector<8x16x32xf32>
    %214 = vector.extract_strided_slice %28 {offsets = [0, 3, 0], sizes = [9, 16, 32], strides = [1, 1, 1]} : vector<9x23x32xf32> to vector<9x16x32xf32>
    %215 = vector.extract_strided_slice %214 {offsets = [0, 0, 0], sizes = [8, 16, 32], strides = [1, 1, 1]} : vector<9x16x32xf32> to vector<8x16x32xf32>
    %c0_48 = arith.constant 0 : index
    %c0_49 = arith.constant 0 : index
    %216 = vector.load %arg8[%c0_48, %c0_49] : memref<4x32xf32, #tpu.memory_space<vmem>>, vector<1x32xf32>
    %217 = vector.shape_cast %216 : vector<1x32xf32> to vector<32xf32>
    %218 = vector.shape_cast %217 : vector<32xf32> to vector<1x1x32xf32>
    %219 = vector.broadcast %218 : vector<1x1x32xf32> to vector<8x16x32xf32>
    %220 = arith.mulf %215, %219 : vector<8x16x32xf32>
    %221 = arith.addf %213, %220 : vector<8x16x32xf32>
    %222 = vector.extract_strided_slice %214 {offsets = [1, 0, 0], sizes = [8, 16, 32], strides = [1, 1, 1]} : vector<9x16x32xf32> to vector<8x16x32xf32>
    %c2_50 = arith.constant 2 : index
    %c0_51 = arith.constant 0 : index
    %223 = vector.load %arg8[%c2_50, %c0_51] : memref<4x32xf32, #tpu.memory_space<vmem>>, vector<1x32xf32>
    %224 = vector.shape_cast %223 : vector<1x32xf32> to vector<32xf32>
    %225 = vector.shape_cast %224 : vector<32xf32> to vector<1x1x32xf32>
    %226 = vector.broadcast %225 : vector<1x1x32xf32> to vector<8x16x32xf32>
    %227 = arith.mulf %222, %226 : vector<8x16x32xf32>
    %228 = arith.addf %221, %227 : vector<8x16x32xf32>
    %229 = vector.extract_strided_slice %28 {offsets = [0, 4, 0], sizes = [9, 16, 32], strides = [1, 1, 1]} : vector<9x23x32xf32> to vector<9x16x32xf32>
    %230 = vector.extract_strided_slice %229 {offsets = [0, 0, 0], sizes = [8, 16, 32], strides = [1, 1, 1]} : vector<9x16x32xf32> to vector<8x16x32xf32>
    %c1_52 = arith.constant 1 : index
    %c0_53 = arith.constant 0 : index
    %231 = vector.load %arg8[%c1_52, %c0_53] : memref<4x32xf32, #tpu.memory_space<vmem>>, vector<1x32xf32>
    %232 = vector.shape_cast %231 : vector<1x32xf32> to vector<32xf32>
    %233 = vector.shape_cast %232 : vector<32xf32> to vector<1x1x32xf32>
    %234 = vector.broadcast %233 : vector<1x1x32xf32> to vector<8x16x32xf32>
    %235 = arith.mulf %230, %234 : vector<8x16x32xf32>
    %236 = arith.addf %228, %235 : vector<8x16x32xf32>
    %237 = vector.extract_strided_slice %229 {offsets = [1, 0, 0], sizes = [8, 16, 32], strides = [1, 1, 1]} : vector<9x16x32xf32> to vector<8x16x32xf32>
    %c3_54 = arith.constant 3 : index
    %c0_55 = arith.constant 0 : index
    %238 = vector.load %arg8[%c3_54, %c0_55] : memref<4x32xf32, #tpu.memory_space<vmem>>, vector<1x32xf32>
    %239 = vector.shape_cast %238 : vector<1x32xf32> to vector<32xf32>
    %240 = vector.shape_cast %239 : vector<32xf32> to vector<1x1x32xf32>
    %241 = vector.broadcast %240 : vector<1x1x32xf32> to vector<8x16x32xf32>
    %242 = arith.mulf %237, %241 : vector<8x16x32xf32>
    %243 = arith.addf %236, %242 : vector<8x16x32xf32>
    %244 = vector.shape_cast %243 : vector<8x16x32xf32> to vector<128x32xf32>
    %245 = vector.extract_strided_slice %28 {offsets = [0, 2, 0], sizes = [8, 16, 32], strides = [1, 1, 1]} : vector<9x23x32xf32> to vector<8x16x32xf32>
    %246 = vector.extract_strided_slice %28 {offsets = [0, 3, 0], sizes = [8, 16, 32], strides = [1, 1, 1]} : vector<9x23x32xf32> to vector<8x16x32xf32>
    %247 = arith.maximumf %245, %246 : vector<8x16x32xf32>
    %248 = vector.extract_strided_slice %28 {offsets = [0, 4, 0], sizes = [8, 16, 32], strides = [1, 1, 1]} : vector<9x23x32xf32> to vector<8x16x32xf32>
    %249 = arith.maximumf %247, %248 : vector<8x16x32xf32>
    %250 = vector.shape_cast %249 : vector<8x16x32xf32> to vector<128x32xf32>
    %251 = tpu.concatenate %150, %212, %244, %250 in 1 : vector<128x32xf32>, vector<128x32xf32>, vector<128x32xf32>, vector<128x32xf32> -> vector<128x128xf32>
    %252 = arith.truncf %251 : vector<128x128xf32> to vector<128x128xbf16>
    %c0_56 = arith.constant 0 : index
    %c0_57 = arith.constant 0 : index
    %253 = vector.load %arg9[%c0_56, %c0_57] : memref<32x128xbf16, #tpu.memory_space<vmem>>, vector<32x128xbf16>
    %cst_58 = arith.constant dense<0.000000e+00> : vector<32x128xf32>
    %254 = tpu.matmul %253, %252, %cst_58 {dimension_numbers = #tpu.dot_dimension_numbers<[1], [1], [0], [0], [0, 0, 1, 0], [], []>} : vector<32x128xbf16>, vector<128x128xbf16>, vector<32x128xf32> -> vector<32x128xf32>
    %c0_59 = arith.constant 0 : index
    %c0_60 = arith.constant 0 : index
    %255 = vector.load %arg10[%c0_59, %c0_60] : memref<32x1xf32, #tpu.memory_space<vmem>>, vector<32x1xf32>
    %256 = vector.broadcast %255 : vector<32x1xf32> to vector<32x128xf32>
    %257 = arith.mulf %254, %256 : vector<32x128xf32>
    %c0_61 = arith.constant 0 : index
    %c0_62 = arith.constant 0 : index
    %258 = vector.load %arg11[%c0_61, %c0_62] : memref<32x1xf32, #tpu.memory_space<vmem>>, vector<32x1xf32>
    %259 = vector.broadcast %258 : vector<32x1xf32> to vector<32x128xf32>
    %260 = arith.addf %257, %259 : vector<32x128xf32>
    %cst_63 = arith.constant 0.000000e+00 : f32
    %261 = vector.broadcast %cst_63 : f32 to vector<32x128xf32>
    %262 = arith.maximumf %260, %261 : vector<32x128xf32>
    %c0_64 = arith.constant 0 : index
    %c0_65 = arith.constant 0 : index
    %c0_66 = arith.constant 0 : index
    %263 = vector.load %arg12[%c0_64, %c0_65, %c0_66] : memref<1x32x128xf32, #tpu.memory_space<vmem>>, vector<1x32x128xf32>
    %264 = vector.shape_cast %263 : vector<1x32x128xf32> to vector<32x128xf32>
    %265 = vector.shape_cast %262 : vector<32x128xf32> to vector<1x32x128xf32>
    tpu.vector_store %arg12[%c0_64, %c0_65, %c0_66], %265 {strides = array<i32>} : memref<1x32x128xf32, #tpu.memory_space<vmem>>, vector<1x32x128xf32>,
    return
  }
  func.func @transform_0(%arg0: i32) -> (i32, i32, i32, i32) {
    %c0_i32 = arith.constant 0 : i32
    %c0_i32_0 = arith.constant 0 : i32
    %c0_i32_1 = arith.constant 0 : i32
    %c0_i32_2 = arith.constant 0 : i32
    return %arg0, %c0_i32, %c0_i32_0, %c0_i32_1 : i32, i32, i32, i32
  }
  func.func @transform_1(%arg0: i32) -> (i32, i32) {
    %c0_i32 = arith.constant 0 : i32
    %c0_i32_0 = arith.constant 0 : i32
    %c0_i32_1 = arith.constant 0 : i32
    return %c0_i32, %c0_i32_0 : i32, i32
  }
  func.func @transform_2(%arg0: i32) -> (i32, i32) {
    %c0_i32 = arith.constant 0 : i32
    %c0_i32_0 = arith.constant 0 : i32
    %c0_i32_1 = arith.constant 0 : i32
    return %c0_i32, %c0_i32_0 : i32, i32
  }
  func.func @transform_3(%arg0: i32) -> (i32, i32) {
    %c0_i32 = arith.constant 0 : i32
    %c0_i32_0 = arith.constant 0 : i32
    %c0_i32_1 = arith.constant 0 : i32
    return %c0_i32, %c0_i32_0 : i32, i32
  }
  func.func @transform_4(%arg0: i32) -> (i32, i32) {
    %c0_i32 = arith.constant 0 : i32
    %c0_i32_0 = arith.constant 0 : i32
    %c0_i32_1 = arith.constant 0 : i32
    return %c0_i32, %c0_i32_0 : i32, i32
  }
  func.func @transform_5(%arg0: i32) -> (i32, i32) {
    %c0_i32 = arith.constant 0 : i32
    %c0_i32_0 = arith.constant 0 : i32
    %c0_i32_1 = arith.constant 0 : i32
    return %c0_i32, %c0_i32_0 : i32, i32
  }
  func.func @transform_6(%arg0: i32) -> (i32, i32) {
    %c0_i32 = arith.constant 0 : i32
    %c0_i32_0 = arith.constant 0 : i32
    %c0_i32_1 = arith.constant 0 : i32
    return %c0_i32, %c0_i32_0 : i32, i32
  }
  func.func @transform_7(%arg0: i32) -> (i32, i32) {
    %c0_i32 = arith.constant 0 : i32
    %c0_i32_0 = arith.constant 0 : i32
    %c0_i32_1 = arith.constant 0 : i32
    return %c0_i32, %c0_i32_0 : i32, i32
  }
  func.func @transform_8(%arg0: i32) -> (i32, i32) {
    %c0_i32 = arith.constant 0 : i32
    %c0_i32_0 = arith.constant 0 : i32
    %c0_i32_1 = arith.constant 0 : i32
    return %c0_i32, %c0_i32_0 : i32, i32
  }
  func.func @transform_9(%arg0: i32) -> (i32, i32) {
    %c0_i32 = arith.constant 0 : i32
    %c0_i32_0 = arith.constant 0 : i32
    %c0_i32_1 = arith.constant 0 : i32
    return %c0_i32, %c0_i32_0 : i32, i32
  }
  func.func @transform_10(%arg0: i32) -> (i32, i32) {
    %c0_i32 = arith.constant 0 : i32
    %c0_i32_0 = arith.constant 0 : i32
    %c0_i32_1 = arith.constant 0 : i32
    return %c0_i32, %c0_i32_0 : i32, i32
  }
  func.func @transform_11(%arg0: i32) -> (i32, i32, i32) {
    %c0_i32 = arith.constant 0 : i32
    %c0_i32_0 = arith.constant 0 : i32
    %c0_i32_1 = arith.constant 0 : i32
    return %arg0, %c0_i32, %c0_i32_0 : i32, i32, i32
  }
}

</mosaic_0001>

<bundles_post_ra>
// kernel: tpu_custom_call.1
= control target key start
LH: loop header
LB: loop body
LE: loop exit
PB: predicated region body
PF: predicated region fallthrough
CT: control target
= control target key end

     0   :  { %16 = vsyncpa [#allocation3], 0  ;;  %s8481_s0 = inlined_call_operand.hbm [shape: f32[2,8,16,40], index: 0, kind: input, shape index: {}]   ;;  %s8482_s1 = inlined_call_operand.vmem [shape: f32[1,40], index: 1, kind: input, shape index: {}]   ;;  %s8483_s2 = inlined_call_operand.vmem [shape: bf16[40,32], index: 2, kind: input, shape index: {}]   ;;  %s8484_s3 = inlined_call_operand.vmem [shape: f32[1,32], index: 3, kind: input, shape index: {}]   ;;  %s8485_s4 = inlined_call_operand.vmem [shape: f32[1,32], index: 4, kind: input, shape index: {}]   ;;  %s8486_s5 = inlined_call_operand.vmem [shape: f32[16,32], index: 5, kind: input, shape index: {}]   ;;  %s8487_s6 = inlined_call_operand.vmem [shape: f32[8,32], index: 6, kind: input, shape index: {}]   ;;  %s8488_s7 = inlined_call_operand.vmem [shape: f32[4,32], index: 7, kind: input, shape index: {}]   ;;  %s8489_s8 = inlined_call_operand.vmem [shape: bf16[32,128], index: 8, kind: input, shape index: {}]   ;;  %s8490_s9 = inlined_call_operand.vmem [shape: f32[32,1], index: 9, kind: input, shape index: {}]   ;;  %s8491_s10 = inlined_call_operand.vmem [shape: f32[32,1], index: 10, kind: input, shape index: {}]   ;;  %s8492_s11 = inlined_call_operand.hbm [shape: f32[2,32,128], index: 11, kind: output, shape index: {}]  }
   0x1   :  { %18 = vsyncpa [#allocation3 + $0x1], 0 }
   0x2   :  { %19 = vsyncpa [#allocation4], 0 }
   0x3   :  { %21 = vsyncpa [#allocation4 + $0x1], 0  ;;  %s5133_s17 = smov 0   ;;  %s5135_s18 = smov 0  }
   0x4   :  { %s5137_s19 = smov 0   ;;  %s5139_s20 = smov 0  }
   0x5 LB: > { %8551 = sst [smem:[#allocation8_spill]] %s5057_s19  ;;  %s5154_s21 = sadd.s32 4294967295, %s5061_s20   ;;  %s5061_s20 = sphi %s5139_s20, %s8636_s20   ;;  %s5057_s19 = sphi %s5137_s19, %s8633_s19   ;;  %s5053_s18 = sphi %s5135_s18, %s8635_s18   ;;  %s5049_s17 = sphi %s5133_s17, %s8634_s17  }
   0x6   : > { %s4623_s22 = sadd.s32 4294967294, %s5061_s20   ;;  %s5158_s23 = sadd.s32 1, %s5061_s20  }
   0x7   : > { %s34_s24 = sadd.s32 1, %s5057_s19  ;;  %s31_s25 = ssub.s32 %s5061_s20, %s5158_s23 }
   0x8   : > { %p41_p0 = scmp.ne.s32.totalorder %s5057_s19, %s5053_s18  ;;  %p32_p1 = scmp.eq.s32.totalorder %s31_s25, 0 }
   0x9   : > { %p42_p2 = scmp.eq.s32.totalorder %s5061_s20, 0  ;;  %p47_p3 = scmp.ne.s32.totalorder %s5053_s18, %s5049_s17 }
   0xa   : > { %p48_p4 = scmp.eq.s32.totalorder %s5154_s21, 0  ;;  %p281_p7 = scmp.eq.s32.totalorder %s5154_s21, 1 }
   0xb   : > { %s5170_s26 = scalar_select %p32_p1, %s5057_s19, %s34_s24  }
   0xc   : > { %p5172_p5 = por %p42_p2, %p41_p0  ;;  %p5176_p6 = por %p48_p4, %p47_p3 }
   0xd   : > { %8552 = sst [smem:[#allocation9_spill]] %s5170_s26  ;;  %p287_p8 = scmp.eq.s32.totalorder %s4623_s22, 1 }
   0xe   : > { %p4759_p10 = scmp.lt.s32.totalorder %s5061_s20, 2  ;;  %p5183_p11 = por %p281_p7, %p41_p0 }
   0xf   : > { %p5187_p12 = por %p287_p8, %p47_p3  ;;  %s337_s12 = sand.u32 1, %s5057_s19  }
  0x10   : > { %s8555_s29 = scalar_select %p5183_p11, 1, 0 }
  0x11   : > { %s8556_s30 = scalar_select %p5187_p12, 1, 0 }
  0x12   : > { %s4681_s13 = sshll.u32 %s5061_s20, 11  ;;  %s4626_s14 = sshll.u32 %s337_s12, 7 }
  0x13   : > { %s5196_s24 = scalar_lea.hbm %s8481_s0, %s4681_s13  ;;  %s341_s22 = scalar_lea.vmem [#allocation2], %s4626_s14 }
  0x14   : > { %s348_s25 = sshll.u32 %s341_s22, 4  ;;  %p5200_p13 = pnand %p4759_p10, %p5172_p5  ;;  %s5204_s25 = int_to_ptr.vmem [resolvable:$true] %s348_s25 }
  0x15   : > { %s5206_s19 = scalar_lea.sflag [#allocation3], %s337_s12  ;;  %s4965_s15 = scalar_lea.hbm %s5196_s24, 2048 }
  0x16   : > { %p4966_p0 = scmp.ne.s32.totalorder %s5196_s24, %s4965_s15  ;;  %p4967_p1 = pneg %p5200_p13 }
  0x17   : > { %s4970_s14 = scalar_lea.hbm %s8481_s0, 4096  ;;  %p4971_p4 = scmp.lt.u32.totalorder %s5196_s24, %s8481_s0 }
  0x18   : > { %p4968_p2 = pnand %p4967_p1, %p4966_p0  ;;  %p4972_p5 = scmp.lt.u32.totalorder %s4970_s14, %s4965_s15 }
  0x19   : > { %p4974_p8 = scmp.lt.u32.totalorder %s4965_s15, %s5196_s24 }
  0x1a   : > { %p4969_p3 = pneg %p4968_p2  ;;  %p4973_p7 = por %p4972_p5, %p4971_p4 }
  0x1c   : > { %p4975_p10 = por %p4974_p8, %p4973_p7 }
  0x1e   : > { %p4976_p9 = pnand %p4975_p10, %p4969_p3 }
  0x20   : > { %4979 = shalt.err (!%p4976_p9)
}
  0x21   : > { %s4980_s12 = scalar_lea.vmem %s5204_s25, 2048  ;;  %s5063_s13 = smov [#allocation2]  }
  0x22   : > { %p4981_p0 = scmp.ne.s32.totalorder %s5204_s25, %s4980_s12  ;;  %s4985_s27 = sshll.u32 %s5063_s13, 4  ;;  %s4986_s27 = int_to_ptr.vmem [resolvable:$false] %s4985_s27 }
  0x23   : > { %s4987_s16 = scalar_lea.vmem %s4986_s27, 4096  ;;  %p4988_p11 = scmp.lt.s32.totalorder %s5204_s25, %s4986_s27 }
  0x24   : > { %p4983_p2 = pnand %p4981_p0, %p4967_p1  ;;  %p4989_p4 = scmp.lt.s32.totalorder %s4987_s16, %s4980_s12 }
  0x26   : > { %p4984_p12 = pneg %p4983_p2  ;;  %p4990_p5 = por %p4989_p4, %p4988_p11 }
  0x28   : > { %p4991_p7 = pnand %p4990_p5, %p4984_p12 }
  0x2a   : > { %4994 = shalt.err (!%p4991_p7)
}
  0x2b   : > { %s5064_s15 = smov 128   ;;  %s5065_s14 = smov 8  }
  0x2c   : > { %4754 = dma.hbm_to_vmem [thread:$0]  (!%p5200_p13), %s5196_s24, 2048, %s5204_s25, %s5206_s19, %s5064_s15, %s5064_s15, %s5065_s14  }
  0x2d   : > { %p4629_p9 = scmp.ge.s32.totalorder %s5061_s20, 1  ;;  %p356_p1 = scmp.lt.s32.totalorder %s5061_s20, 3 }
  0x2f   : > { %p357_p3 = pnand %p4629_p9, %p356_p1 }
  0x31   : > { %360 = sbr.rel (%p357_p3) target bundleno = 1153 (0x481), region = 64 }
  0x38   : > { %s5237_s22 = sand.u32 1, %s5053_s18  }
  0x39   : > { %s4630_s12 = sshll.u32 %s5237_s22, 7  ;;  %s363_s13 = scalar_lea.sflag [#allocation3], %s5237_s22 }
  0x3a   : > { %s5241_s27 = scalar_lea.vmem [#allocation2], %s4630_s12 }
  0x3b   : > { %5040 = dma.done.wait (%p5176_p6), %s363_s13, 2048  }
  0x3c   : > { %5042 = vsyncadd (%p5176_p6), %s363_s13, 4294965248  ;;  %v4923_v0 = vld [vmem:[%s8483_s2] sm:$0xff]   ;;  %v4924_v1 = vld [vmem:[%s8483_s2 + $0x8] sm:$0xff]   ;;  %vm498_vm0 = vcmask 1043456   ;;  %vm473_vm1 = vcmask 326656   ;;  %v661_v45 = vlaneseq  ;;  %vm741_vm2 = vcmask 1042432  }
  0x3d   : > { %4704 = vmatprep.subr.bf16.mxu0 %v4923_v0  ;;  %v4925_v2 = vld [vmem:[%s8483_s2 + $0x10] ss:$0 sps:$4 sm:$0xff]   ;;  %v406_v3 = vld [vmem:[%s5241_s27] sm:$0xff]  ;;  %v407_v4 = vld [vmem:[%s5241_s27 + $0x8] sm:$0xff]  ;;  %vm931_vm3 = vcmask 1046528   ;;  %vm1169_vm4 = vcmask 1045504  }
  0x3e   : > { %4705 = vmatpush3.bf16.msra.mxu0 %v4923_v0  ;;  %v4632_v5 = vld [vmem:[%s8482_s1] ss:$0 sm:$0xff]  ;;  %v408_v6 = vld [vmem:[%s5241_s27 + $0x10] sm:$0xff]  ;;  %v409_v9 = vld [vmem:[%s5241_s27 + $0x18] sm:$0xff]  ;;  %v500_v17 = vsel %vm498_vm0, %v4925_v2, 0  ;;  %v662_v47 = vshrl.u32 %v661_v45, 7 }
  0x3f   : > { %4706 = vmatprep.subr.bf16.mxu0 %v4924_v1  ;;  %v429_v7 = vmul.f32 %v4632_v5, %v406_v3  ;;  %v430_v8 = vmul.f32 %v4632_v5, %v407_v4  ;;  %v410_v10 = vld [vmem:[%s5241_s27 + $0x20] sm:$0xff]  ;;  %v411_v11 = vld [vmem:[%s5241_s27 + $0x28] sm:$0xff]  ;;  %v431_v13 = vmul.f32 %v4632_v5, %v408_v6  ;;  %v432_v14 = vmul.f32 %v4632_v5, %v409_v9  ;;  %v412_v20 = vld [vmem:[%s5241_s27 + $0x30] sm:$0xff]  ;;  %s5066_s15 = smov 96   ;;  %s5067_s28 = smov 32  }
  0x40   : > { %v433_v15 = vmul.f32 %v4632_v5, %v410_v10  ;;  %v434_v16 = vmul.f32 %v4632_v5, %v411_v11  ;;  %v413_v21 = vld [vmem:[%s5241_s27 + $0x38] sm:$0xff]  ;;  %v414_v22 = vld [vmem:[%s5241_s27 + $0x40] sm:$0xff]  ;;  %v415_v23 = vld [vmem:[%s5241_s27 + $0x48] sm:$0xff]  ;;  %v435_v24 = vmul.f32 %v4632_v5, %v412_v20  ;;  %v5298_v55 = vsub.s32 0, %v662_v47  ;;  %s5068_s14 = smov 64   ;;  %p8629_p11 = scmp.ne.s32.totalorder %s8555_s29, 0 }
  0x41   : > { %v445_v12 = vpack.c.bf16 %v430_v8, %v429_v7  ;;  %v446_v18 = vpack.c.bf16 %v432_v14, %v431_v13  ;;  %v436_v25 = vmul.f32 %v4632_v5, %v413_v21  ;;  %v437_v26 = vmul.f32 %v4632_v5, %v414_v22  ;;  %v416_v30 = vld [vmem:[%s5241_s27 + $0x50] sm:$0xff]  ;;  %v417_v31 = vld [vmem:[%s5241_s27 + $0x58] sm:$0xff]  ;;  %v418_v32 = vld [vmem:[%s5241_s27 + $0x60] sm:$0xff]  ;;  %s5070_s19 = smov [#allocation5]  }
  0x42   : > { %4707 = vmatpush3.bf16.msra.mxu0 %v4924_v1  ;;  %v447_v19 = vpack.c.bf16 %v434_v16, %v433_v15  ;;  %v438_v27 = vmul.f32 %v4632_v5, %v415_v23  ;;  %v419_v33 = vld [vmem:[%s5241_s27 + $0x68] sm:$0xff]  ;;  %v439_v34 = vmul.f32 %v4632_v5, %v416_v30  ;;  %v440_v35 = vmul.f32 %v4632_v5, %v417_v31  ;;  %v420_v40 = vld [vmem:[%s5241_s27 + $0x70] sm:$0xff]  ;;  %v421_v41 = vld [vmem:[%s5241_s27 + $0x78] sm:$0xff]  ;;  %s4631_s27 = sshll.u32 %s5237_s22, 5 }
  0x43   : > { %4746 = vmatprep.subr.msk.bf16.mxu0 %vm498_vm0, %v4925_v2  ;;  %4710 = vmatprep.mubr.msk.bf16.mxu0 %vm473_vm1, %v445_v12  ;;  %v448_v28 = vpack.c.bf16 %v436_v25, %v435_v24  ;;  %v441_v36 = vmul.f32 %v4632_v5, %v418_v32  ;;  %v442_v37 = vmul.f32 %v4632_v5, %v419_v33  ;;  %v5288_v46 = vld [vmem:[%s8484_s3] ss:$0 sm:$0xff]  ;;  %v5304_v62 = vsub.s32 7, %v662_v47  ;;  %s404_s24 = scalar_lea.vmem [#allocation5], %s4631_s27 }
  0x44   : > { %v449_v29 = vpack.c.bf16 %v438_v27, %v437_v26  ;;  %v450_v38 = vpack.c.bf16 %v440_v35, %v439_v34  ;;  %v443_v42 = vmul.f32 %v4632_v5, %v420_v40  ;;  %v444_v43 = vmul.f32 %v4632_v5, %v421_v41  ;;  %v5293_v49 = vld [vmem:[%s8485_s4] ss:$0 sm:$0xff] }
  0x45   : > { %v451_v39 = vpack.c.bf16 %v442_v37, %v441_v36  ;;  %vm1407_vm5 = vcmask 1044480   ;;  %vm2119_vm6 = vcmask 1041408   ;;  %vm2357_vm7 = vcmask 1040384  }
  0x46   : > { %4709 = vmatpush3.bf16.msra.mxu0 %v500_v17  ;;  %v452_v44 = vpack.c.bf16 %v444_v43, %v443_v42  ;;  %vm4348_vm8 = vcmask 261120   ;;  %vm4365_vm9 = vcmask 523264   ;;  %vm4382_vm10 = vcmask 785408  }
  0x49   : > { %4711 = vmatmul.mubr.msk.bf16.vlgmr.msra.gmra.mrb[0].mxu0 %vm473_vm1, %v446_v18 }
  0x4a   : > { %4714 = vmatprep.mubr.msk.bf16.mxu0 %vm473_vm1, %v447_v19 }
  0x51   : > { %4715 = vmatmul.mubr.msk.bf16.gmra.mrb[4].mxu0 %vm473_vm1, %v448_v28 }
  0x52   : > { %4718 = vmatprep.mubr.msk.bf16.mxu0 %vm473_vm1, %v449_v29 }
  0x59   : > { %4719 = vmatmul.mubr.msk.bf16.gmra.mrb[8].mxu0 %vm473_vm1, %v450_v38 }
  0x5a   : > { %4722 = vmatprep.mubr.msk.bf16.mxu0 %vm473_vm1, %v451_v39 }
  0x61   : > { %4723 = vmatmul.mubr.msk.bf16.gmra.mrb[12].mxu0 %vm473_vm1, %v452_v44 }
 0x11c   : > { %v4712_v48 = vpop.f32.mrb[0].mxu0 }
 0x11d   : > { %v608_v50 = vmul.f32 %v4712_v48, %v5288_v46  ;;  %v536_v51 = vpop.f32.mrb[1].mxu0 }
 0x11e   : > { %v606_v52 = vmul.f32 %v5288_v46, %v536_v51  ;;  %v4713_v53 = vpop.f32.mrb[2].mxu0 }
 0x11f   : > { %v631_v54 = vadd.f32 %v5293_v49, %v608_v50  ;;  %v609_v56 = vmul.f32 %v4713_v53, %v5288_v46  ;;  %v539_v57 = vpop.f32.mrb[3].mxu0 }
 0x120   : > { %v629_v58 = vadd.f32 %v5293_v49, %v606_v52  ;;  %v607_v59 = vmul.f32 %v5288_v46, %v539_v57 }
 0x121   : > { %v647_v60 = vmax.f32 %v631_v54, 0.0  ;;  %v632_v61 = vadd.f32 %v5293_v49, %v609_v56 }
 0x122   : > { %v645_v63 = vmax.f32 %v629_v58, 0.0  ;;  %v630_v0 = vadd.f32 %v5293_v49, %v607_v59 }
 0x123   : > { %v668_v1 = vrot.slane %v647_v60, %v5298_v55  ;;  %v745_v2 = vrot.slane %v647_v60, 5  ;;  %v648_v3 = vmax.f32 %v632_v61, 0.0 }
 0x124   : > { %v664_v4 = vrot.slane %v645_v63, %v5298_v55  ;;  %v742_v5 = vrot.slane %v645_v63, 5  ;;  %v646_v6 = vmax.f32 %v630_v0, 0.0  ;;  %v4716_v7 = vpop.f32.mrb[4].mxu0 }
 0x125   : > { %v5310_v8 = vsel %vm741_vm2, %v668_v1, %v745_v2  ;;  %v700_v9 = vrot.slane %v648_v3, %v5304_v62  ;;  %v746_v10 = vrot.slane %v648_v3, 5  ;;  %v612_v11 = vmul.f32 %v4716_v7, %v5288_v46  ;;  %v552_v12 = vpop.f32.mrb[5].mxu0 }
 0x126   : > { %v5315_v13 = vsel %vm741_vm2, %v664_v4, %v742_v5  ;;  %v696_v14 = vrot.slane %v646_v6, %v5304_v62  ;;  %v743_v15 = vrot.slane %v646_v6, 5  ;;  %v610_v16 = vmul.f32 %v5288_v46, %v552_v12  ;;  %v4717_v17 = vpop.f32.mrb[6].mxu0 }
 0x127   : > { %v5320_v18 = vsel %vm741_vm2, %v745_v2, %v746_v10  ;;  %v5323_v19 = vsel %vm741_vm2, %v746_v10, %v700_v9  ;;  %v635_v20 = vadd.f32 %v5293_v49, %v612_v11  ;;  %v613_v21 = vmul.f32 %v4717_v17, %v5288_v46  ;;  %v555_v22 = vpop.f32.mrb[7].mxu0 }
 0x128   : > { %v5328_v23 = vsel %vm741_vm2, %v742_v5, %v743_v15  ;;  %v5331_v24 = vsel %vm741_vm2, %v743_v15, %v696_v14  ;;  %v633_v25 = vadd.f32 %v5293_v49, %v610_v16  ;;  %v611_v26 = vmul.f32 %v5288_v46, %v555_v22 }
 0x129   : > { %v651_v27 = vmax.f32 %v635_v20, 0.0  ;;  %v636_v28 = vadd.f32 %v5293_v49, %v613_v21  ;;  %v3964_v29 = vrot.slane %v5315_v13, 1  ;;  %v3965_v30 = vrot.slane %v5328_v23, 1 }
 0x12a   : > { %v649_v31 = vmax.f32 %v633_v25, 0.0  ;;  %v634_v32 = vadd.f32 %v5293_v49, %v611_v26  ;;  %v3967_v33 = vrot.slane %v5331_v24, 1  ;;  %v4052_v34 = vrot.slane %v5315_v13, 2 }
 0x12b   : > { %v676_v35 = vrot.slane %v651_v27, %v5298_v55  ;;  %v751_v36 = vrot.slane %v651_v27, 5  ;;  %v652_v37 = vmax.f32 %v636_v28, 0.0  ;;  %v3966_v38 = vsel %vm931_vm3, %v3964_v29, %v3965_v30 }
 0x12c   : > { %v672_v39 = vrot.slane %v649_v31, %v5298_v55  ;;  %v748_v40 = vrot.slane %v649_v31, 5  ;;  %v650_v41 = vmax.f32 %v634_v32, 0.0  ;;  %v4720_v42 = vpop.f32.mrb[8].mxu0  ;;  %v3968_v43 = vsel %vm931_vm3, %v3965_v30, %v3967_v33 }
 0x12d   : > { %v5346_v44 = vsel %vm741_vm2, %v676_v35, %v751_v36  ;;  %v708_v45 = vrot.slane %v652_v37, %v5304_v62  ;;  %v752_v47 = vrot.slane %v652_v37, 5  ;;  %v616_v48 = vmul.f32 %v4720_v42, %v5288_v46  ;;  %v568_v50 = vpop.f32.mrb[9].mxu0 }
 0x12e   : > { %v5351_v51 = vsel %vm741_vm2, %v672_v39, %v748_v40  ;;  %v704_v52 = vrot.slane %v650_v41, %v5304_v62  ;;  %v749_v53 = vrot.slane %v650_v41, 5  ;;  %v614_v54 = vmul.f32 %v5288_v46, %v568_v50  ;;  %v4721_v56 = vpop.f32.mrb[10].mxu0  ;;  %v5401_v41 = vld [vmem:[%s8487_s6] ss:$0 sm:$0xff] }
 0x12f   : > { %v5356_v57 = vsel %vm741_vm2, %v751_v36, %v752_v47  ;;  %v5359_v58 = vsel %vm741_vm2, %v752_v47, %v708_v45  ;;  %v639_v59 = vadd.f32 %v5293_v49, %v616_v48  ;;  %v617_v60 = vmul.f32 %v4721_v56, %v5288_v46  ;;  %v571_v61 = vpop.f32.mrb[11].mxu0 }
 0x130   : > { %8558 = vst [vmem:[#allocation10_spill] sm:$0xff] %v5359_v58  ;;  %v5364_v63 = vsel %vm741_vm2, %v748_v40, %v749_v53  ;;  %v5367_v0 = vsel %vm741_vm2, %v749_v53, %v704_v52  ;;  %v637_v1 = vadd.f32 %v5293_v49, %v614_v54  ;;  %v615_v2 = vmul.f32 %v5288_v46, %v571_v61 }
 0x131   : > { %v655_v3 = vmax.f32 %v639_v59, 0.0  ;;  %v640_v4 = vadd.f32 %v5293_v49, %v617_v60  ;;  %v4028_v5 = vmax.f32 %v5315_v13, %v3966_v38  ;;  %v4029_v6 = vmax.f32 %v5328_v23, %v3968_v43 }
 0x132   : > { %v653_v7 = vmax.f32 %v637_v1, 0.0  ;;  %v638_v9 = vadd.f32 %v5293_v49, %v615_v2  ;;  %v4030_v10 = vmax.f32 %v5331_v24, %v3967_v33  ;;  %v4053_v11 = vrot.slane %v5328_v23, 2 }
 0x133   : > { %v684_v12 = vrot.slane %v655_v3, %v5298_v55  ;;  %v757_v14 = vrot.slane %v655_v3, 5  ;;  %v656_v15 = vmax.f32 %v640_v4, 0.0  ;;  %v4055_v16 = vrot.slane %v5331_v24, 2  ;;  %v5420_v4 = vld [vmem:[%s8487_s6 + $0x4] ss:$0 sm:$0xff] }
 0x134   : > { %v680_v17 = vrot.slane %v653_v7, %v5298_v55  ;;  %v754_v20 = vrot.slane %v653_v7, 5  ;;  %v654_v21 = vmax.f32 %v638_v9, 0.0  ;;  %v4724_v22 = vpop.f32.mrb[12].mxu0  ;;  %v4054_v25 = vsel %vm1169_vm4, %v4052_v34, %v4053_v11 }
 0x135   : > { %v5382_v26 = vsel %vm741_vm2, %v684_v12, %v757_v14  ;;  %v716_v27 = vrot.slane %v656_v15, %v5304_v62  ;;  %v758_v28 = vrot.slane %v656_v15, 5  ;;  %v620_v29 = vmul.f32 %v4724_v22, %v5288_v46  ;;  %v584_v30 = vpop.f32.mrb[13].mxu0 }
 0x136   : > { %8559 = vst [vmem:[#allocation11_spill] sm:$0xff] %v5382_v26  ;;  %v5387_v31 = vsel %vm741_vm2, %v680_v17, %v754_v20  ;;  %v712_v32 = vrot.slane %v654_v21, %v5304_v62  ;;  %v755_v33 = vrot.slane %v654_v21, 5  ;;  %v4056_v35 = vsel %vm1169_vm4, %v4053_v11, %v4055_v16  ;;  %v4725_v36 = vpop.f32.mrb[14].mxu0 }
 0x137   : > { %8560 = vst [vmem:[#allocation12_spill] sm:$0xff] %v5387_v31  ;;  %v5392_v34 = vsel %vm741_vm2, %v757_v14, %v758_v28  ;;  %v5395_v37 = vsel %vm741_vm2, %v758_v28, %v716_v27  ;;  %v643_v38 = vadd.f32 %v5293_v49, %v620_v29  ;;  %v4116_v39 = vmax.f32 %v4028_v5, %v4054_v25  ;;  %v587_v40 = vpop.f32.mrb[15].mxu0  ;;  %v5442_v25 = vld [vmem:[%s8487_s6 + $0x1] ss:$0 sm:$0xff] }
 0x138   : > { %8561 = vst [vmem:[#allocation13_spill] sm:$0xff] %v5392_v34  ;;  %8562 = vst [vmem:[#allocation14_spill] sm:$0xff] %v5395_v37  ;;  %v5404_v42 = vsel %vm741_vm2, %v754_v20, %v755_v33  ;;  %v5407_v43 = vsel %vm741_vm2, %v755_v33, %v712_v32  ;;  %v4117_v45 = vmax.f32 %v4029_v6, %v4056_v35 }
 0x139   : > { %8563 = vst [vmem:[#allocation15_spill] sm:$0xff] %v5404_v42  ;;  %8564 = vst [vmem:[#allocation16_spill] sm:$0xff] %v5407_v43  ;;  %v4118_v47 = vmax.f32 %v4030_v10, %v4055_v16  ;;  %v659_v48 = vmax.f32 %v643_v38, 0.0  ;;  %v4164_v50 = vrot.slane %v4116_v39, 2  ;;  %v618_v52 = vmul.f32 %v5288_v46, %v584_v30 }
 0x13a   : > { %v621_v53 = vmul.f32 %v4725_v36, %v5288_v46  ;;  %v4165_v54 = vrot.slane %v4117_v45, 2  ;;  %v619_v59 = vmul.f32 %v5288_v46, %v587_v40  ;;  %v2547_v60 = vmul.f32 %v5401_v41, %v5315_v13  ;;  %v5464_v36 = vld [vmem:[%s8487_s6 + $0x2] ss:$0 sm:$0xff] }
 0x13b   : > { %v4167_v56 = vrot.slane %v4118_v47, 2  ;;  %v692_v61 = vrot.slane %v659_v48, %v5298_v55  ;;  %v763_v1 = vrot.slane %v659_v48, 5  ;;  %v641_v2 = vadd.f32 %v5293_v49, %v618_v52 }
 0x13c   : > { %v644_v3 = vadd.f32 %v5293_v49, %v621_v53  ;;  %v4166_v5 = vsel %vm1169_vm4, %v4164_v50, %v4165_v54  ;;  %v642_v46 = vadd.f32 %v5293_v49, %v619_v59  ;;  %v2548_v7 = vmul.f32 %v5401_v41, %v5328_v23 }
 0x13d   : > { %v4168_v6 = vsel %vm1169_vm4, %v4165_v54, %v4167_v56  ;;  %v5428_v9 = vsel %vm741_vm2, %v692_v61, %v763_v1  ;;  %v657_v11 = vmax.f32 %v641_v2, 0.0  ;;  %v2549_v15 = vmul.f32 %v5401_v41, %v5331_v24 }
 0x13e   : > { %8565 = vst [vmem:[#allocation17_spill] sm:$0xff] %v5428_v9  ;;  %v4811_v10 = vpack.i.bf16 %v4168_v6, %v4166_v5  ;;  %v660_v12 = vmax.f32 %v644_v3, 0.0  ;;  %v658_v14 = vmax.f32 %v642_v46, 0.0  ;;  %v2600_v16 = vmul.f32 %v5420_v4, %v5310_v8 }
 0x13f   : > { %v2601_v17 = vmul.f32 %v5420_v4, %v5320_v18  ;;  %v688_v49 = vrot.slane %v657_v11, %v5298_v55  ;;  %v760_v20 = vrot.slane %v657_v11, 5  ;;  %v2602_v29 = vmul.f32 %v5420_v4, %v5323_v19  ;;  %v5450_v55 = vld [vmem:[%s8487_s6 + $0x5] ss:$0 sm:$0xff] }
 0x140   : > { %4812 = vrot.lane.b32.xlu1 %v4811_v10, %s5066_s15  ;;  %v724_v21 = vrot.slane %v660_v12, %v5304_v62  ;;  %v764_v22 = vrot.slane %v660_v12, 5  ;;  %v720_v27 = vrot.slane %v658_v14, %v5304_v62  ;;  %v761_v28 = vrot.slane %v658_v14, 5 }
 0x141   : > { %v2621_v30 = vadd.f32 %v2600_v16, %v2547_v60  ;;  %v5453_v32 = vsel %vm741_vm2, %v688_v49, %v760_v20  ;;  %v2622_v62 = vadd.f32 %v2601_v17, %v2548_v7  ;;  %v2623_v40 = vadd.f32 %v2602_v29, %v2549_v15  ;;  %v5493_v7 = vld [vmem:[%s8487_s6 + $0x6] ss:$0 sm:$0xff]  ;;  %v5501_v15 = vld [vmem:[%s8487_s6 + $0x3] ss:$0 sm:$0xff] }
 0x142   : > { %8566 = vst [vmem:[#allocation18_spill] sm:$0xff] %v5453_v32  ;;  %v5456_v33 = vsel %vm741_vm2, %v763_v1, %v764_v22  ;;  %v5459_v35 = vsel %vm741_vm2, %v764_v22, %v724_v21  ;;  %v5467_v38 = vsel %vm741_vm2, %v760_v20, %v761_v28  ;;  %v5470_v39 = vsel %vm741_vm2, %v761_v28, %v720_v27 }
 0x143   : > { %8567 = vst [vmem:[#allocation19_spill] sm:$0xff] %v5456_v33  ;;  %8568 = vst [vmem:[#allocation20_spill] sm:$0xff] %v5459_v35  ;;  %v2650_v45 = vmul.f32 %v5442_v25, %v5315_v13  ;;  %v2651_v47 = vmul.f32 %v5442_v25, %v5328_v23  ;;  %v2652_v48 = vmul.f32 %v5442_v25, %v5331_v24 }
 0x144   : > { %8569 = vst [vmem:[#allocation21_spill] sm:$0xff] %v5467_v38  ;;  %8570 = vst [vmem:[#allocation22_spill] sm:$0xff] %v5470_v39  ;;  %v2791_v50 = vmul.f32 %v5450_v55, %v5310_v8  ;;  %v2792_v52 = vmul.f32 %v5450_v55, %v5320_v18  ;;  %v2793_v54 = vmul.f32 %v5450_v55, %v5323_v19 }
 0x145   : > { %v2698_v53 = vrot.slane %v2650_v45, 1  ;;  %v2918_v56 = vmul.f32 %v5464_v36, %v5315_v13  ;;  %v2919_v59 = vmul.f32 %v5464_v36, %v5328_v23  ;;  %v2699_v60 = vrot.slane %v2651_v47, 1 }
 0x146   : > { %v2701_v61 = vrot.slane %v2652_v48, 1  ;;  %v2833_v1 = vrot.slane %v2791_v50, 1  ;;  %v2834_v2 = vrot.slane %v2792_v52, 1  ;;  %v2836_v3 = vrot.slane %v2793_v54, 1 }
 0x147   : > { %v2920_v5 = vmul.f32 %v5464_v36, %v5331_v24  ;;  %v2966_v6 = vrot.slane %v2918_v56, 2  ;;  %v2967_v46 = vrot.slane %v2919_v59, 2  ;;  %v2700_v10 = vsel %vm931_vm3, %v2698_v53, %v2699_v60 }
 0x148   : > { %v2702_v11 = vsel %vm931_vm3, %v2699_v60, %v2701_v61  ;;  %v2764_v12 = vadd.f32 %v2701_v61, %v2623_v40  ;;  %v2835_v14 = vsel %vm931_vm3, %v2833_v1, %v2834_v2  ;;  %v2762_v16 = vadd.f32 %v2700_v10, %v2621_v30 }
 0x149   : > { %v2763_v17 = vadd.f32 %v2702_v11, %v2622_v62  ;;  %v2837_v49 = vsel %vm931_vm3, %v2834_v2, %v2836_v3  ;;  %v2968_v20 = vsel %vm1169_vm4, %v2966_v6, %v2967_v46  ;;  %v2969_v22 = vrot.slane %v2920_v5, 2  ;;  %v5516_v62 = vld [vmem:[%s8487_s6 + $0x7] ss:$0 sm:$0xff] }
 0x14a   : > { %v2891_v21 = vadd.f32 %v2836_v3, %v2764_v12  ;;  %v3059_v27 = vmul.f32 %v5493_v7, %v5310_v8  ;;  %v3060_v28 = vmul.f32 %v5493_v7, %v5320_v18  ;;  %v2889_v29 = vadd.f32 %v2835_v14, %v2762_v16  ;;  %v5529_v3 = vld [vmem:[%s8488_s7] ss:$0 sm:$0xff] }
 0x14b   : > { %v2890_v40 = vadd.f32 %v2837_v49, %v2763_v17  ;;  %v3061_v45 = vmul.f32 %v5493_v7, %v5323_v19  ;;  %v3186_v30 = vmul.f32 %v5501_v15, %v5315_v13  ;;  %v2970_v47 = vsel %vm1169_vm4, %v2967_v46, %v2969_v22  ;;  %v5539_v17 = vld [vmem:[%s8488_s7 + $0x2] ss:$0 sm:$0xff] }
 0x14c   : > { %v3032_v48 = vadd.f32 %v2969_v22, %v2891_v21  ;;  %v3101_v50 = vrot.slane %v3059_v27, 2  ;;  %v3102_v52 = vrot.slane %v3060_v28, 2  ;;  %v3030_v53 = vadd.f32 %v2968_v20, %v2889_v29  ;;  %v5549_v27 = vld [vmem:[%s8488_s7 + $0x1] ss:$0 sm:$0xff] }
 0x14d   : > { %v3031_v54 = vadd.f32 %v2970_v47, %v2890_v40  ;;  %v3104_v56 = vrot.slane %v3061_v45, 2  ;;  %v3187_v59 = vmul.f32 %v5501_v15, %v5328_v23  ;;  %v3188_v61 = vmul.f32 %v5501_v15, %v5331_v24 }
 0x14e   : > { %v3103_v60 = vsel %vm1169_vm4, %v3101_v50, %v3102_v52  ;;  %v3234_v1 = vrot.slane %v3186_v30, 3  ;;  %v3327_v2 = vmul.f32 %v5516_v62, %v5310_v8  ;;  %v3328_v14 = vmul.f32 %v5516_v62, %v5320_v18 }
 0x14f   : > { %v3105_v5 = vsel %vm1169_vm4, %v3102_v52, %v3104_v56  ;;  %v3157_v6 = vadd.f32 %v3103_v60, %v3030_v53  ;;  %v3159_v46 = vadd.f32 %v3104_v56, %v3032_v48  ;;  %v3235_v10 = vrot.slane %v3187_v59, 3 }
 0x150   : > { %v3158_v11 = vadd.f32 %v3105_v5, %v3031_v54  ;;  %v3237_v12 = vrot.slane %v3188_v61, 3  ;;  %v3329_v16 = vmul.f32 %v5516_v62, %v5323_v19  ;;  %v3369_v20 = vrot.slane %v3327_v2, 3  ;;  %v5567_v2 = vld [vmem:[%s8488_s7 + $0x3] ss:$0 sm:$0xff] }
 0x151   : > { %v3236_v49 = vsel %vm1407_vm5, %v3234_v1, %v3235_v10  ;;  %v3518_v21 = vmul.f32 %v5529_v3, %v5315_v13  ;;  %v3519_v22 = vmul.f32 %v5529_v3, %v5328_v23  ;;  %v3370_v45 = vrot.slane %v3328_v14, 3 }
 0x152   : > { %v3238_v28 = vsel %vm1407_vm5, %v3235_v10, %v3237_v12  ;;  %v3298_v29 = vadd.f32 %v3236_v49, %v3157_v6  ;;  %v3300_v40 = vadd.f32 %v3237_v12, %v3159_v46  ;;  %v3372_v47 = vrot.slane %v3329_v16, 3 }
 0x153   : > { %v3299_v30 = vadd.f32 %v3238_v28, %v3158_v11  ;;  %v3520_v48 = vmul.f32 %v5529_v3, %v5331_v24  ;;  %v3571_v50 = vmul.f32 %v5539_v17, %v5310_v8  ;;  %v3371_v52 = vsel %vm1407_vm5, %v3369_v20, %v3370_v45 }
 0x154   : > { %v3572_v53 = vmul.f32 %v5539_v17, %v5320_v18  ;;  %v3573_v54 = vmul.f32 %v5539_v17, %v5323_v19  ;;  %v3621_v56 = vmul.f32 %v5549_v27, %v5315_v13  ;;  %v3373_v59 = vsel %vm1407_vm5, %v3370_v45, %v3372_v47 }
 0x155   : > { %v3425_v60 = vadd.f32 %v3371_v52, %v3298_v29  ;;  %v3427_v61 = vadd.f32 %v3372_v47, %v3300_v40  ;;  %v3592_v1 = vadd.f32 %v3571_v50, %v3518_v21  ;;  %v3426_v5 = vadd.f32 %v3373_v59, %v3299_v30 }
 0x156   : > { %v3593_v6 = vadd.f32 %v3572_v53, %v3519_v22  ;;  %v3594_v46 = vadd.f32 %v3573_v54, %v3520_v48  ;;  %v3622_v10 = vmul.f32 %v5549_v27, %v5328_v23  ;;  %v3623_v14 = vmul.f32 %v5549_v27, %v5331_v24 }
 0x157   : > { %v3473_v11 = vrot.slane %v3425_v60, 2  ;;  %v3476_v12 = vrot.slane %v3427_v61, 2  ;;  %v3669_v16 = vrot.slane %v3621_v56, 1  ;;  %v3474_v49 = vrot.slane %v3426_v5, 2 }
 0x158   : > { %v3670_v20 = vrot.slane %v3622_v10, 1  ;;  %v3762_v21 = vmul.f32 %v5567_v2, %v5310_v8  ;;  %v3763_v28 = vmul.f32 %v5567_v2, %v5320_v18  ;;  %v3672_v29 = vrot.slane %v3623_v14, 1 }
 0x159   : > { %v3764_v22 = vmul.f32 %v5567_v2, %v5323_v19  ;;  %v2550_v40 = vmul.f32 %v5401_v41, %v5310_v8  ;;  %v2551_v45 = vmul.f32 %v5401_v41, %v5320_v18  ;;  %v3475_v30 = vsel %vm1169_vm4, %v3473_v11, %v3474_v49 }
 0x15a   : > { %v3477_v47 = vsel %vm1169_vm4, %v3474_v49, %v3476_v12  ;;  %v3671_v48 = vsel %vm931_vm3, %v3669_v16, %v3670_v20  ;;  %v3804_v50 = vrot.slane %v3762_v21, 1  ;;  %v3673_v53 = vsel %vm931_vm3, %v3670_v20, %v3672_v29 }
 0x15b   : > { %v4801_v52 = vpack.i.bf16 %v3477_v47, %v3475_v30  ;;  %v3733_v54 = vadd.f32 %v3671_v48, %v3592_v1  ;;  %v3735_v56 = vadd.f32 %v3672_v29, %v3594_v46  ;;  %v3734_v59 = vadd.f32 %v3673_v53, %v3593_v6 }
 0x15c   : > { %v3805_v60 = vrot.slane %v3763_v28, 1  ;;  %v3807_v61 = vrot.slane %v3764_v22, 1  ;;  %v2552_v5 = vmul.f32 %v5401_v41, %v5323_v19  ;;  %v2603_v10 = vmul.f32 %v5420_v4, %v5351_v51 }
 0x15d   : > { %4802 = vrot.lane.b32.xlu0 %v4801_v52, %s5067_s28  ;;  %v2604_v11 = vmul.f32 %v5420_v4, %v5364_v63  ;;  %v2605_v12 = vmul.f32 %v5420_v4, %v5367_v0  ;;  %v2653_v1 = vmul.f32 %v5442_v25, %v5310_v8  ;;  %v2654_v16 = vmul.f32 %v5442_v25, %v5320_v18 }
 0x15e   : > { %v3806_v6 = vsel %vm931_vm3, %v3804_v50, %v3805_v60  ;;  %v3808_v46 = vsel %vm931_vm3, %v3805_v60, %v3807_v61  ;;  %v3862_v14 = vadd.f32 %v3807_v61, %v3735_v56  ;;  %v2624_v21 = vadd.f32 %v2603_v10, %v2550_v40 }
 0x15f   : > { %v3860_v49 = vadd.f32 %v3806_v6, %v3733_v54  ;;  %v3861_v20 = vadd.f32 %v3808_v46, %v3734_v59  ;;  %v2625_v28 = vadd.f32 %v2604_v11, %v2551_v45  ;;  %v2626_v22 = vadd.f32 %v2605_v12, %v2552_v5 }
 0x160   : > { %v3911_v29 = vrot.slane %v3862_v14, 3  ;;  %v2655_v30 = vmul.f32 %v5442_v25, %v5323_v19  ;;  %v2703_v47 = vrot.slane %v2653_v1, 1  ;;  %v2704_v53 = vrot.slane %v2654_v16, 1 }
 0x161   : > { %v3908_v48 = vrot.slane %v3860_v49, 3  ;;  %v3909_v52 = vrot.slane %v3861_v20, 3  ;;  %v2794_v50 = vmul.f32 %v5450_v55, %v5351_v51  ;;  %v2795_v60 = vmul.f32 %v5450_v55, %v5364_v63 }
 0x162   : > { %v2706_v56 = vrot.slane %v2655_v30, 1  ;;  %v2796_v40 = vmul.f32 %v5450_v55, %v5367_v0  ;;  %v2921_v45 = vmul.f32 %v5464_v36, %v5310_v8  ;;  %v2705_v61 = vsel %vm931_vm3, %v2703_v47, %v2704_v53 }
 0x163   : > { %v3910_v54 = vsel %vm1407_vm5, %v3908_v48, %v3909_v52  ;;  %v3912_v59 = vsel %vm1407_vm5, %v3909_v52, %v3911_v29  ;;  %v2838_v5 = vrot.slane %v2794_v50, 1  ;;  %v2765_v12 = vadd.f32 %v2705_v61, %v2624_v21 }
 0x164   : > { %v4806_v10 = vpack.i.bf16 %v3912_v59, %v3910_v54  ;;  %v2707_v11 = vsel %vm931_vm3, %v2704_v53, %v2706_v56  ;;  %v2767_v1 = vadd.f32 %v2706_v56, %v2626_v22  ;;  %v2839_v46 = vrot.slane %v2795_v60, 1 }
 0x165   : > { %v2766_v6 = vadd.f32 %v2707_v11, %v2625_v28  ;;  %v2841_v14 = vrot.slane %v2796_v40, 1  ;;  %v2922_v16 = vmul.f32 %v5464_v36, %v5320_v18  ;;  %v2923_v49 = vmul.f32 %v5464_v36, %v5323_v19 }
 0x166   : > { %4807 = vrot.lane.b32.xlu0 %v4806_v10, %s5068_s14  ;;  %v2971_v20 = vrot.slane %v2921_v45, 2  ;;  %v3062_v29 = vmul.f32 %v5493_v7, %v5351_v51  ;;  %v3063_v21 = vmul.f32 %v5493_v7, %v5364_v63  ;;  %v2840_v28 = vsel %vm931_vm3, %v2838_v5, %v2839_v46 }
 0x167   : > { %v2842_v22 = vsel %vm931_vm3, %v2839_v46, %v2841_v14  ;;  %v2894_v30 = vadd.f32 %v2841_v14, %v2767_v1  ;;  %v2972_v47 = vrot.slane %v2922_v16, 2  ;;  %v2892_v48 = vadd.f32 %v2840_v28, %v2765_v12 }
 0x168   : > { %v2893_v52 = vadd.f32 %v2842_v22, %v2766_v6  ;;  %v2974_v53 = vrot.slane %v2923_v49, 2  ;;  %v3064_v50 = vmul.f32 %v5493_v7, %v5367_v0  ;;  %v3106_v60 = vrot.slane %v3062_v29, 2 }
 0x169   : > { %v2973_v56 = vsel %vm1169_vm4, %v2971_v20, %v2972_v47  ;;  %v3107_v40 = vrot.slane %v3063_v21, 2  ;;  %v3189_v45 = vmul.f32 %v5501_v15, %v5310_v8  ;;  %v3190_v12 = vmul.f32 %v5501_v15, %v5320_v18 }
 0x16a   : > { %v2975_v54 = vsel %vm1169_vm4, %v2972_v47, %v2974_v53  ;;  %v3033_v59 = vadd.f32 %v2973_v56, %v2892_v48  ;;  %v3035_v61 = vadd.f32 %v2974_v53, %v2894_v30  ;;  %v3109_v5 = vrot.slane %v3064_v50, 2 }
 0x16b   : > { %v3034_v10 = vadd.f32 %v2975_v54, %v2893_v52  ;;  %v3108_v11 = vsel %vm1169_vm4, %v3106_v60, %v3107_v40  ;;  %v3191_v1 = vmul.f32 %v5501_v15, %v5323_v19  ;;  %v3239_v16 = vrot.slane %v3189_v45, 3 }
 0x16c   : > { %v3110_v6 = vsel %vm1169_vm4, %v3107_v40, %v3109_v5  ;;  %v3160_v46 = vadd.f32 %v3108_v11, %v3033_v59  ;;  %v3162_v14 = vadd.f32 %v3109_v5, %v3035_v61  ;;  %v3240_v20 = vrot.slane %v3190_v12, 3 }
 0x16d   : > { %v3161_v49 = vadd.f32 %v3110_v6, %v3034_v10  ;;  %v3242_v29 = vrot.slane %v3191_v1, 3  ;;  %v3330_v21 = vmul.f32 %v5516_v62, %v5351_v51  ;;  %v3331_v28 = vmul.f32 %v5516_v62, %v5364_v63 }
 0x16e   : > { %v3332_v22 = vmul.f32 %v5516_v62, %v5367_v0  ;;  %v3521_v30 = vmul.f32 %v5529_v3, %v5310_v8  ;;  %v3522_v47 = vmul.f32 %v5529_v3, %v5320_v18  ;;  %v3241_v48 = vsel %vm1407_vm5, %v3239_v16, %v3240_v20 }
 0x16f   : > { %v3243_v52 = vsel %vm1407_vm5, %v3240_v20, %v3242_v29  ;;  %v3303_v53 = vadd.f32 %v3242_v29, %v3162_v14  ;;  %v3374_v50 = vrot.slane %v3330_v21, 3  ;;  %v3301_v56 = vadd.f32 %v3241_v48, %v3160_v46 }
 0x170   : > { %v3302_v60 = vadd.f32 %v3243_v52, %v3161_v49  ;;  %v3375_v40 = vrot.slane %v3331_v28, 3  ;;  %v3377_v45 = vrot.slane %v3332_v22, 3  ;;  %v3523_v54 = vmul.f32 %v5529_v3, %v5323_v19 }
 0x171   : > { %v3574_v59 = vmul.f32 %v5539_v17, %v5351_v51  ;;  %v3575_v61 = vmul.f32 %v5539_v17, %v5364_v63  ;;  %v3576_v5 = vmul.f32 %v5539_v17, %v5367_v0  ;;  %v3624_v1 = vmul.f32 %v5549_v27, %v5310_v8 }
 0x172   : > { %v3376_v10 = vsel %vm1407_vm5, %v3374_v50, %v3375_v40  ;;  %v3378_v11 = vsel %vm1407_vm5, %v3375_v40, %v3377_v45  ;;  %v3430_v12 = vadd.f32 %v3377_v45, %v3303_v53  ;;  %v3625_v29 = vmul.f32 %v5549_v27, %v5320_v18 }
 0x173   : > { %v3428_v6 = vadd.f32 %v3376_v10, %v3301_v56  ;;  %v3429_v46 = vadd.f32 %v3378_v11, %v3302_v60  ;;  %v3595_v14 = vadd.f32 %v3574_v59, %v3521_v30  ;;  %v3596_v16 = vadd.f32 %v3575_v61, %v3522_v47 }
 0x174   : > { %v3481_v49 = vrot.slane %v3430_v12, 2  ;;  %v3597_v20 = vadd.f32 %v3576_v5, %v3523_v54  ;;  %v3626_v21 = vmul.f32 %v5549_v27, %v5323_v19  ;;  %v3674_v48 = vrot.slane %v3624_v1, 1 }
 0x175   : > { %v3478_v28 = vrot.slane %v3428_v6, 2  ;;  %v3479_v22 = vrot.slane %v3429_v46, 2  ;;  %v3765_v52 = vmul.f32 %v5567_v2, %v5351_v51  ;;  %v3675_v53 = vrot.slane %v3625_v29, 1 }
 0x176   : > { %v3677_v50 = vrot.slane %v3626_v21, 1  ;;  %v3766_v30 = vmul.f32 %v5567_v2, %v5364_v63  ;;  %v3767_v47 = vmul.f32 %v5567_v2, %v5367_v0  ;;  %v3969_v45 = vrot.slane %v5310_v8, 1 }
 0x177   : > { %v3480_v56 = vsel %vm1169_vm4, %v3478_v28, %v3479_v22  ;;  %v3482_v60 = vsel %vm1169_vm4, %v3479_v22, %v3481_v49  ;;  %v3809_v40 = vrot.slane %v3765_v52, 1  ;;  %v3676_v59 = vsel %vm931_vm3, %v3674_v48, %v3675_v53 }
 0x178   : > { %v4821_v54 = vpack.i.bf16 %v3482_v60, %v3480_v56  ;;  %v3678_v61 = vsel %vm931_vm3, %v3675_v53, %v3677_v50  ;;  %v3738_v5 = vadd.f32 %v3677_v50, %v3597_v20  ;;  %v3736_v10 = vadd.f32 %v3676_v59, %v3595_v14 }
 0x179   : > { %v3737_v11 = vadd.f32 %v3678_v61, %v3596_v16  ;;  %v3810_v12 = vrot.slane %v3766_v30, 1  ;;  %v3812_v1 = vrot.slane %v3767_v47, 1  ;;  %v3970_v6 = vrot.slane %v5320_v18, 1 }
 0x17a   : > { %4822 = vrot.lane.b32.xlu1 %v4821_v54, %s5067_s28  ;;  %v3972_v46 = vrot.slane %v5323_v19, 1  ;;  %v4057_v49 = vrot.slane %v5310_v8, 2  ;;  %v4058_v29 = vrot.slane %v5320_v18, 2  ;;  %v4060_v14 = vrot.slane %v5323_v19, 2 }
 0x17b   : > { %v3811_v21 = vsel %vm931_vm3, %v3809_v40, %v3810_v12  ;;  %v3813_v28 = vsel %vm931_vm3, %v3810_v12, %v3812_v1  ;;  %v3865_v22 = vadd.f32 %v3812_v1, %v3738_v5  ;;  %v3971_v48 = vsel %vm931_vm3, %v3969_v45, %v3970_v6 }
 0x17c   : > { %v3863_v16 = vadd.f32 %v3811_v21, %v3736_v10  ;;  %v3864_v20 = vadd.f32 %v3813_v28, %v3737_v11  ;;  %v3973_v52 = vsel %vm931_vm3, %v3970_v6, %v3972_v46  ;;  %v4031_v50 = vmax.f32 %v5310_v8, %v3971_v48 }
 0x17d   : > { %v3916_v53 = vrot.slane %v3865_v22, 3  ;;  %v4032_v30 = vmax.f32 %v5320_v18, %v3973_v52  ;;  %v4033_v47 = vmax.f32 %v5323_v19, %v3972_v46  ;;  %v4059_v40 = vsel %vm1169_vm4, %v4057_v49, %v4058_v29 }
 0x17e   : > { %v3913_v56 = vrot.slane %v3863_v16, 3  ;;  %v3914_v60 = vrot.slane %v3864_v20, 3  ;;  %v4061_v54 = vsel %vm1169_vm4, %v4058_v29, %v4060_v14  ;;  %v4119_v59 = vmax.f32 %v4031_v50, %v4059_v40 }
 0x17f   : > { %v4120_v61 = vmax.f32 %v4032_v30, %v4061_v54  ;;  %v4121_v5 = vmax.f32 %v4033_v47, %v4060_v14  ;;  %v2553_v45 = vmul.f32 %v5401_v41, %v5351_v51  ;;  %v2554_v12 = vmul.f32 %v5401_v41, %v5364_v63 }
 0x180   : > { %v3915_v10 = vsel %vm1407_vm5, %v3913_v56, %v3914_v60  ;;  %v3917_v11 = vsel %vm1407_vm5, %v3914_v60, %v3916_v53  ;;  %v2555_v1 = vmul.f32 %v5401_v41, %v5367_v0  ;;  %v4169_v46 = vrot.slane %v4119_v59, 2 }
 0x181   : > { %v4816_v6 = vpack.i.bf16 %v3917_v11, %v3915_v10  ;;  %v4170_v49 = vrot.slane %v4120_v61, 2  ;;  %v4172_v29 = vrot.slane %v4121_v5, 2  ;;  %v2606_v21 = vmul.f32 %v5420_v4, %v5346_v44 }
 0x182   : > { %v2607_v28 = vmul.f32 %v5420_v4, %v5356_v57  ;;  %v2608_v22 = vmul.f32 %v5420_v4, %v5359_v58  ;;  %v2656_v14 = vmul.f32 %v5442_v25, %v5351_v51  ;;  %v2657_v48 = vmul.f32 %v5442_v25, %v5364_v63 }
 0x183   : > { %4817 = vrot.lane.b32.xlu0 %v4816_v6, %s5068_s14  ;;  %v4171_v16 = vsel %vm1169_vm4, %v4169_v46, %v4170_v49  ;;  %v4173_v20 = vsel %vm1169_vm4, %v4170_v49, %v4172_v29  ;;  %v2658_v52 = vmul.f32 %v5442_v25, %v5367_v0  ;;  %v2627_v50 = vadd.f32 %v2606_v21, %v2553_v45 }
 0x184   : > { %v4826_v53 = vpack.i.bf16 %v4173_v20, %v4171_v16  ;;  %v2628_v30 = vadd.f32 %v2607_v28, %v2554_v12  ;;  %v2629_v47 = vadd.f32 %v2608_v22, %v2555_v1  ;;  %v2708_v56 = vrot.slane %v2656_v14, 1 }
 0x185   : > { %v2709_v60 = vrot.slane %v2657_v48, 1  ;;  %v2711_v40 = vrot.slane %v2658_v52, 1  ;;  %v2797_v54 = vmul.f32 %v5450_v55, %v5346_v44  ;;  %v2798_v59 = vmul.f32 %v5450_v55, %v5356_v57 }
 0x186   : > { %4827 = vrot.lane.b32.xlu1 %v4826_v53, %s5066_s15  ;;  %v2799_v61 = vmul.f32 %v5450_v55, %v5359_v58  ;;  %v2924_v5 = vmul.f32 %v5464_v36, %v5351_v51  ;;  %v2925_v45 = vmul.f32 %v5464_v36, %v5364_v63  ;;  %v2926_v21 = vmul.f32 %v5464_v36, %v5367_v0 }
 0x187   : > { %v2710_v10 = vsel %vm931_vm3, %v2708_v56, %v2709_v60  ;;  %v2712_v11 = vsel %vm931_vm3, %v2709_v60, %v2711_v40  ;;  %v2770_v12 = vadd.f32 %v2711_v40, %v2629_v47  ;;  %v2843_v1 = vrot.slane %v2797_v54, 1 }
 0x188   : > { %v2768_v6 = vadd.f32 %v2710_v10, %v2627_v50  ;;  %v2769_v46 = vadd.f32 %v2712_v11, %v2628_v30  ;;  %v2844_v49 = vrot.slane %v2798_v59, 1  ;;  %v2846_v29 = vrot.slane %v2799_v61, 1 }
 0x189   : > { %v2976_v28 = vrot.slane %v2924_v5, 2  ;;  %v2977_v22 = vrot.slane %v2925_v45, 2  ;;  %v3065_v14 = vmul.f32 %v5493_v7, %v5346_v44  ;;  %v3066_v52 = vmul.f32 %v5493_v7, %v5356_v57 }
 0x18a   : > { %v2845_v16 = vsel %vm931_vm3, %v2843_v1, %v2844_v49  ;;  %v2847_v20 = vsel %vm931_vm3, %v2844_v49, %v2846_v29  ;;  %v2897_v48 = vadd.f32 %v2846_v29, %v2770_v12  ;;  %v2979_v47 = vrot.slane %v2926_v21, 2 }
 0x18b   : > { %v2895_v53 = vadd.f32 %v2845_v16, %v2768_v6  ;;  %v2896_v50 = vadd.f32 %v2847_v20, %v2769_v46  ;;  %v2978_v30 = vsel %vm1169_vm4, %v2976_v28, %v2977_v22  ;;  %v3067_v56 = vmul.f32 %v5493_v7, %v5359_v58 }
 0x18c   : > { %v3111_v60 = vrot.slane %v3065_v14, 2  ;;  %v3112_v40 = vrot.slane %v3066_v52, 2  ;;  %v3192_v54 = vmul.f32 %v5501_v15, %v5351_v51  ;;  %v2980_v59 = vsel %vm1169_vm4, %v2977_v22, %v2979_v47 }
 0x18d   : > { %v3036_v61 = vadd.f32 %v2978_v30, %v2895_v53  ;;  %v3038_v5 = vadd.f32 %v2979_v47, %v2897_v48  ;;  %v3193_v45 = vmul.f32 %v5501_v15, %v5364_v63  ;;  %v3037_v10 = vadd.f32 %v2980_v59, %v2896_v50 }
 0x18e   : > { %v3113_v11 = vsel %vm1169_vm4, %v3111_v60, %v3112_v40  ;;  %v3114_v12 = vrot.slane %v3067_v56, 2  ;;  %v3194_v1 = vmul.f32 %v5501_v15, %v5367_v0  ;;  %v3244_v46 = vrot.slane %v3192_v54, 3 }
 0x18f   : > { %v3163_v6 = vadd.f32 %v3113_v11, %v3036_v61  ;;  %v3245_v49 = vrot.slane %v3193_v45, 3  ;;  %v3333_v29 = vmul.f32 %v5516_v62, %v5346_v44  ;;  %v3334_v14 = vmul.f32 %v5516_v62, %v5356_v57 }
 0x190   : > { %v3115_v21 = vsel %vm1169_vm4, %v3112_v40, %v3114_v12  ;;  %v3165_v28 = vadd.f32 %v3114_v12, %v3038_v5  ;;  %v3247_v22 = vrot.slane %v3194_v1, 3  ;;  %v3335_v48 = vmul.f32 %v5516_v62, %v5359_v58 }
 0x191   : > { %v3164_v16 = vadd.f32 %v3115_v21, %v3037_v10  ;;  %v3246_v20 = vsel %vm1407_vm5, %v3244_v46, %v3245_v49  ;;  %v3379_v52 = vrot.slane %v3333_v29, 3  ;;  %v3380_v47 = vrot.slane %v3334_v14, 3 }
 0x192   : > { %v3248_v53 = vsel %vm1407_vm5, %v3245_v49, %v3247_v22  ;;  %v3304_v50 = vadd.f32 %v3246_v20, %v3163_v6  ;;  %v3306_v30 = vadd.f32 %v3247_v22, %v3165_v28  ;;  %v3382_v60 = vrot.slane %v3335_v48, 3 }
 0x193   : > { %v3305_v56 = vadd.f32 %v3248_v53, %v3164_v16  ;;  %v3524_v40 = vmul.f32 %v5529_v3, %v5351_v51  ;;  %v3525_v54 = vmul.f32 %v5529_v3, %v5364_v63  ;;  %v3381_v59 = vsel %vm1407_vm5, %v3379_v52, %v3380_v47 }
 0x194   : > { %v3526_v61 = vmul.f32 %v5529_v3, %v5367_v0  ;;  %v3577_v5 = vmul.f32 %v5539_v17, %v5346_v44  ;;  %v3578_v45 = vmul.f32 %v5539_v17, %v5356_v57  ;;  %v3383_v10 = vsel %vm1407_vm5, %v3380_v47, %v3382_v60 }
 0x195   : > { %v3431_v11 = vadd.f32 %v3381_v59, %v3304_v50  ;;  %v3433_v12 = vadd.f32 %v3382_v60, %v3306_v30  ;;  %v3579_v1 = vmul.f32 %v5539_v17, %v5359_v58  ;;  %v3432_v6 = vadd.f32 %v3383_v10, %v3305_v56 }
 0x196   : > { %v3598_v46 = vadd.f32 %v3577_v5, %v3524_v40  ;;  %v3599_v49 = vadd.f32 %v3578_v45, %v3525_v54  ;;  %v3627_v29 = vmul.f32 %v5549_v27, %v5351_v51  ;;  %v3628_v14 = vmul.f32 %v5549_v27, %v5364_v63 }
 0x197   : > { %v3483_v21 = vrot.slane %v3431_v11, 2  ;;  %v3486_v28 = vrot.slane %v3433_v12, 2  ;;  %v3600_v22 = vadd.f32 %v3579_v1, %v3526_v61  ;;  %v3484_v16 = vrot.slane %v3432_v6, 2 }
 0x198   : > { %v3629_v20 = vmul.f32 %v5549_v27, %v5367_v0  ;;  %v3679_v48 = vrot.slane %v3627_v29, 1  ;;  %v3768_v52 = vmul.f32 %v5567_v2, %v5346_v44  ;;  %v3680_v53 = vrot.slane %v3628_v14, 1 }
 0x199   : > { %v3769_v50 = vmul.f32 %v5567_v2, %v5356_v57  ;;  %v3770_v30 = vmul.f32 %v5567_v2, %v5359_v58  ;;  %v3974_v47 = vrot.slane %v5351_v51, 1  ;;  %v3485_v56 = vsel %vm1169_vm4, %v3483_v21, %v3484_v16 }
 0x19a   : > { %v3487_v60 = vsel %vm1169_vm4, %v3484_v16, %v3486_v28  ;;  %v3682_v40 = vrot.slane %v3629_v20, 1  ;;  %v3814_v54 = vrot.slane %v3768_v52, 1  ;;  %v3681_v61 = vsel %vm931_vm3, %v3679_v48, %v3680_v53 }
 0x19b   : > { %v4836_v59 = vpack.i.bf16 %v3487_v60, %v3485_v56  ;;  %v3815_v5 = vrot.slane %v3769_v50, 1  ;;  %v3817_v45 = vrot.slane %v3770_v30, 1  ;;  %v3739_v11 = vadd.f32 %v3681_v61, %v3598_v46 }
 0x19c   : > { %v3683_v10 = vsel %vm931_vm3, %v3680_v53, %v3682_v40  ;;  %v3741_v12 = vadd.f32 %v3682_v40, %v3600_v22  ;;  %v3975_v1 = vrot.slane %v5364_v63, 1  ;;  %v3977_v28 = vrot.slane %v5367_v0, 1 }
 0x19d   : > { %4837 = vrot.lane.b32.xlu0 %v4836_v59, %s5067_s28  ;;  %v3740_v6 = vadd.f32 %v3683_v10, %v3599_v49  ;;  %v3816_v29 = vsel %vm931_vm3, %v3814_v54, %v3815_v5  ;;  %v3818_v21 = vsel %vm931_vm3, %v3815_v5, %v3817_v45  ;;  %v4062_v48 = vrot.slane %v5351_v51, 2 }
 0x19e   : > { %v3866_v14 = vadd.f32 %v3816_v29, %v3739_v11  ;;  %v3868_v16 = vadd.f32 %v3817_v45, %v3741_v12  ;;  %v3976_v20 = vsel %vm931_vm3, %v3974_v47, %v3975_v1  ;;  %v3978_v46 = vsel %vm931_vm3, %v3975_v1, %v3977_v28 }
 0x19f   : > { %v3867_v52 = vadd.f32 %v3818_v21, %v3740_v6  ;;  %v4034_v22 = vmax.f32 %v5351_v51, %v3976_v20  ;;  %v4036_v53 = vmax.f32 %v5367_v0, %v3977_v28  ;;  %v4035_v30 = vmax.f32 %v5364_v63, %v3978_v46 }
 0x1a0   : > { %v3918_v49 = vrot.slane %v3866_v14, 3  ;;  %v3921_v50 = vrot.slane %v3868_v16, 3  ;;  %v4063_v56 = vrot.slane %v5364_v63, 2  ;;  %v4065_v40 = vrot.slane %v5367_v0, 2 }
 0x1a1   : > { %v3919_v60 = vrot.slane %v3867_v52, 3  ;;  %v2556_v47 = vmul.f32 %v5401_v41, %v5346_v44  ;;  %v2557_v54 = vmul.f32 %v5401_v41, %v5356_v57  ;;  %v2558_v61 = vmul.f32 %v5401_v41, %v5359_v58 }
 0x1a2   : > { %v4064_v59 = vsel %vm1169_vm4, %v4062_v48, %v4063_v56  ;;  %v2609_v5 = vmul.f32 %v5420_v4, %v5387_v31  ;;  %v2610_v45 = vmul.f32 %v5420_v4, %v5404_v42  ;;  %v4066_v12 = vsel %vm1169_vm4, %v4063_v56, %v4065_v40 }
 0x1a3   : > { %v3920_v10 = vsel %vm1407_vm5, %v3918_v49, %v3919_v60  ;;  %v3922_v11 = vsel %vm1407_vm5, %v3919_v60, %v3921_v50  ;;  %v4122_v1 = vmax.f32 %v4034_v22, %v4064_v59  ;;  %v4123_v29 = vmax.f32 %v4035_v30, %v4066_v12 }
 0x1a4   : > { %v4831_v6 = vpack.i.bf16 %v3922_v11, %v3920_v10  ;;  %v4124_v21 = vmax.f32 %v4036_v53, %v4065_v40  ;;  %v2611_v28 = vmul.f32 %v5420_v4, %v5407_v43  ;;  %v2630_v14 = vadd.f32 %v2609_v5, %v2556_v47 }
 0x1a5   : > { %v4174_v41 = vrot.slane %v4122_v1, 2  ;;  %v2631_v16 = vadd.f32 %v2610_v45, %v2557_v54  ;;  %v2659_v20 = vmul.f32 %v5442_v25, %v5346_v44  ;;  %v4175_v48 = vrot.slane %v4123_v29, 2 }
 0x1a6   : > { %4832 = vrot.lane.b32.xlu1 %v4831_v6, %s5068_s14  ;;  %v4177_v52 = vrot.slane %v4124_v21, 2  ;;  %v2632_v46 = vadd.f32 %v2611_v28, %v2558_v61  ;;  %v2660_v22 = vmul.f32 %v5442_v25, %v5356_v57  ;;  %v2661_v53 = vmul.f32 %v5442_v25, %v5359_v58 }
 0x1a7   : > { %v2713_v49 = vrot.slane %v2659_v20, 1  ;;  %v2800_v4 = vmul.f32 %v5450_v55, %v5387_v31  ;;  %v2801_v50 = vmul.f32 %v5450_v55, %v5404_v42  ;;  %v4176_v30 = vsel %vm1169_vm4, %v4174_v41, %v4175_v48 }
 0x1a8   : > { %v4178_v56 = vsel %vm1169_vm4, %v4175_v48, %v4177_v52  ;;  %v2714_v60 = vrot.slane %v2660_v22, 1  ;;  %v2802_v40 = vmul.f32 %v5450_v55, %v5407_v43  ;;  %v2716_v54 = vrot.slane %v2661_v53, 1 }
 0x1a9   : > { %v4841_v47 = vpack.i.bf16 %v4178_v56, %v4176_v30  ;;  %v2848_v59 = vrot.slane %v2800_v4, 1  ;;  %v2849_v61 = vrot.slane %v2801_v50, 1  ;;  %v2927_v45 = vmul.f32 %v5464_v36, %v5346_v44 }
 0x1aa   : > { %v2715_v25 = vsel %vm931_vm3, %v2713_v49, %v2714_v60  ;;  %v2851_v5 = vrot.slane %v2802_v40, 1  ;;  %v2928_v10 = vmul.f32 %v5464_v36, %v5356_v57  ;;  %v2717_v11 = vsel %vm931_vm3, %v2714_v60, %v2716_v54 }
 0x1ab   : > { %4842 = vrot.lane.b32.xlu0 %v4841_v47, %s5066_s15  ;;  %v2771_v12 = vadd.f32 %v2715_v25, %v2630_v14  ;;  %v2773_v1 = vadd.f32 %v2716_v54, %v2632_v46  ;;  %v2850_v55 = vsel %vm931_vm3, %v2848_v59, %v2849_v61  ;;  %v2772_v6 = vadd.f32 %v2717_v11, %v2631_v16 }
 0x1ac   : > { %v2852_v29 = vsel %vm931_vm3, %v2849_v61, %v2851_v5  ;;  %v2929_v21 = vmul.f32 %v5464_v36, %v5359_v58  ;;  %v2981_v28 = vrot.slane %v2927_v45, 2  ;;  %v2982_v48 = vrot.slane %v2928_v10, 2 }
 0x1ad   : > { %v2898_v41 = vadd.f32 %v2850_v55, %v2771_v12  ;;  %v2900_v20 = vadd.f32 %v2851_v5, %v2773_v1  ;;  %v3068_v52 = vmul.f32 %v5493_v7, %v5387_v31  ;;  %v2899_v22 = vadd.f32 %v2852_v29, %v2772_v6 }
 0x1ae   : > { %v2984_v53 = vrot.slane %v2929_v21, 2  ;;  %v3069_v14 = vmul.f32 %v5493_v7, %v5404_v42  ;;  %v3070_v16 = vmul.f32 %v5493_v7, %v5407_v43  ;;  %v2983_v46 = vsel %vm1169_vm4, %v2981_v28, %v2982_v48 }
 0x1af   : > { %v3116_v49 = vrot.slane %v3068_v52, 2  ;;  %v3195_v36 = vmul.f32 %v5501_v15, %v5346_v44  ;;  %v3196_v4 = vmul.f32 %v5501_v15, %v5356_v57  ;;  %v3039_v30 = vadd.f32 %v2983_v46, %v2898_v41 }
 0x1b0   : > { %v2985_v50 = vsel %vm1169_vm4, %v2982_v48, %v2984_v53  ;;  %v3041_v56 = vadd.f32 %v2984_v53, %v2900_v20  ;;  %v3117_v60 = vrot.slane %v3069_v14, 2  ;;  %v3119_v47 = vrot.slane %v3070_v16, 2 }
 0x1b1   : > { %v3040_v40 = vadd.f32 %v2985_v50, %v2899_v22  ;;  %v3197_v54 = vmul.f32 %v5501_v15, %v5359_v58  ;;  %v3249_v7 = vrot.slane %v3195_v36, 3  ;;  %v3250_v61 = vrot.slane %v3196_v4, 3 }
 0x1b2   : > { %v3118_v59 = vsel %vm1169_vm4, %v3116_v49, %v3117_v60  ;;  %v3336_v25 = vmul.f32 %v5516_v62, %v5387_v31  ;;  %v3337_v5 = vmul.f32 %v5516_v62, %v5404_v42  ;;  %v3120_v45 = vsel %vm1169_vm4, %v3117_v60, %v3119_v47 }
 0x1b3   : > { %v3166_v10 = vadd.f32 %v3118_v59, %v3039_v30  ;;  %v3168_v11 = vadd.f32 %v3119_v47, %v3041_v56  ;;  %v3252_v12 = vrot.slane %v3197_v54, 3  ;;  %v3167_v1 = vadd.f32 %v3120_v45, %v3040_v40 }
 0x1b4   : > { %v3251_v55 = vsel %vm1407_vm5, %v3249_v7, %v3250_v61  ;;  %v3338_v15 = vmul.f32 %v5516_v62, %v5407_v43  ;;  %v3384_v6 = vrot.slane %v3336_v25, 3  ;;  %v3385_v41 = vrot.slane %v3337_v5, 3 }
 0x1b5   : > { %v3253_v29 = vsel %vm1407_vm5, %v3250_v61, %v3252_v12  ;;  %v3307_v21 = vadd.f32 %v3251_v55, %v3166_v10  ;;  %v3309_v28 = vadd.f32 %v3252_v12, %v3168_v11  ;;  %v3527_v52 = vmul.f32 %v5529_v3, %v5346_v44 }
 0x1b6   : > { %v3308_v20 = vadd.f32 %v3253_v29, %v3167_v1  ;;  %v3387_v48 = vrot.slane %v3338_v15, 3  ;;  %v3528_v22 = vmul.f32 %v5529_v3, %v5356_v57  ;;  %v3386_v53 = vsel %vm1407_vm5, %v3384_v6, %v3385_v41 }
 0x1b7   : > { %v3529_v14 = vmul.f32 %v5529_v3, %v5359_v58  ;;  %v3580_v62 = vmul.f32 %v5539_v17, %v5387_v31  ;;  %v3581_v16 = vmul.f32 %v5539_v17, %v5404_v42  ;;  %v3434_v49 = vadd.f32 %v3386_v53, %v3307_v21 }
 0x1b8   : > { %v3388_v46 = vsel %vm1407_vm5, %v3385_v41, %v3387_v48  ;;  %v3436_v36 = vadd.f32 %v3387_v48, %v3309_v28  ;;  %v3582_v4 = vmul.f32 %v5539_v17, %v5407_v43  ;;  %v3630_v60 = vmul.f32 %v5549_v27, %v5346_v44 }
 0x1b9   : > { %v3435_v50 = vadd.f32 %v3388_v46, %v3308_v20  ;;  %v3601_v30 = vadd.f32 %v3580_v62, %v3527_v52  ;;  %v3602_v56 = vadd.f32 %v3581_v16, %v3528_v22  ;;  %v3488_v3 = vrot.slane %v3434_v49, 2 }
 0x1ba   : > { %v3491_v40 = vrot.slane %v3436_v36, 2  ;;  %v3603_v47 = vadd.f32 %v3582_v4, %v3529_v14  ;;  %v3631_v54 = vmul.f32 %v5549_v27, %v5356_v57  ;;  %v3632_v59 = vmul.f32 %v5549_v27, %v5359_v58 }
 0x1bb   : > { %v3489_v7 = vrot.slane %v3435_v50, 2  ;;  %v3684_v61 = vrot.slane %v3630_v60, 1  ;;  %v3771_v17 = vmul.f32 %v5567_v2, %v5387_v31  ;;  %v3772_v5 = vmul.f32 %v5567_v2, %v5404_v42 }
 0x1bc   : > { %v3685_v25 = vrot.slane %v3631_v54, 1  ;;  %v3773_v45 = vmul.f32 %v5567_v2, %v5407_v43  ;;  %v3979_v10 = vrot.slane %v5346_v44, 1  ;;  %v3687_v1 = vrot.slane %v3632_v59, 1 }
 0x1bd   : > { %v3490_v11 = vsel %vm1169_vm4, %v3488_v3, %v3489_v7  ;;  %v3492_v12 = vsel %vm1169_vm4, %v3489_v7, %v3491_v40  ;;  %v3819_v55 = vrot.slane %v3771_v17, 1  ;;  %v3820_v6 = vrot.slane %v3772_v5, 1  ;;  %v5926_v17 = vld [vmem:[%s8487_s6 + $0x4] ss:$0 sm:$0xff] }
 0x1be   : > { %v4851_v27 = vpack.i.bf16 %v3492_v12, %v3490_v11  ;;  %v3686_v15 = vsel %vm931_vm3, %v3684_v61, %v3685_v25  ;;  %v3822_v29 = vrot.slane %v3773_v45, 1  ;;  %v3688_v21 = vsel %vm931_vm3, %v3685_v25, %v3687_v1 }
 0x1bf   : > { %v3742_v28 = vadd.f32 %v3686_v15, %v3601_v30  ;;  %v3744_v41 = vadd.f32 %v3687_v1, %v3603_v47  ;;  %v3980_v20 = vrot.slane %v5356_v57, 1  ;;  %v3743_v2 = vadd.f32 %v3688_v21, %v3602_v56  ;;  %v5914_v47 = vld [vmem:[%s8487_s6] ss:$0 sm:$0xff] }
 0x1c0   : > { %4852 = vrot.lane.b32.xlu1 %v4851_v27, %s5067_s28  ;;  %v3821_v48 = vsel %vm931_vm3, %v3819_v55, %v3820_v6  ;;  %v3823_v52 = vsel %vm931_vm3, %v3820_v6, %v3822_v29  ;;  %v3982_v22 = vrot.slane %v5359_v58, 1  ;;  %v4067_v16 = vrot.slane %v5346_v44, 2 }
 0x1c1   : > { %v3869_v53 = vadd.f32 %v3821_v48, %v3742_v28  ;;  %v3871_v14 = vadd.f32 %v3822_v29, %v3744_v41  ;;  %v3981_v62 = vsel %vm931_vm3, %v3979_v10, %v3980_v20  ;;  %v3870_v46 = vadd.f32 %v3823_v52, %v3743_v2  ;;  %v5940_v28 = vld [vmem:[%s8487_s6 + $0x1] ss:$0 sm:$0xff] }
 0x1c2   : > { %v3983_v49 = vsel %vm931_vm3, %v3980_v20, %v3982_v22  ;;  %v4037_v36 = vmax.f32 %v5346_v44, %v3981_v62  ;;  %v4039_v4 = vmax.f32 %v5359_v58, %v3982_v22  ;;  %v4068_v60 = vrot.slane %v5356_v57, 2 }
 0x1c3   : > { %v3923_v50 = vrot.slane %v3869_v53, 3  ;;  %v3926_v30 = vrot.slane %v3871_v14, 3  ;;  %v4038_v56 = vmax.f32 %v5356_v57, %v3983_v49  ;;  %v3924_v3 = vrot.slane %v3870_v46, 3  ;;  %v5952_v14 = vld [vmem:[%s8487_s6 + $0x5] ss:$0 sm:$0xff] }
 0x1c4   : > { %v4070_v40 = vrot.slane %v5359_v58, 2  ;;  %v2559_v54 = vmul.f32 %v5914_v47, %v5387_v31  ;;  %v2560_v7 = vmul.f32 %v5914_v47, %v5404_v42  ;;  %v4069_v59 = vsel %vm1169_vm4, %v4067_v16, %v4068_v60 }
 0x1c5   : > { %v2561_v61 = vmul.f32 %v5914_v47, %v5407_v43  ;;  %v2612_v25 = vmul.f32 %v5926_v17, %v5382_v26  ;;  %v2613_v5 = vmul.f32 %v5926_v17, %v5392_v34  ;;  %v3925_v45 = vsel %vm1407_vm5, %v3923_v50, %v3924_v3 }
 0x1c6   : > { %v3927_v10 = vsel %vm1407_vm5, %v3924_v3, %v3926_v30  ;;  %v4071_v11 = vsel %vm1169_vm4, %v4068_v60, %v4070_v40  ;;  %v4125_v12 = vmax.f32 %v4037_v36, %v4069_v59  ;;  %v4127_v27 = vmax.f32 %v4039_v4, %v4070_v40 }
 0x1c7   : > { %v4846_v1 = vpack.i.bf16 %v3927_v10, %v3925_v45  ;;  %v4126_v55 = vmax.f32 %v4038_v56, %v4071_v11  ;;  %v2614_v15 = vmul.f32 %v5926_v17, %v5395_v37  ;;  %v2633_v29 = vadd.f32 %v2612_v25, %v2559_v54  ;;  %v5966_v54 = vld [vmem:[%s8487_s6 + $0x2] ss:$0 sm:$0xff] }
 0x1c8   : > { %v4179_v6 = vrot.slane %v4125_v12, 2  ;;  %v2634_v21 = vadd.f32 %v2613_v5, %v2560_v7  ;;  %v2662_v41 = vmul.f32 %v5940_v28, %v5387_v31  ;;  %v4182_v2 = vrot.slane %v4127_v27, 2 }
 0x1c9   : > { %4847 = vrot.lane.b32.xlu0 %v4846_v1, %s5068_s14  ;;  %v4180_v20 = vrot.slane %v4126_v55, 2  ;;  %v2635_v48 = vadd.f32 %v2614_v15, %v2561_v61  ;;  %v2663_v52 = vmul.f32 %v5940_v28, %v5404_v42  ;;  %v2664_v22 = vmul.f32 %v5940_v28, %v5407_v43 }
 0x1ca   : > { %v2718_v53 = vrot.slane %v2662_v41, 1  ;;  %v2803_v62 = vmul.f32 %v5952_v14, %v5382_v26  ;;  %v2804_v16 = vmul.f32 %v5952_v14, %v5392_v34  ;;  %v2805_v4 = vmul.f32 %v5952_v14, %v5395_v37 }
 0x1cb   : > { %v4181_v46 = vsel %vm1169_vm4, %v4179_v6, %v4180_v20  ;;  %v4183_v49 = vsel %vm1169_vm4, %v4180_v20, %v4182_v2  ;;  %v2719_v36 = vrot.slane %v2663_v52, 1  ;;  %v2721_v30 = vrot.slane %v2664_v22, 1  ;;  %v5981_v6 = vld [vmem:[%s8487_s6 + $0x6] ss:$0 sm:$0xff]  ;;  %v5993_v22 = vld [vmem:[%s8487_s6 + $0x3] ss:$0 sm:$0xff] }
 0x1cc   : > { %v4856_v50 = vpack.i.bf16 %v4183_v49, %v4181_v46  ;;  %v2853_v56 = vrot.slane %v2803_v62, 1  ;;  %v2854_v60 = vrot.slane %v2804_v16, 1  ;;  %v2856_v40 = vrot.slane %v2805_v4, 1 }
 0x1cd   : > { %v2720_v3 = vsel %vm931_vm3, %v2718_v53, %v2719_v36  ;;  %v2930_v7 = vmul.f32 %v5966_v54, %v5387_v31  ;;  %v2931_v59 = vmul.f32 %v5966_v54, %v5404_v42  ;;  %v2722_v61 = vsel %vm931_vm3, %v2719_v36, %v2721_v30 }
 0x1ce   : > { %4857 = vrot.lane.b32.xlu1 %v4856_v50, %s5066_s15  ;;  %v2774_v25 = vadd.f32 %v2720_v3, %v2633_v29  ;;  %v2776_v5 = vadd.f32 %v2721_v30, %v2635_v48  ;;  %v2855_v45 = vsel %vm931_vm3, %v2853_v56, %v2854_v60  ;;  %v2775_v10 = vadd.f32 %v2722_v61, %v2634_v21 }
 0x1cf   : > { %v2857_v11 = vsel %vm931_vm3, %v2854_v60, %v2856_v40  ;;  %v2932_v12 = vmul.f32 %v5966_v54, %v5407_v43  ;;  %v2986_v1 = vrot.slane %v2930_v7, 2  ;;  %v2987_v15 = vrot.slane %v2931_v59, 2 }
 0x1d0   : > { %v2901_v55 = vadd.f32 %v2855_v45, %v2774_v25  ;;  %v2903_v27 = vadd.f32 %v2856_v40, %v2776_v5  ;;  %v3071_v29 = vmul.f32 %v5981_v6, %v5382_v26  ;;  %v2902_v41 = vadd.f32 %v2857_v11, %v2775_v10  ;;  %v6006_v40 = vld [vmem:[%s8487_s6 + $0x7] ss:$0 sm:$0xff] }
 0x1d1   : > { %v2989_v20 = vrot.slane %v2932_v12, 2  ;;  %v3072_v21 = vmul.f32 %v5981_v6, %v5392_v34  ;;  %v3073_v2 = vmul.f32 %v5981_v6, %v5395_v37  ;;  %v2988_v48 = vsel %vm1169_vm4, %v2986_v1, %v2987_v15 }
 0x1d2   : > { %v3121_v52 = vrot.slane %v3071_v29, 2  ;;  %v3198_v53 = vmul.f32 %v5993_v22, %v5387_v31  ;;  %v3199_v62 = vmul.f32 %v5993_v22, %v5404_v42  ;;  %v3042_v46 = vadd.f32 %v2988_v48, %v2901_v55 }
 0x1d3   : > { %v2990_v16 = vsel %vm1169_vm4, %v2987_v15, %v2989_v20  ;;  %v3044_v49 = vadd.f32 %v2989_v20, %v2903_v27  ;;  %v3122_v36 = vrot.slane %v3072_v21, 2  ;;  %v3124_v50 = vrot.slane %v3073_v2, 2  ;;  %v6020_v21 = vld [vmem:[%s8488_s7] ss:$0 sm:$0xff] }
 0x1d4   : > { %v3043_v4 = vadd.f32 %v2990_v16, %v2902_v41  ;;  %v3200_v30 = vmul.f32 %v5993_v22, %v5407_v43  ;;  %v3254_v56 = vrot.slane %v3198_v53, 3  ;;  %v3255_v3 = vrot.slane %v3199_v62, 3  ;;  %v6032_v62 = vld [vmem:[%s8488_s7 + $0x2] ss:$0 sm:$0xff] }
 0x1d5   : > { %v3123_v60 = vsel %vm1169_vm4, %v3121_v52, %v3122_v36  ;;  %v3339_v7 = vmul.f32 %v6006_v40, %v5382_v26  ;;  %v3340_v59 = vmul.f32 %v6006_v40, %v5392_v34  ;;  %v3125_v61 = vsel %vm1169_vm4, %v3122_v36, %v3124_v50 }
 0x1d6   : > { %v3169_v25 = vadd.f32 %v3123_v60, %v3042_v46  ;;  %v3171_v5 = vadd.f32 %v3124_v50, %v3044_v49  ;;  %v3257_v45 = vrot.slane %v3200_v30, 3  ;;  %v3170_v10 = vadd.f32 %v3125_v61, %v3043_v4 }
 0x1d7   : > { %v3256_v11 = vsel %vm1407_vm5, %v3254_v56, %v3255_v3  ;;  %v3341_v12 = vmul.f32 %v6006_v40, %v5395_v37  ;;  %v3389_v1 = vrot.slane %v3339_v7, 3  ;;  %v3390_v29 = vrot.slane %v3340_v59, 3 }
 0x1d8   : > { %v3258_v55 = vsel %vm1407_vm5, %v3255_v3, %v3257_v45  ;;  %v3310_v27 = vadd.f32 %v3256_v11, %v3169_v25  ;;  %v3312_v15 = vadd.f32 %v3257_v45, %v3171_v5  ;;  %v3530_v2 = vmul.f32 %v6020_v21, %v5387_v31  ;;  %v6044_v3 = vld [vmem:[%s8488_s7 + $0x1] ss:$0 sm:$0xff] }
 0x1d9   : > { %v3311_v41 = vadd.f32 %v3258_v55, %v3170_v10  ;;  %v3392_v20 = vrot.slane %v3341_v12, 3  ;;  %v3531_v48 = vmul.f32 %v6020_v21, %v5404_v42  ;;  %v3391_v52 = vsel %vm1407_vm5, %v3389_v1, %v3390_v29  ;;  %v6055_v12 = vld [vmem:[%s8488_s7 + $0x3] ss:$0 sm:$0xff] }
 0x1da   : > { %v3532_v53 = vmul.f32 %v6020_v21, %v5407_v43  ;;  %v3583_v16 = vmul.f32 %v6032_v62, %v5382_v26  ;;  %v3584_v46 = vmul.f32 %v6032_v62, %v5392_v34  ;;  %v3437_v36 = vadd.f32 %v3391_v52, %v3310_v27 }
 0x1db   : > { %v3393_v49 = vsel %vm1407_vm5, %v3390_v29, %v3392_v20  ;;  %v3439_v4 = vadd.f32 %v3392_v20, %v3312_v15  ;;  %v3585_v50 = vmul.f32 %v6032_v62, %v5395_v37  ;;  %v3633_v7 = vmul.f32 %v6044_v3, %v5387_v31 }
 0x1dc   : > { %v3438_v30 = vadd.f32 %v3393_v49, %v3311_v41  ;;  %v3604_v56 = vadd.f32 %v3583_v16, %v3530_v2  ;;  %v3605_v60 = vadd.f32 %v3584_v46, %v3531_v48  ;;  %v3493_v59 = vrot.slane %v3437_v36, 2 }
 0x1dd   : > { %v3496_v61 = vrot.slane %v3439_v4, 2  ;;  %v3606_v25 = vadd.f32 %v3585_v50, %v3532_v53  ;;  %v3634_v5 = vmul.f32 %v6044_v3, %v5404_v42  ;;  %v3635_v10 = vmul.f32 %v6044_v3, %v5407_v43 }
 0x1de   : > { %v3494_v45 = vrot.slane %v3438_v30, 2  ;;  %v3689_v11 = vrot.slane %v3633_v7, 1  ;;  %v3774_v1 = vmul.f32 %v6055_v12, %v5382_v26  ;;  %v3775_v27 = vmul.f32 %v6055_v12, %v5392_v34 }
 0x1df   : > { %v3690_v55 = vrot.slane %v3634_v5, 1  ;;  %v3776_v15 = vmul.f32 %v6055_v12, %v5395_v37  ;;  %v3984_v29 = vrot.slane %v5387_v31, 1  ;;  %v3692_v2 = vrot.slane %v3635_v10, 1 }
 0x1e0   : > { %v3495_v41 = vsel %vm1169_vm4, %v3493_v59, %v3494_v45  ;;  %v3497_v20 = vsel %vm1169_vm4, %v3494_v45, %v3496_v61  ;;  %v3824_v48 = vrot.slane %v3774_v1, 1  ;;  %v3825_v16 = vrot.slane %v3775_v27, 1 }
 0x1e1   : > { %v4866_v52 = vpack.i.bf16 %v3497_v20, %v3495_v41  ;;  %v3691_v53 = vsel %vm931_vm3, %v3689_v11, %v3690_v55  ;;  %v3827_v46 = vrot.slane %v3776_v15, 1  ;;  %v3693_v49 = vsel %vm931_vm3, %v3690_v55, %v3692_v2 }
 0x1e2   : > { %v3745_v36 = vadd.f32 %v3691_v53, %v3604_v56  ;;  %v3747_v4 = vadd.f32 %v3692_v2, %v3606_v25  ;;  %v3985_v50 = vrot.slane %v5404_v42, 1  ;;  %v3746_v30 = vadd.f32 %v3693_v49, %v3605_v60 }
 0x1e3   : > { %4867 = vrot.lane.b32.xlu0 %v4866_v52, %s5067_s28  ;;  %v3826_v7 = vsel %vm931_vm3, %v3824_v48, %v3825_v16  ;;  %v3828_v59 = vsel %vm931_vm3, %v3825_v16, %v3827_v46  ;;  %v3987_v61 = vrot.slane %v5407_v43, 1  ;;  %v4072_v11 = vrot.slane %v5387_v31, 2 }
 0x1e4   : > { %v3872_v5 = vadd.f32 %v3826_v7, %v3745_v36  ;;  %v3874_v45 = vadd.f32 %v3827_v46, %v3747_v4  ;;  %v3986_v10 = vsel %vm931_vm3, %v3984_v29, %v3985_v50  ;;  %v3873_v1 = vadd.f32 %v3828_v59, %v3746_v30 }
 0x1e5   : > { %v3988_v56 = vsel %vm931_vm3, %v3985_v50, %v3987_v61  ;;  %v4040_v25 = vmax.f32 %v5387_v31, %v3986_v10  ;;  %v4042_v55 = vmax.f32 %v5407_v43, %v3987_v61  ;;  %v4073_v41 = vrot.slane %v5404_v42, 2 }
 0x1e6   : > { %v3928_v60 = vrot.slane %v3872_v5, 3  ;;  %v3931_v27 = vrot.slane %v3874_v45, 3  ;;  %v4041_v15 = vmax.f32 %v5404_v42, %v3988_v56  ;;  %v3929_v20 = vrot.slane %v3873_v1, 3 }
 0x1e7   : > { %v4075_v2 = vrot.slane %v5407_v43, 2  ;;  %v2562_v29 = vmul.f32 %v5914_v47, %v5382_v26  ;;  %v2563_v48 = vmul.f32 %v5914_v47, %v5392_v34  ;;  %v4074_v52 = vsel %vm1169_vm4, %v4072_v11, %v4073_v41 }
 0x1e8   : > { %v2564_v53 = vmul.f32 %v5914_v47, %v5395_v37  ;;  %v2615_v16 = vmul.f32 %v5926_v17, %v5453_v32  ;;  %v2616_v46 = vmul.f32 %v5926_v17, %v5467_v38  ;;  %v3930_v49 = vsel %vm1407_vm5, %v3928_v60, %v3929_v20 }
 0x1e9   : > { %v3932_v36 = vsel %vm1407_vm5, %v3929_v20, %v3931_v27  ;;  %v4076_v4 = vsel %vm1169_vm4, %v4073_v41, %v4075_v2  ;;  %v4128_v50 = vmax.f32 %v4040_v25, %v4074_v52  ;;  %v4130_v59 = vmax.f32 %v4042_v55, %v4075_v2 }
 0x1ea   : > { %v4861_v30 = vpack.i.bf16 %v3932_v36, %v3930_v49  ;;  %v4129_v7 = vmax.f32 %v4041_v15, %v4076_v4  ;;  %v2617_v61 = vmul.f32 %v5926_v17, %v5470_v39  ;;  %v2636_v45 = vadd.f32 %v2615_v16, %v2562_v29 }
 0x1eb   : > { %v4184_v5 = vrot.slane %v4128_v50, 2  ;;  %v2637_v10 = vadd.f32 %v2616_v46, %v2563_v48  ;;  %v2665_v11 = vmul.f32 %v5940_v28, %v5382_v26  ;;  %v4187_v56 = vrot.slane %v4130_v59, 2 }
 0x1ec   : > { %4862 = vrot.lane.b32.xlu1 %v4861_v30, %s5068_s14  ;;  %v4185_v1 = vrot.slane %v4129_v7, 2  ;;  %v2638_v60 = vadd.f32 %v2617_v61, %v2564_v53  ;;  %v2666_v25 = vmul.f32 %v5940_v28, %v5392_v34  ;;  %v2667_v55 = vmul.f32 %v5940_v28, %v5395_v37 }
 0x1ed   : > { %v2723_v27 = vrot.slane %v2665_v11, 1  ;;  %v2806_v15 = vmul.f32 %v5952_v14, %v5453_v32  ;;  %v2807_v41 = vmul.f32 %v5952_v14, %v5467_v38  ;;  %v2808_v48 = vmul.f32 %v5952_v14, %v5470_v39 }
 0x1ee   : > { %v4186_v20 = vsel %vm1169_vm4, %v4184_v5, %v4185_v1  ;;  %v4188_v2 = vsel %vm1169_vm4, %v4185_v1, %v4187_v56  ;;  %v2724_v29 = vrot.slane %v2666_v25, 1  ;;  %v2726_v53 = vrot.slane %v2667_v55, 1 }
 0x1ef   : > { %v4871_v52 = vpack.i.bf16 %v4188_v2, %v4186_v20  ;;  %v2858_v16 = vrot.slane %v2806_v15, 1  ;;  %v2859_v46 = vrot.slane %v2807_v41, 1  ;;  %v2861_v36 = vrot.slane %v2808_v48, 1 }
 0x1f0   : > { %v2725_v49 = vsel %vm931_vm3, %v2723_v27, %v2724_v29  ;;  %v2933_v4 = vmul.f32 %v5966_v54, %v5382_v26  ;;  %v2934_v50 = vmul.f32 %v5966_v54, %v5392_v34  ;;  %v2727_v30 = vsel %vm931_vm3, %v2724_v29, %v2726_v53 }
 0x1f1   : > { %4872 = vrot.lane.b32.xlu0 %v4871_v52, %s5066_s15  ;;  %v2777_v7 = vadd.f32 %v2725_v49, %v2636_v45  ;;  %v2779_v59 = vadd.f32 %v2726_v53, %v2638_v60  ;;  %v2860_v61 = vsel %vm931_vm3, %v2858_v16, %v2859_v46  ;;  %v2778_v5 = vadd.f32 %v2727_v30, %v2637_v10 }
 0x1f2   : > { %v2862_v11 = vsel %vm931_vm3, %v2859_v46, %v2861_v36  ;;  %v2935_v1 = vmul.f32 %v5966_v54, %v5395_v37  ;;  %v2991_v56 = vrot.slane %v2933_v4, 2  ;;  %v2992_v27 = vrot.slane %v2934_v50, 2 }
 0x1f3   : > { %v2904_v25 = vadd.f32 %v2860_v61, %v2777_v7  ;;  %v2906_v55 = vadd.f32 %v2861_v36, %v2779_v59  ;;  %v3074_v15 = vmul.f32 %v5981_v6, %v5453_v32  ;;  %v2905_v41 = vadd.f32 %v2862_v11, %v2778_v5 }
 0x1f4   : > { %v2994_v20 = vrot.slane %v2935_v1, 2  ;;  %v3075_v45 = vmul.f32 %v5981_v6, %v5467_v38  ;;  %v3076_v10 = vmul.f32 %v5981_v6, %v5470_v39  ;;  %v2993_v60 = vsel %vm1169_vm4, %v2991_v56, %v2992_v27 }
 0x1f5   : > { %v3126_v2 = vrot.slane %v3074_v15, 2  ;;  %v3201_v29 = vmul.f32 %v5993_v22, %v5382_v26  ;;  %v3202_v48 = vmul.f32 %v5993_v22, %v5392_v34  ;;  %v3045_v53 = vadd.f32 %v2993_v60, %v2904_v25 }
 0x1f6   : > { %v2995_v52 = vsel %vm1169_vm4, %v2992_v27, %v2994_v20  ;;  %v3047_v16 = vadd.f32 %v2994_v20, %v2906_v55  ;;  %v3127_v46 = vrot.slane %v3075_v45, 2  ;;  %v3129_v36 = vrot.slane %v3076_v10, 2 }
 0x1f7   : > { %v3046_v49 = vadd.f32 %v2995_v52, %v2905_v41  ;;  %v3203_v4 = vmul.f32 %v5993_v22, %v5395_v37  ;;  %v3259_v50 = vrot.slane %v3201_v29, 3  ;;  %v3260_v7 = vrot.slane %v3202_v48, 3 }
 0x1f8   : > { %v3128_v30 = vsel %vm1169_vm4, %v3126_v2, %v3127_v46  ;;  %v3342_v59 = vmul.f32 %v6006_v40, %v5453_v32  ;;  %v3343_v61 = vmul.f32 %v6006_v40, %v5467_v38  ;;  %v3130_v5 = vsel %vm1169_vm4, %v3127_v46, %v3129_v36 }
 0x1f9   : > { %v3172_v11 = vadd.f32 %v3128_v30, %v3045_v53  ;;  %v3174_v1 = vadd.f32 %v3129_v36, %v3047_v16  ;;  %v3262_v56 = vrot.slane %v3203_v4, 3  ;;  %v3173_v25 = vadd.f32 %v3130_v5, %v3046_v49 }
 0x1fa   : > { %v3261_v55 = vsel %vm1407_vm5, %v3259_v50, %v3260_v7  ;;  %v3344_v27 = vmul.f32 %v6006_v40, %v5470_v39  ;;  %v3394_v15 = vrot.slane %v3342_v59, 3  ;;  %v3395_v10 = vrot.slane %v3343_v61, 3 }
 0x1fb   : > { %v3263_v41 = vsel %vm1407_vm5, %v3260_v7, %v3262_v56  ;;  %v3313_v20 = vadd.f32 %v3261_v55, %v3172_v11  ;;  %v3315_v45 = vadd.f32 %v3262_v56, %v3174_v1  ;;  %v3533_v29 = vmul.f32 %v6020_v21, %v5382_v26 }
 0x1fc   : > { %v3314_v60 = vadd.f32 %v3263_v41, %v3173_v25  ;;  %v3397_v2 = vrot.slane %v3344_v27, 3  ;;  %v3534_v48 = vmul.f32 %v6020_v21, %v5392_v34  ;;  %v3396_v52 = vsel %vm1407_vm5, %v3394_v15, %v3395_v10 }
 0x1fd   : > { %v3535_v53 = vmul.f32 %v6020_v21, %v5395_v37  ;;  %v3586_v16 = vmul.f32 %v6032_v62, %v5453_v32  ;;  %v3587_v46 = vmul.f32 %v6032_v62, %v5467_v38  ;;  %v3440_v36 = vadd.f32 %v3396_v52, %v3313_v20 }
 0x1fe   : > { %v3398_v49 = vsel %vm1407_vm5, %v3395_v10, %v3397_v2  ;;  %v3442_v4 = vadd.f32 %v3397_v2, %v3315_v45  ;;  %v3588_v50 = vmul.f32 %v6032_v62, %v5470_v39  ;;  %v3636_v61 = vmul.f32 %v6044_v3, %v5382_v26 }
 0x1ff   : > { %v3441_v30 = vadd.f32 %v3398_v49, %v3314_v60  ;;  %v3607_v7 = vadd.f32 %v3586_v16, %v3533_v29  ;;  %v3608_v59 = vadd.f32 %v3587_v46, %v3534_v48  ;;  %v3498_v5 = vrot.slane %v3440_v36, 2 }
 0x200   : > { %v3501_v11 = vrot.slane %v3442_v4, 2  ;;  %v3609_v1 = vadd.f32 %v3588_v50, %v3535_v53  ;;  %v3637_v56 = vmul.f32 %v6044_v3, %v5392_v34  ;;  %v3638_v55 = vmul.f32 %v6044_v3, %v5395_v37 }
 0x201   : > { %v3499_v25 = vrot.slane %v3441_v30, 2  ;;  %v3694_v27 = vrot.slane %v3636_v61, 1  ;;  %v3777_v15 = vmul.f32 %v6055_v12, %v5453_v32  ;;  %v3778_v20 = vmul.f32 %v6055_v12, %v5467_v38 }
 0x202   : > { %v3695_v41 = vrot.slane %v3637_v56, 1  ;;  %v3779_v45 = vmul.f32 %v6055_v12, %v5470_v39  ;;  %v3989_v10 = vrot.slane %v5382_v26, 1  ;;  %v3697_v29 = vrot.slane %v3638_v55, 1 }
 0x203   : > { %v3500_v60 = vsel %vm1169_vm4, %v3498_v5, %v3499_v25  ;;  %v3502_v2 = vsel %vm1169_vm4, %v3499_v25, %v3501_v11  ;;  %v3829_v48 = vrot.slane %v3777_v15, 1  ;;  %v3830_v16 = vrot.slane %v3778_v20, 1 }
 0x204   : > { %v4881_v52 = vpack.i.bf16 %v3502_v2, %v3500_v60  ;;  %v3696_v53 = vsel %vm931_vm3, %v3694_v27, %v3695_v41  ;;  %v3832_v46 = vrot.slane %v3779_v45, 1  ;;  %v3698_v49 = vsel %vm931_vm3, %v3695_v41, %v3697_v29 }
 0x205   : > { %v3748_v36 = vadd.f32 %v3696_v53, %v3607_v7  ;;  %v3750_v4 = vadd.f32 %v3697_v29, %v3609_v1  ;;  %v3990_v50 = vrot.slane %v5392_v34, 1  ;;  %v3749_v30 = vadd.f32 %v3698_v49, %v3608_v59 }
 0x206   : > { %4882 = vrot.lane.b32.xlu1 %v4881_v52, %s5067_s28  ;;  %v3831_v61 = vsel %vm931_vm3, %v3829_v48, %v3830_v16  ;;  %v3833_v5 = vsel %vm931_vm3, %v3830_v16, %v3832_v46  ;;  %v3992_v11 = vrot.slane %v5395_v37, 1  ;;  %v4077_v27 = vrot.slane %v5382_v26, 2 }
 0x207   : > { %v3875_v56 = vadd.f32 %v3831_v61, %v3748_v36  ;;  %v3877_v25 = vadd.f32 %v3832_v46, %v3750_v4  ;;  %v3991_v55 = vsel %vm931_vm3, %v3989_v10, %v3990_v50  ;;  %v3876_v15 = vadd.f32 %v3833_v5, %v3749_v30 }
 0x208   : > { %v3993_v7 = vsel %vm931_vm3, %v3990_v50, %v3992_v11  ;;  %v4043_v1 = vmax.f32 %v5382_v26, %v3991_v55  ;;  %v4045_v41 = vmax.f32 %v5395_v37, %v3992_v11  ;;  %v4078_v60 = vrot.slane %v5392_v34, 2 }
 0x209   : > { %v3933_v59 = vrot.slane %v3875_v56, 3  ;;  %v3936_v20 = vrot.slane %v3877_v25, 3  ;;  %v4044_v45 = vmax.f32 %v5392_v34, %v3993_v7  ;;  %v3934_v2 = vrot.slane %v3876_v15, 3 }
 0x20a   : > { %v4080_v29 = vrot.slane %v5395_v37, 2  ;;  %v2565_v10 = vmul.f32 %v5914_v47, %v5453_v32  ;;  %v2566_v48 = vmul.f32 %v5914_v47, %v5467_v38  ;;  %v4079_v52 = vsel %vm1169_vm4, %v4077_v27, %v4078_v60 }
 0x20b   : > { %v2567_v53 = vmul.f32 %v5914_v47, %v5470_v39  ;;  %v6200_v16 = vmul.f32 %v5926_v17, %v5428_v9  ;;  %v6204_v46 = vmul.f32 %v5926_v17, %v5456_v33  ;;  %v3935_v49 = vsel %vm1407_vm5, %v3933_v59, %v3934_v2 }
 0x20c   : > { %v3937_v36 = vsel %vm1407_vm5, %v3934_v2, %v3936_v20  ;;  %v4081_v4 = vsel %vm1169_vm4, %v4078_v60, %v4080_v29  ;;  %v4131_v50 = vmax.f32 %v4043_v1, %v4079_v52  ;;  %v4133_v5 = vmax.f32 %v4045_v41, %v4080_v29 }
 0x20d   : > { %v4876_v30 = vpack.i.bf16 %v3937_v36, %v3935_v49  ;;  %v4132_v61 = vmax.f32 %v4044_v45, %v4081_v4  ;;  %v6211_v11 = vmul.f32 %v5926_v17, %v5459_v35  ;;  %v2639_v25 = vadd.f32 %v6200_v16, %v2565_v10 }
 0x20e   : > { %v4189_v56 = vrot.slane %v4131_v50, 2  ;;  %v2640_v55 = vadd.f32 %v6204_v46, %v2566_v48  ;;  %v2668_v27 = vmul.f32 %v5940_v28, %v5453_v32  ;;  %v4192_v7 = vrot.slane %v4133_v5, 2 }
 0x20f   : > { %4877 = vrot.lane.b32.xlu0 %v4876_v30, %s5068_s14  ;;  %v4190_v15 = vrot.slane %v4132_v61, 2  ;;  %v2641_v1 = vadd.f32 %v6211_v11, %v2567_v53  ;;  %v2669_v41 = vmul.f32 %v5940_v28, %v5467_v38  ;;  %v2670_v17 = vmul.f32 %v5940_v28, %v5470_v39 }
 0x210   : > { %v2728_v59 = vrot.slane %v2668_v27, 1  ;;  %v2809_v20 = vmul.f32 %v5952_v14, %v5428_v9  ;;  %v2810_v45 = vmul.f32 %v5952_v14, %v5456_v33  ;;  %v2811_v10 = vmul.f32 %v5952_v14, %v5459_v35 }
 0x211   : > { %v4191_v60 = vsel %vm1169_vm4, %v4189_v56, %v4190_v15  ;;  %v4193_v2 = vsel %vm1169_vm4, %v4190_v15, %v4192_v7  ;;  %v2729_v29 = vrot.slane %v2669_v41, 1  ;;  %v2731_v52 = vrot.slane %v2670_v17, 1 }
 0x212   : > { %v4886_v48 = vpack.i.bf16 %v4193_v2, %v4191_v60  ;;  %v2863_v53 = vrot.slane %v2809_v20, 1  ;;  %v2864_v49 = vrot.slane %v2810_v45, 1  ;;  %v6232_v4 = vrot.slane %v2811_v10, 1 }
 0x213   : > { %v2730_v36 = vsel %vm931_vm3, %v2728_v59, %v2729_v29  ;;  %v2936_v50 = vmul.f32 %v5966_v54, %v5453_v32  ;;  %v2937_v30 = vmul.f32 %v5966_v54, %v5467_v38  ;;  %v2732_v61 = vsel %vm931_vm3, %v2729_v29, %v2731_v52 }
 0x214   : > { %4887 = vrot.lane.b32.xlu1 %v4886_v48, %s5066_s15  ;;  %v2780_v5 = vadd.f32 %v2730_v36, %v2639_v25  ;;  %v2782_v14 = vadd.f32 %v2731_v52, %v2641_v1  ;;  %v6241_v56 = vsel %vm931_vm3, %v2863_v53, %v2864_v49  ;;  %v2781_v27 = vadd.f32 %v2732_v61, %v2640_v55 }
 0x215   : > { %v6245_v15 = vsel %vm931_vm3, %v2864_v49, %v6232_v4  ;;  %v2938_v7 = vmul.f32 %v5966_v54, %v5470_v39  ;;  %v2996_v41 = vrot.slane %v2936_v50, 2  ;;  %v2997_v20 = vrot.slane %v2937_v30, 2 }
 0x216   : > { %v2907_v17 = vadd.f32 %v6241_v56, %v2780_v5  ;;  %v2909_v59 = vadd.f32 %v6232_v4, %v2782_v14  ;;  %v3077_v25 = vmul.f32 %v5981_v6, %v5428_v9  ;;  %v2908_v1 = vadd.f32 %v6245_v15, %v2781_v27 }
 0x217   : > { %v2999_v45 = vrot.slane %v2938_v7, 2  ;;  %v3078_v55 = vmul.f32 %v5981_v6, %v5456_v33  ;;  %v3079_v60 = vmul.f32 %v5981_v6, %v5459_v35  ;;  %v2998_v2 = vsel %vm1169_vm4, %v2996_v41, %v2997_v20 }
 0x218   : > { %v3131_v29 = vrot.slane %v3077_v25, 2  ;;  %v3204_v10 = vmul.f32 %v5993_v22, %v5453_v32  ;;  %v3205_v48 = vmul.f32 %v5993_v22, %v5467_v38  ;;  %v3048_v53 = vadd.f32 %v2998_v2, %v2907_v17 }
 0x219   : > { %v3000_v52 = vsel %vm1169_vm4, %v2997_v20, %v2999_v45  ;;  %v3050_v49 = vadd.f32 %v2999_v45, %v2909_v59  ;;  %v3132_v36 = vrot.slane %v3078_v55, 2  ;;  %v6264_v30 = vrot.slane %v3079_v60, 2 }
 0x21a   : > { %v3049_v50 = vadd.f32 %v3000_v52, %v2908_v1  ;;  %v3206_v6 = vmul.f32 %v5993_v22, %v5470_v39  ;;  %v3264_v61 = vrot.slane %v3204_v10, 3  ;;  %v3265_v14 = vrot.slane %v3205_v48, 3 }
 0x21b   : > { %v6269_v5 = vsel %vm1169_vm4, %v3131_v29, %v3132_v36  ;;  %v3345_v27 = vmul.f32 %v6006_v40, %v5428_v9  ;;  %v3346_v7 = vmul.f32 %v6006_v40, %v5456_v33  ;;  %v6277_v41 = vsel %vm1169_vm4, %v3132_v36, %v6264_v30 }
 0x21c   : > { %v3175_v17 = vadd.f32 %v6269_v5, %v3048_v53  ;;  %v3177_v59 = vadd.f32 %v6264_v30, %v3050_v49  ;;  %v3267_v20 = vrot.slane %v3206_v6, 3  ;;  %v3176_v25 = vadd.f32 %v6277_v41, %v3049_v50 }
 0x21d   : > { %v3266_v1 = vsel %vm1407_vm5, %v3264_v61, %v3265_v14  ;;  %v3347_v45 = vmul.f32 %v6006_v40, %v5459_v35  ;;  %v3399_v55 = vrot.slane %v3345_v27, 3  ;;  %v3400_v10 = vrot.slane %v3346_v7, 3 }
 0x21e   : > { %v3268_v60 = vsel %vm1407_vm5, %v3265_v14, %v3267_v20  ;;  %v3316_v2 = vadd.f32 %v3266_v1, %v3175_v17  ;;  %v3318_v29 = vadd.f32 %v3267_v20, %v3177_v59  ;;  %v3536_v53 = vmul.f32 %v6020_v21, %v5453_v32 }
 0x21f   : > { %v3317_v48 = vadd.f32 %v3268_v60, %v3176_v25  ;;  %v6286_v52 = vrot.slane %v3347_v45, 3  ;;  %v3537_v49 = vmul.f32 %v6020_v21, %v5467_v38  ;;  %v6293_v36 = vsel %vm1407_vm5, %v3399_v55, %v3400_v10 }
 0x220   : > { %v3538_v40 = vmul.f32 %v6020_v21, %v5470_v39  ;;  %v6299_v50 = vmul.f32 %v6032_v62, %v5428_v9  ;;  %v6303_v6 = vmul.f32 %v6032_v62, %v5456_v33  ;;  %v3443_v14 = vadd.f32 %v6293_v36, %v3316_v2 }
 0x221   : > { %v6307_v61 = vsel %vm1407_vm5, %v3400_v10, %v6286_v52  ;;  %v3445_v27 = vadd.f32 %v6286_v52, %v3318_v29  ;;  %v6313_v7 = vmul.f32 %v6032_v62, %v5459_v35  ;;  %v3639_v25 = vmul.f32 %v6044_v3, %v5453_v32 }
 0x222   : > { %v3444_v17 = vadd.f32 %v6307_v61, %v3317_v48  ;;  %v3610_v59 = vadd.f32 %v6299_v50, %v3536_v53  ;;  %v3611_v20 = vadd.f32 %v6303_v6, %v3537_v49  ;;  %v3503_v1 = vrot.slane %v3443_v14, 2 }
 0x223   : > { %v3506_v45 = vrot.slane %v3445_v27, 2  ;;  %v3612_v55 = vadd.f32 %v6313_v7, %v3538_v40  ;;  %v3640_v60 = vmul.f32 %v6044_v3, %v5467_v38  ;;  %v3641_v62 = vmul.f32 %v6044_v3, %v5470_v39 }
 0x224   : > { %v3504_v2 = vrot.slane %v3444_v17, 2  ;;  %v3699_v29 = vrot.slane %v3639_v25, 1  ;;  %v3780_v10 = vmul.f32 %v6055_v12, %v5428_v9  ;;  %v3781_v53 = vmul.f32 %v6055_v12, %v5456_v33 }
 0x225   : > { %v3700_v48 = vrot.slane %v3640_v60, 1  ;;  %v3782_v49 = vmul.f32 %v6055_v12, %v5459_v35  ;;  %v3994_v40 = vrot.slane %v5453_v32, 1  ;;  %v3702_v17 = vrot.slane %v3641_v62, 1 }
 0x226   : > { %v3505_v14 = vsel %vm1169_vm4, %v3503_v1, %v3504_v2  ;;  %v3507_v27 = vsel %vm1169_vm4, %v3504_v2, %v3506_v45  ;;  %v3834_v37 = vrot.slane %v3780_v10, 1  ;;  %v3835_v26 = vrot.slane %v3781_v53, 1 }
 0x227   : > { %v4896_v34 = vpack.i.bf16 %v3507_v27, %v3505_v14  ;;  %v3701_v25 = vsel %vm931_vm3, %v3699_v29, %v3700_v48  ;;  %v6335_v43 = vrot.slane %v3782_v49, 1  ;;  %v3703_v60 = vsel %vm931_vm3, %v3700_v48, %v3702_v17 }
 0x228   : > { %v3751_v42 = vadd.f32 %v3701_v25, %v3610_v59  ;;  %v3753_v31 = vadd.f32 %v3702_v17, %v3612_v55  ;;  %v3995_v12 = vrot.slane %v5467_v38, 1  ;;  %v3752_v58 = vadd.f32 %v3703_v60, %v3611_v20 }
 0x229   : > { %4897 = vrot.lane.b32.xlu0 %v4896_v34, %s5067_s28  ;;  %v6341_v1 = vsel %vm931_vm3, %v3834_v37, %v3835_v26  ;;  %v6345_v45 = vsel %vm931_vm3, %v3835_v26, %v6335_v43  ;;  %v3997_v2 = vrot.slane %v5470_v39, 1  ;;  %v4082_v55 = vrot.slane %v5453_v32, 2 }
 0x22a   : > { %v3878_v62 = vadd.f32 %v6341_v1, %v3751_v42  ;;  %v3880_v29 = vadd.f32 %v6335_v43, %v3753_v31  ;;  %v3996_v59 = vsel %vm931_vm3, %v3994_v40, %v3995_v12  ;;  %v3879_v34 = vadd.f32 %v6345_v45, %v3752_v58 }
 0x22b   : > { %v3998_v20 = vsel %vm931_vm3, %v3995_v12, %v3997_v2  ;;  %v4046_v37 = vmax.f32 %v5453_v32, %v3996_v59  ;;  %v4048_v10 = vmax.f32 %v5470_v39, %v3997_v2  ;;  %v4083_v42 = vrot.slane %v5467_v38, 2 }
 0x22c   : > { %v3938_v26 = vrot.slane %v3878_v62, 3  ;;  %v3941_v48 = vrot.slane %v3880_v29, 3  ;;  %v4047_v53 = vmax.f32 %v5467_v38, %v3998_v20  ;;  %v3939_v49 = vrot.slane %v3879_v34, 3 }
 0x22d   : > { %v4085_v31 = vrot.slane %v5470_v39, 2  ;;  %v2568_v40 = vmul.f32 %v5914_v47, %v5428_v9  ;;  %v2569_v58 = vmul.f32 %v5914_v47, %v5456_v33  ;;  %v4084_v14 = vsel %vm1169_vm4, %v4082_v55, %v4083_v42 }
 0x22e   : > { %v2570_v27 = vmul.f32 %v5914_v47, %v5459_v35  ;;  %v2671_v17 = vmul.f32 %v5940_v28, %v5428_v9  ;;  %v2672_v25 = vmul.f32 %v5940_v28, %v5456_v33  ;;  %v3940_v60 = vsel %vm1407_vm5, %v3938_v26, %v3939_v49 }
 0x22f   : > { %v3942_v12 = vsel %vm1407_vm5, %v3939_v49, %v3941_v48  ;;  %v4086_v2 = vsel %vm1169_vm4, %v4083_v42, %v4085_v31  ;;  %v4134_v62 = vmax.f32 %v4046_v37, %v4084_v14  ;;  %v4136_v34 = vmax.f32 %v4048_v10, %v4085_v31 }
 0x230   : > { %v4891_v29 = vpack.i.bf16 %v3942_v12, %v3940_v60  ;;  %v4135_v59 = vmax.f32 %v4047_v53, %v4086_v2  ;;  %v2642_v55 = vadd.f32 %v6200_v16, %v2568_v40  ;;  %v2643_v47 = vadd.f32 %v6204_v46, %v2569_v58 }
 0x231   : > { %v4194_v20 = vrot.slane %v4134_v62, 2  ;;  %v2644_v39 = vadd.f32 %v6211_v11, %v2570_v27  ;;  %v2673_v38 = vmul.f32 %v5940_v28, %v5459_v35  ;;  %v4197_v48 = vrot.slane %v4136_v34, 2 }
 0x232   : > { %4892 = vrot.lane.b32.xlu1 %v4891_v29, %s5068_s14  ;;  %v4195_v26 = vrot.slane %v4135_v59, 2  ;;  %v2733_v49 = vrot.slane %v2671_v17, 1  ;;  %v2734_v42 = vrot.slane %v2672_v25, 1  ;;  %v2939_v10 = vmul.f32 %v5966_v54, %v5428_v9 }
 0x233   : > { %v2736_v37 = vrot.slane %v2673_v38, 1  ;;  %v2940_v16 = vmul.f32 %v5966_v54, %v5456_v33  ;;  %v2941_v46 = vmul.f32 %v5966_v54, %v5459_v35  ;;  %v3207_v31 = vmul.f32 %v5993_v22, %v5428_v9 }
 0x234   : > { %v4196_v11 = vsel %vm1169_vm4, %v4194_v20, %v4195_v26  ;;  %v4198_v28 = vsel %vm1169_vm4, %v4195_v26, %v4197_v48  ;;  %v2735_v53 = vsel %vm931_vm3, %v2733_v49, %v2734_v42  ;;  %v3001_v17 = vrot.slane %v2939_v10, 2 }
 0x235   : > { %v4901_v40 = vpack.i.bf16 %v4198_v28, %v4196_v11  ;;  %v2737_v38 = vsel %vm931_vm3, %v2734_v42, %v2736_v37  ;;  %v2783_v58 = vadd.f32 %v2735_v53, %v2642_v55  ;;  %v2785_v14 = vadd.f32 %v2736_v37, %v2644_v39 }
 0x236   : > { %v2784_v27 = vadd.f32 %v2737_v38, %v2643_v47  ;;  %v3002_v25 = vrot.slane %v2940_v16, 2  ;;  %v3004_v60 = vrot.slane %v2941_v46, 2  ;;  %v3208_v2 = vmul.f32 %v5993_v22, %v5456_v33 }
 0x237   : > { %4902 = vrot.lane.b32.xlu0 %v4901_v40, %s5066_s15  ;;  %v2910_v54 = vadd.f32 %v6241_v56, %v2783_v58  ;;  %v2912_v12 = vadd.f32 %v6232_v4, %v2785_v14  ;;  %v3209_v62 = vmul.f32 %v5993_v22, %v5459_v35  ;;  %v3269_v34 = vrot.slane %v3207_v31, 3 }
 0x238   : > { %v2911_v29 = vadd.f32 %v6245_v15, %v2784_v27  ;;  %v3003_v39 = vsel %vm1169_vm4, %v3001_v17, %v3002_v25  ;;  %v3005_v59 = vsel %vm1169_vm4, %v3002_v25, %v3004_v60  ;;  %v3270_v47 = vrot.slane %v3208_v2, 3 }
 0x239   : > { %v3051_v55 = vadd.f32 %v3003_v39, %v2910_v54  ;;  %v3053_v20 = vadd.f32 %v3004_v60, %v2912_v12  ;;  %v3272_v26 = vrot.slane %v3209_v62, 3  ;;  %v3539_v4 = vmul.f32 %v6020_v21, %v5428_v9 }
 0x23a   : > { %v3052_v56 = vadd.f32 %v3005_v59, %v2911_v29  ;;  %v3540_v48 = vmul.f32 %v6020_v21, %v5456_v33  ;;  %v3541_v22 = vmul.f32 %v6020_v21, %v5459_v35  ;;  %v3271_v42 = vsel %vm1407_vm5, %v3269_v34, %v3270_v47 }
 0x23b   : > { %v3178_v15 = vadd.f32 %v6269_v5, %v3051_v55  ;;  %v3180_v49 = vadd.f32 %v6264_v30, %v3053_v20  ;;  %v3273_v37 = vsel %vm1407_vm5, %v3270_v47, %v3272_v26  ;;  %v3613_v16 = vadd.f32 %v6299_v50, %v3539_v4 }
 0x23c   : > { %v3179_v10 = vadd.f32 %v6277_v41, %v3052_v56  ;;  %v3614_v46 = vadd.f32 %v6303_v6, %v3540_v48  ;;  %v3615_v11 = vadd.f32 %v6313_v7, %v3541_v22  ;;  %v3642_v21 = vmul.f32 %v6044_v3, %v5428_v9 }
 0x23d   : > { %v3319_v28 = vadd.f32 %v3271_v42, %v3178_v15  ;;  %v3321_v53 = vadd.f32 %v3272_v26, %v3180_v49  ;;  %v3643_v30 = vmul.f32 %v6044_v3, %v5456_v33  ;;  %v3644_v31 = vmul.f32 %v6044_v3, %v5459_v35  ;;  %v6445_v49 = vld [vmem:[%s8486_s5] ss:$0 sm:$0xff] }
 0x23e   : > { %v3320_v5 = vadd.f32 %v3273_v37, %v3179_v10  ;;  %v3999_v41 = vrot.slane %v5428_v9, 1  ;;  %v4000_v50 = vrot.slane %v5456_v33, 1  ;;  %v3704_v40 = vrot.slane %v3642_v21, 1  ;;  %v6467_v21 = vld [vmem:[%s8486_s5 + $0x9] ss:$0 sm:$0xff] }
 0x23f   : > { %v3446_v6 = vadd.f32 %v6293_v36, %v3319_v28  ;;  %v3448_v7 = vadd.f32 %v6286_v52, %v3321_v53  ;;  %v3705_v38 = vrot.slane %v3643_v30, 1  ;;  %v3707_v14 = vrot.slane %v3644_v31, 1 }
 0x240   : > { %v3447_v58 = vadd.f32 %v6307_v61, %v3320_v5  ;;  %v4001_v27 = vsel %vm931_vm3, %v3999_v41, %v4000_v50  ;;  %v4002_v17 = vrot.slane %v5459_v35, 1  ;;  %v4087_v39 = vrot.slane %v5428_v9, 2 }
 0x241   : > { %v3508_v25 = vrot.slane %v3446_v6, 2  ;;  %v3511_v60 = vrot.slane %v3448_v7, 2  ;;  %v3706_v3 = vsel %vm931_vm3, %v3704_v40, %v3705_v38  ;;  %v4049_v54 = vmax.f32 %v5428_v9, %v4001_v27 }
 0x242   : > { %v3509_v12 = vrot.slane %v3447_v58, 2  ;;  %v3708_v36 = vsel %vm931_vm3, %v3705_v38, %v3707_v14  ;;  %v3754_v2 = vadd.f32 %v3706_v3, %v3613_v16  ;;  %v3756_v52 = vadd.f32 %v3707_v14, %v3615_v11  ;;  %v6458_v16 = vld [vmem:[%s8486_s5 + $0x1] ss:$0 sm:$0xff]  ;;  %v6487_v58 = vld [vmem:[%s8486_s5 + $0x2] ss:$0 sm:$0xff] }
 0x243   : > { %v3755_v62 = vadd.f32 %v3708_v36, %v3614_v46  ;;  %v4003_v29 = vsel %vm931_vm3, %v4000_v50, %v4002_v17  ;;  %v4051_v61 = vmax.f32 %v5459_v35, %v4002_v17  ;;  %v4088_v4 = vrot.slane %v5456_v33, 2  ;;  %v6492_v14 = vld [vmem:[%s8486_s5 + $0xa] ss:$0 sm:$0xff] }
 0x244   : > { %v3510_v59 = vsel %vm1169_vm4, %v3508_v25, %v3509_v12  ;;  %v3512_v34 = vsel %vm1169_vm4, %v3509_v12, %v3511_v60  ;;  %v3881_v55 = vadd.f32 %v6341_v1, %v3754_v2  ;;  %v3883_v20 = vadd.f32 %v6335_v43, %v3756_v52  ;;  %v6496_v25 = vpop.permute.xlu1 %4812 }
 0x245   : > { %v4906_v47 = vpack.i.bf16 %v3512_v34, %v3510_v59  ;;  %v3882_v26 = vadd.f32 %v6345_v45, %v3755_v62  ;;  %v4050_v56 = vmax.f32 %v5456_v33, %v4003_v29  ;;  %v4090_v15 = vrot.slane %v5459_v35, 2  ;;  %v6452_v45 = vld [vmem:[%s8486_s5 + $0x8] ss:$0 sm:$0xff] }
 0x246   : > { %v3943_v48 = vrot.slane %v3881_v55, 3  ;;  %v3946_v22 = vrot.slane %v3883_v20, 3  ;;  %v4089_v43 = vsel %vm1169_vm4, %v4087_v39, %v4088_v4  ;;  %v811_v53 = vmul.f32 %v6445_v49, %v5315_v13  ;;  %v6514_v39 = vld [vmem:[%s8486_s5 + $0x3] ss:$0 sm:$0xff]  ;;  %v6525_v20 = vld [vmem:[%s8486_s5 + $0xb] ss:$0 sm:$0xff] }
 0x247   : > { %4907 = vrot.lane.b32.xlu1 %v4906_v47, %s5067_s28  ;;  %v3944_v1 = vrot.slane %v3882_v26, 3  ;;  %v4091_v42 = vsel %vm1169_vm4, %v4088_v4, %v4090_v15  ;;  %v4137_v37 = vmax.f32 %v4049_v54, %v4089_v43  ;;  %v4139_v10 = vmax.f32 %v4051_v61, %v4090_v15  ;;  %s4682_s28 = sshll.u32 %s5154_s21, 9  ;;  %s4537_s21 = scalar_lea.sflag [#allocation4], %s5237_s22 }
 0x248   : > { %v4138_v28 = vmax.f32 %v4050_v56, %v4091_v42  ;;  %v848_v41 = vmul.f32 %v6452_v45, %v5310_v8  ;;  %v883_v6 = vmul.f32 %v6458_v16, %v5315_v13  ;;  %v6475_v7 = vmul.f32 %v6458_v16, %v5328_v23  ;;  %s8437_s12 = scalar_lea.hbm %s8492_s11, %s4682_s28 }
 0x249   : > { %v3945_v46 = vsel %vm1407_vm5, %v3943_v48, %v3944_v1  ;;  %v3947_v11 = vsel %vm1407_vm5, %v3944_v1, %v3946_v22  ;;  %v4199_v5 = vrot.slane %v4137_v37, 2  ;;  %v4202_v31 = vrot.slane %v4139_v10, 2 }
 0x24a   : > { %v4911_v30 = vpack.i.bf16 %v3947_v11, %v3945_v46  ;;  %v4200_v50 = vrot.slane %v4138_v28, 2  ;;  %v1009_v40 = vmul.f32 %v6467_v21, %v5310_v8  ;;  %v6482_v38 = vmul.f32 %v6467_v21, %v5320_v18  ;;  %v6550_v46 = vld [vmem:[%s8486_s5 + $0x4] ss:$0 sm:$0xff] }
 0x24b   : > { %v932_v60 = vrot.slane %v883_v6, 1  ;;  %v8516_v3 = vrot.slane %v6475_v7, 1  ;;  %v862_v12 = vadd.f32 %v848_v41, %v811_v53  ;;  %v1121_v62 = vmul.f32 %v6487_v58, %v5315_v13 }
 0x24c   : > { %4912 = vrot.lane.b32.xlu0 %v4911_v30, %s5068_s14  ;;  %v4201_v27 = vsel %vm1169_vm4, %v4199_v5, %v4200_v50  ;;  %v4203_v17 = vsel %vm1169_vm4, %v4200_v50, %v4202_v31  ;;  %v1051_v36 = vrot.slane %v1009_v40, 1  ;;  %v1052_v2 = vrot.slane %v6482_v38, 1  ;;  %v6560_v5 = vld [vmem:[%s8486_s5 + $0xc] ss:$0 sm:$0xff]  ;;  %v6641_v31 = vld [vmem:[%s8486_s5 + $0x7] ss:$0 sm:$0xff] }
 0x24d   : > { %v4916_v54 = vpack.i.bf16 %v4203_v17, %v4201_v27  ;;  %v934_v52 = vsel %vm931_vm3, %v932_v60, %v8516_v3  ;;  %v6507_v29 = vmul.f32 %v6487_v58, %v5328_v23  ;;  %v1247_v61 = vmul.f32 %v6492_v14, %v5310_v8  ;;  %v6576_v60 = vld [vmem:[%s8486_s5 + $0x5] ss:$0 sm:$0xff]  ;;  %s4999_s14 = sshll.u32 %s5070_s19, 4  ;;  %s5000_s14 = int_to_ptr.vmem [resolvable:$false] %s4999_s14 }
 0x24e   : > { %v988_v34 = vadd.f32 %v934_v52, %v862_v12  ;;  %v6520_v55 = vmul.f32 %v6492_v14, %v5320_v18  ;;  %v1011_v47 = vmul.f32 %v6467_v21, %v5323_v19  ;;  %v1053_v26 = vsel %vm931_vm3, %v1051_v36, %v1052_v2  ;;  %8571 = vst [vmem:[#allocation23_spill] sm:$0xff] %v6576_v60  ;;  %s5001_s26 = scalar_lea.vmem %s5000_s14, 1024 }
 0x24f   : > { %4917 = vrot.lane.b32.xlu1 %v4916_v54, %s5066_s15  ;;  %v1170_v56 = vrot.slane %v1121_v62, 2  ;;  %v8515_v4 = vrot.slane %v6507_v29, 2  ;;  %v1359_v15 = vmul.f32 %v6514_v39, %v5315_v13  ;;  %v6536_v1 = vmul.f32 %v6514_v39, %v5328_v23  ;;  %s4550_s15 = sshll.u32 %s404_s24, 4  ;;  %s8432_s15 = int_to_ptr.vmem [resolvable:$true] %s4550_s15 }
 0x250   : > { %v1100_v48 = vadd.f32 %v1053_v26, %v988_v34  ;;  %v1290_v22 = vrot.slane %v6520_v55, 2  ;;  %v1289_v42 = vrot.slane %v1247_v61, 2  ;;  %v1485_v37 = vmul.f32 %v6525_v20, %v5310_v8  ;;  %v6593_v26 = vld [vmem:[%s8486_s5 + $0xd] ss:$0 sm:$0xff]  ;;  %s4995_s13 = scalar_lea.vmem %s8432_s15, 512  ;;  %p5002_p8 = scmp.lt.s32.totalorder %s8432_s15, %s5000_s14 }
 0x251   : > { %v1172_v43 = vsel %vm1169_vm4, %v1170_v56, %v8515_v4  ;;  %v6545_v10 = vmul.f32 %v6525_v20, %v5320_v18  ;;  %v812_v11 = vmul.f32 %v6445_v49, %v5328_v23  ;;  %v849_v28 = vmul.f32 %v6452_v45, %v5320_v18  ;;  %p4996_p6 = scmp.ne.s32.totalorder %s8432_s15, %s4995_s13  ;;  %p5003_p10 = scmp.lt.s32.totalorder %s5001_s26, %s4995_s13 }
 0x252   : > { %v1226_v53 = vadd.f32 %v1172_v43, %v1100_v48  ;;  %v8514_v30 = vrot.slane %v6536_v1, 3  ;;  %v1291_v41 = vsel %vm1169_vm4, %v1289_v42, %v1290_v22  ;;  %v1408_v50 = vrot.slane %v1359_v15, 3 }
 0x253   : > { %v1528_v6 = vrot.slane %v6545_v10, 3  ;;  %v1054_v40 = vrot.slane %v1011_v47, 1  ;;  %v1597_v27 = vmul.f32 %v6550_v46, %v5315_v13  ;;  %v6571_v17 = vmul.f32 %v6550_v46, %v5328_v23  ;;  %p4997_p12 = pnand %p4996_p6, %p8629_p11  ;;  %p5004_p0 = por %p5003_p10, %p5002_p8 }
 0x254   : > { %v1338_v38 = vadd.f32 %v1291_v41, %v1226_v53  ;;  %v1410_v54 = vsel %vm1407_vm5, %v1408_v50, %v8514_v30  ;;  %v1527_v12 = vrot.slane %v1485_v37, 3  ;;  %v1722_v36 = vmul.f32 %v6560_v5, %v5310_v8  ;;  %v6609_v53 = vld [vmem:[%s8486_s5 + $0x6] ss:$0 sm:$0xff] }
 0x255   : > { %v1723_v52 = vmul.f32 %v6560_v5, %v5320_v18  ;;  %v6585_v62 = vadd.f32 %v849_v28, %v812_v11  ;;  %v1249_v61 = vmul.f32 %v6492_v14, %v5323_v19  ;;  %v8513_v47 = vrot.slane %v6571_v17, 4  ;;  %p4998_p13 = pneg %p4997_p12 }
 0x256   : > { %v1464_v34 = vadd.f32 %v1410_v54, %v1338_v38  ;;  %v1529_v56 = vsel %vm1407_vm5, %v1527_v12, %v1528_v6  ;;  %v1645_v48 = vrot.slane %v1597_v27, 4  ;;  %v1834_v43 = vmul.f32 %v6576_v60, %v5315_v13 }
 0x257   : > { %v1765_v15 = vrot.slane %v1723_v52, 4  ;;  %v1487_v42 = vmul.f32 %v6525_v20, %v5323_v19  ;;  %v1764_v11 = vrot.slane %v1722_v36, 4  ;;  %v6604_v28 = vmul.f32 %v6576_v60, %v5328_v23  ;;  %p5005_p2 = pnand %p5004_p0, %p4998_p13 }
 0x258   : > { %v1576_v37 = vadd.f32 %v1529_v56, %v1464_v34  ;;  %v6612_v41 = vsel %vm931_vm3, %v1052_v2, %v1054_v40  ;;  %v1647_v50 = vsel %vm498_vm0, %v1645_v48, %v8513_v47  ;;  %v1959_v38 = vmul.f32 %v6593_v26, %v5310_v8  ;;  %v6628_v2 = vld [vmem:[%s8486_s5 + $0xe] ss:$0 sm:$0xff] }
 0x259   : > { %v1960_v27 = vmul.f32 %v6593_v26, %v5320_v18  ;;  %v1724_v12 = vmul.f32 %v6560_v5, %v5323_v19  ;;  %v1766_v36 = vsel %vm498_vm0, %v1764_v11, %v1765_v15  ;;  %v8517_v52 = vrot.slane %v6604_v28, 5 }
 0x25a   : > { %v1701_v54 = vadd.f32 %v1647_v50, %v1576_v37  ;;  %v1882_v40 = vrot.slane %v1834_v43, 5  ;;  %v2071_v56 = vmul.f32 %v6609_v53, %v5315_v13  ;;  %v6634_v48 = vmul.f32 %v6609_v53, %v5328_v23 }
 0x25b   : > { %v2002_v34 = vrot.slane %v1960_v27, 5  ;;  %v1292_v37 = vrot.slane %v1249_v61, 2  ;;  %v1530_v50 = vrot.slane %v1487_v42, 3  ;;  %v1961_v11 = vmul.f32 %v6593_v26, %v5323_v19 }
 0x25c   : > { %v1813_v59 = vadd.f32 %v1766_v36, %v1701_v54  ;;  %v1884_v43 = vsel %vm741_vm2, %v1882_v40, %v8517_v52  ;;  %v2001_v27 = vrot.slane %v1959_v38, 5  ;;  %v8519_v47 = vrot.slane %v6634_v48, 6 }
 0x25d   : > { %v2197_v61 = vmul.f32 %v6628_v2, %v5310_v8  ;;  %v1767_v42 = vrot.slane %v1724_v12, 4  ;;  %v2198_v36 = vmul.f32 %v6628_v2, %v5320_v18  ;;  %v2120_v4 = vrot.slane %v2071_v56, 6 }
 0x25e   : > { %v1938_v54 = vadd.f32 %v1884_v43, %v1813_v59  ;;  %v2003_v30 = vsel %vm741_vm2, %v2001_v27, %v2002_v34  ;;  %v2309_v3 = vmul.f32 %v6641_v31, %v5315_v13  ;;  %v6656_v38 = vmul.f32 %v6641_v31, %v5328_v23  ;;  %v6672_v23 = vld [vmem:[%s8486_s5 + $0xf] ss:$0 sm:$0xff] }
 0x25f   : > { %v2004_v40 = vrot.slane %v1961_v11, 5  ;;  %v2199_v12 = vmul.f32 %v6628_v2, %v5323_v19  ;;  %v2240_v59 = vrot.slane %v2198_v36, 6  ;;  %v6663_v43 = vsel %vm1169_vm4, %v1290_v22, %v1292_v37 }
 0x260   : > { %v2050_v52 = vadd.f32 %v2003_v30, %v1938_v54  ;;  %v2122_v56 = vsel %vm2119_vm6, %v2120_v4, %v8519_v47  ;;  %v2239_v13 = vrot.slane %v2197_v61, 6  ;;  %v8518_v27 = vrot.slane %v6656_v38, 7 }
 0x261   : > { %v2436_v55 = vmul.f32 %v6672_v23, %v5320_v18  ;;  %v2437_v22 = vmul.f32 %v6672_v23, %v5323_v19  ;;  %v6681_v4 = vsel %vm1407_vm5, %v1528_v6, %v1530_v50  ;;  %v6684_v37 = vsel %vm498_vm0, %v1765_v15, %v1767_v42  ;;  %v6701_v42 = vpop.permute.xlu0 %4802 }
 0x262   : > { %v2176_v30 = vadd.f32 %v2122_v56, %v2050_v52  ;;  %v2241_v11 = vsel %vm2119_vm6, %v2239_v13, %v2240_v59  ;;  %v2358_v61 = vrot.slane %v2309_v3, 7  ;;  %v6688_v52 = vsel %vm741_vm2, %v2002_v34, %v2004_v40 }
 0x263   : > { %v2242_v54 = vrot.slane %v2199_v12, 6  ;;  %v2435_v56 = vmul.f32 %v6672_v23, %v5310_v8  ;;  %v885_v6 = vmul.f32 %v6458_v16, %v5331_v24  ;;  %v1123_v15 = vmul.f32 %v6487_v58, %v5331_v24 }
 0x264   : > { %v2288_v36 = vadd.f32 %v2241_v11, %v2176_v30  ;;  %v2360_v10 = vsel %vm2357_vm7, %v2358_v61, %v8518_v27  ;;  %v1361_v3 = vmul.f32 %v6514_v39, %v5331_v24  ;;  %v2478_v34 = vrot.slane %v2436_v55, 7 }
 0x265   : > { %v2480_v50 = vrot.slane %v2437_v22, 7  ;;  %v1599_v40 = vmul.f32 %v6550_v46, %v5331_v24  ;;  %v1836_v12 = vmul.f32 %v6576_v60, %v5331_v24  ;;  %v935_v30 = vrot.slane %v885_v6, 1 }
 0x266   : > { %v2414_v13 = vadd.f32 %v2360_v10, %v2288_v36  ;;  %v1173_v11 = vrot.slane %v1123_v15, 2  ;;  %v2073_v61 = vmul.f32 %v6609_v53, %v5331_v24  ;;  %v2477_v27 = vrot.slane %v2435_v56, 7 }
 0x267   : > { %v1411_v47 = vrot.slane %v1361_v3, 3  ;;  %v1648_v35 = vrot.slane %v1599_v40, 4  ;;  %v1885_v33 = vrot.slane %v1836_v12, 5  ;;  %v6710_v55 = vsel %vm2119_vm6, %v2240_v59, %v2242_v54  ;;  %v6745_v12 = vpop.permute.xlu0 %4807 }
 0x268   : > { %v8572_v9 = vrot.slane %v6475_v7, 1  ;;  %v2479_v36 = vsel %vm2357_vm7, %v2477_v27, %v2478_v34  ;;  %v4804_v10 = vunpack.i.l.bf16 %v6701_v42  ;;  %v2311_v56 = vmul.f32 %v6641_v31, %v5331_v24 }
 0x269   : > { %v6722_v15 = vsel %vm2357_vm7, %v2478_v34, %v2480_v50  ;;  %v2526_v59 = vadd.f32 %v2479_v36, %v2414_v13  ;;  %v8573_v54 = vrot.slane %v6507_v29, 2  ;;  %v2123_v7 = vrot.slane %v2073_v61, 6 }
 0x26a   : > { %v936_v32 = vsel %vm931_vm3, %v8572_v9, %v935_v30  ;;  %v8574_v27 = vrot.slane %v6536_v1, 3  ;;  %v8576_v24 = vrot.slane %v6604_v28, 5  ;;  %v813_v29 = vmul.f32 %v6445_v49, %v5310_v8 }
 0x26b   : > { %v989_v6 = vadd.f32 %v936_v32, %v6585_v62  ;;  %v1174_v3 = vsel %vm1169_vm4, %v8573_v54, %v1173_v11  ;;  %v8575_v32 = vrot.slane %v6571_v17, 4  ;;  %v850_v50 = vmul.f32 %v6452_v45, %v5351_v51 }
 0x26c   : > { %v1412_v40 = vsel %vm1407_vm5, %v8574_v27, %v1411_v47  ;;  %v1886_v34 = vsel %vm741_vm2, %v8576_v24, %v1885_v33  ;;  %v887_v1 = vmul.f32 %v6458_v16, %v5320_v18  ;;  %v2361_v17 = vrot.slane %v2311_v56, 7 }
 0x26d   : > { %v1101_v9 = vadd.f32 %v6612_v41, %v989_v6  ;;  %v1649_v62 = vsel %vm498_vm0, %v8575_v32, %v1648_v35  ;;  %v886_v41 = vmul.f32 %v6458_v16, %v5310_v8  ;;  %v1012_v35 = vmul.f32 %v6467_v21, %v5351_v51 }
 0x26e   : > { %v6751_v33 = vmul.f32 %v6467_v21, %v5364_v63  ;;  %v8577_v28 = vrot.slane %v6634_v48, 6  ;;  %v864_v30 = vadd.f32 %v850_v50, %v813_v29  ;;  %v938_v61 = vrot.slane %v887_v1, 1 }
 0x26f   : > { %v1227_v47 = vadd.f32 %v1174_v3, %v1101_v9  ;;  %v937_v11 = vrot.slane %v886_v41, 1  ;;  %v6758_v6 = vsel %vm4348_vm8, %v2526_v59, %v4804_v10  ;;  %v1056_v56 = vrot.slane %v1012_v35, 1 }
 0x270   : > { %v2124_v13 = vsel %vm2119_vm6, %v8577_v28, %v2123_v7  ;;  %v8529_v54 = vrot.slane %v6751_v33, 1  ;;  %v1124_v48 = vmul.f32 %v6487_v58, %v5310_v8  ;;  %v6767_v7 = vmul.f32 %v6487_v58, %v5320_v18 }
 0x271   : > { %v1339_v36 = vadd.f32 %v6663_v43, %v1227_v47  ;;  %v939_v9 = vsel %vm931_vm3, %v937_v11, %v938_v61  ;;  %v814_v59 = vmul.f32 %v6445_v49, %v5320_v18  ;;  %v888_v24 = vmul.f32 %v6458_v16, %v5323_v19 }
 0x272   : > { %v990_v32 = vadd.f32 %v939_v9, %v864_v30  ;;  %v1058_v10 = vsel %vm931_vm3, %v1056_v56, %v8529_v54  ;;  %v1175_v29 = vrot.slane %v1124_v48, 2  ;;  %v8532_v50 = vrot.slane %v6767_v7, 2 }
 0x273   : > { %v1465_v27 = vadd.f32 %v1412_v40, %v1339_v36  ;;  %v1250_v40 = vmul.f32 %v6492_v14, %v5351_v51  ;;  %v6783_v47 = vmul.f32 %v6492_v14, %v5364_v63  ;;  %v851_v35 = vmul.f32 %v6452_v45, %v5364_v63 }
 0x274   : > { %v1102_v1 = vadd.f32 %v1058_v10, %v990_v32  ;;  %v1177_v28 = vsel %vm1169_vm4, %v1175_v29, %v8532_v50  ;;  %v1362_v30 = vmul.f32 %v6514_v39, %v5310_v8  ;;  %v940_v48 = vrot.slane %v888_v24, 1 }
 0x275   : > { %v1577_v41 = vadd.f32 %v6681_v4, %v1465_v27  ;;  %v6794_v4 = vmul.f32 %v6514_v39, %v5320_v18  ;;  %v1294_v56 = vrot.slane %v1250_v40, 2  ;;  %v8528_v9 = vrot.slane %v6783_v47, 2 }
 0x276   : > { %v1228_v36 = vadd.f32 %v1177_v28, %v1102_v1  ;;  %v1413_v27 = vrot.slane %v1362_v30, 3  ;;  %v1488_v10 = vmul.f32 %v6525_v20, %v5351_v51  ;;  %v8578_v24 = vrot.slane %v6656_v38, 7 }
 0x277   : > { %v1702_v11 = vadd.f32 %v1649_v62, %v1577_v41  ;;  %v8531_v32 = vrot.slane %v6794_v4, 3  ;;  %v1296_v3 = vsel %vm1169_vm4, %v1294_v56, %v8528_v9  ;;  %v6806_v62 = vmul.f32 %v6525_v20, %v5364_v63 }
 0x278   : > { %v1600_v41 = vmul.f32 %v6550_v46, %v5310_v8  ;;  %v2362_v1 = vsel %vm2357_vm7, %v8578_v24, %v2361_v17  ;;  %v865_v40 = vadd.f32 %v851_v35, %v814_v59  ;;  %v1340_v28 = vadd.f32 %v1296_v3, %v1228_v36 }
 0x279   : > { %v1814_v29 = vadd.f32 %v6684_v37, %v1702_v11  ;;  %v1532_v30 = vrot.slane %v1488_v10, 3  ;;  %v1415_v37 = vsel %vm1407_vm5, %v1413_v27, %v8531_v32  ;;  %v8530_v11 = vrot.slane %v6806_v62, 3 }
 0x27a   : > { %v1601_v56 = vmul.f32 %v6550_v46, %v5320_v18  ;;  %v941_v9 = vsel %vm931_vm3, %v938_v61, %v940_v48  ;;  %v1126_v38 = vmul.f32 %v6487_v58, %v5323_v19  ;;  %v1466_v54 = vadd.f32 %v1415_v37, %v1340_v28 }
 0x27b   : > { %v1939_v43 = vadd.f32 %v1886_v34, %v1814_v29  ;;  %v1725_v17 = vmul.f32 %v6560_v5, %v5351_v51  ;;  %v1534_v3 = vsel %vm1407_vm5, %v1532_v30, %v8530_v11  ;;  %v1650_v59 = vrot.slane %v1600_v41, 4 }
 0x27c   : > { %v1651_v35 = vrot.slane %v1601_v56, 4  ;;  %v1578_v36 = vadd.f32 %v1534_v3, %v1466_v54  ;;  %v6830_v27 = vmul.f32 %v6560_v5, %v5364_v63  ;;  %v1837_v48 = vmul.f32 %v6576_v60, %v5310_v8 }
 0x27d   : > { %v2051_v34 = vadd.f32 %v6688_v52, %v1939_v43  ;;  %v1769_v61 = vrot.slane %v1725_v17, 4  ;;  %v1364_v29 = vmul.f32 %v6514_v39, %v5323_v19  ;;  %v1838_v43 = vmul.f32 %v6576_v60, %v5320_v18 }
 0x27e   : > { %v1652_v52 = vsel %vm498_vm0, %v1650_v59, %v1651_v35  ;;  %v1602_v54 = vmul.f32 %v6550_v46, %v5323_v19  ;;  %v8535_v24 = vrot.slane %v6830_v27, 4  ;;  %v1839_v28 = vmul.f32 %v6576_v60, %v5323_v19 }
 0x27f   : > { %v2177_v10 = vadd.f32 %v2124_v13, %v2051_v34  ;;  %v1703_v41 = vadd.f32 %v1652_v52, %v1578_v36  ;;  %v1887_v30 = vrot.slane %v1837_v48, 5  ;;  %v1888_v37 = vrot.slane %v1838_v43, 5 }
 0x280   : > { %v1962_v13 = vmul.f32 %v6593_v26, %v5351_v51  ;;  %v6848_v56 = vmul.f32 %v6593_v26, %v5364_v63  ;;  %v1771_v34 = vsel %vm498_vm0, %v1769_v61, %v8535_v24  ;;  %v2074_v3 = vmul.f32 %v6609_v53, %v5310_v8 }
 0x281   : > { %v2289_v17 = vadd.f32 %v6710_v55, %v2177_v10  ;;  %v2075_v59 = vmul.f32 %v6609_v53, %v5320_v18  ;;  %v991_v36 = vadd.f32 %v941_v9, %v865_v40  ;;  %v1178_v48 = vrot.slane %v1126_v38, 2 }
 0x282   : > { %v1815_v52 = vadd.f32 %v1771_v34, %v1703_v41  ;;  %v2006_v43 = vrot.slane %v1962_v13, 5  ;;  %v1416_v11 = vrot.slane %v1364_v29, 3  ;;  %v1653_v22 = vrot.slane %v1602_v54, 4 }
 0x283   : > { %v1889_v32 = vsel %vm741_vm2, %v1887_v30, %v1888_v37  ;;  %v2007_v55 = vrot.slane %v6848_v56, 5  ;;  %v1890_v10 = vrot.slane %v1839_v28, 5  ;;  %v2126_v60 = vrot.slane %v2075_v59, 6 }
 0x284   : > { %v1940_v50 = vadd.f32 %v1889_v32, %v1815_v52  ;;  %v2200_v61 = vmul.f32 %v6628_v2, %v5351_v51  ;;  %v2415_v24 = vadd.f32 %v2362_v1, %v2289_v17  ;;  %v2125_v40 = vrot.slane %v2074_v3, 6 }
 0x285   : > { %v2008_v9 = vsel %vm741_vm2, %v2006_v43, %v2007_v55  ;;  %v6867_v38 = vmul.f32 %v6628_v2, %v5364_v63  ;;  %v2076_v54 = vmul.f32 %v6609_v53, %v5323_v19  ;;  %v2312_v32 = vmul.f32 %v6641_v31, %v5310_v8 }
 0x286   : > { %v2052_v29 = vadd.f32 %v2008_v9, %v1940_v50  ;;  %v2244_v41 = vrot.slane %v2200_v61, 6  ;;  %v2127_v28 = vsel %vm2119_vm6, %v2125_v40, %v2126_v60  ;;  %v2313_v30 = vmul.f32 %v6641_v31, %v5320_v18 }
 0x287   : > { %v2245_v1 = vrot.slane %v6867_v38, 6  ;;  %v2314_v13 = vmul.f32 %v6641_v31, %v5323_v19  ;;  %v8579_v17 = vrot.slane %v6767_v7, 2  ;;  %v2438_v3 = vmul.f32 %v6672_v23, %v5351_v51 }
 0x288   : > { %v2178_v34 = vadd.f32 %v2127_v28, %v2052_v29  ;;  %v6886_v8 = vmul.f32 %v6672_v23, %v5364_v63  ;;  %v8580_v59 = vrot.slane %v6794_v4, 3  ;;  %v6892_v18 = vsel %vm498_vm0, %v1651_v35, %v1653_v22  ;;  %v6904_v29 = vpop.permute.xlu1 %4822 }
 0x289   : > { %v1179_v50 = vsel %vm1169_vm4, %v8579_v17, %v1178_v48  ;;  %v2246_v19 = vsel %vm2119_vm6, %v2244_v41, %v2245_v1  ;;  %v2364_v7 = vrot.slane %v2313_v30, 7  ;;  %v2527_v48 = vadd.f32 %v6722_v15, %v2415_v24 }
 0x28a   : > { %v1417_v52 = vsel %vm1407_vm5, %v8580_v59, %v1416_v11  ;;  %v6897_v43 = vsel %vm741_vm2, %v1888_v37, %v1890_v10  ;;  %v2128_v61 = vrot.slane %v2076_v54, 6  ;;  %v2290_v9 = vadd.f32 %v2246_v19, %v2178_v34 }
 0x28b   : > { %v2363_v40 = vrot.slane %v2312_v32, 7  ;;  %v2366_v38 = vrot.slane %v2314_v13, 7  ;;  %v1014_v4 = vmul.f32 %v6467_v21, %v5367_v0  ;;  %v1252_v11 = vmul.f32 %v6492_v14, %v5367_v0 }
 0x28c   : > { %v2482_v22 = vrot.slane %v2438_v3, 7  ;;  %v2483_v35 = vrot.slane %v6886_v8, 7  ;;  %v1490_v15 = vmul.f32 %v6525_v20, %v5367_v0  ;;  %v1727_v24 = vmul.f32 %v6560_v5, %v5367_v0 }
 0x28d   : > { %v2365_v37 = vsel %vm2357_vm7, %v2363_v40, %v2364_v7  ;;  %v1059_v10 = vrot.slane %v1014_v4, 1  ;;  %v1964_v54 = vmul.f32 %v6593_v26, %v5367_v0  ;;  %v2202_v41 = vmul.f32 %v6628_v2, %v5367_v0 }
 0x28e   : > { %v8581_v32 = vunpack.i.h.bf16 %v6701_v42  ;;  %v2416_v30 = vadd.f32 %v2365_v37, %v2290_v9  ;;  %v1297_v13 = vrot.slane %v1252_v11, 2  ;;  %v1535_v17 = vrot.slane %v1490_v15, 3 }
 0x28f   : > { %v6919_v34 = vsel %vm2119_vm6, %v2126_v60, %v2128_v61  ;;  %v4825_v3 = vunpack.i.h.bf16 %v6904_v29  ;;  %v8582_v8 = vrot.slane %v6751_v33, 1  ;;  %v1772_v19 = vrot.slane %v1727_v24, 4 }
 0x290   : > { %v4350_v28 = vsel %vm4348_vm8, %v2527_v48, %v8581_v32  ;;  %v6926_v40 = vsel %vm2357_vm7, %v2364_v7, %v2366_v38  ;;  %v4824_v42 = vunpack.i.l.bf16 %v6904_v29  ;;  %v2440_v48 = vmul.f32 %v6672_v23, %v5367_v0  ;;  %v6948_v32 = vpop.permute.xlu0 %4817 }
 0x291   : > { %v1060_v59 = vsel %vm931_vm3, %v8582_v8, %v1059_v10  ;;  %v2484_v9 = vsel %vm2357_vm7, %v2482_v22, %v2483_v35  ;;  %v2009_v60 = vrot.slane %v1964_v54, 5  ;;  %v2247_v61 = vrot.slane %v2202_v41, 6 }
 0x292   : > { %v1103_v4 = vadd.f32 %v1060_v59, %v991_v36  ;;  %v2528_v11 = vadd.f32 %v2484_v9, %v2416_v30  ;;  %v8583_v33 = vrot.slane %v6783_v47, 2  ;;  %v8584_v7 = vrot.slane %v6806_v62, 3  ;;  %v6984_v9 = vpop.permute.xlu1 %4827 }
 0x293   : > { %v8585_v36 = vrot.slane %v6830_v27, 4  ;;  %v8586_v10 = vunpack.i.l.bf16 %v6745_v12  ;;  %v8587_v54 = vunpack.i.h.bf16 %v6745_v12  ;;  %v2485_v41 = vrot.slane %v2440_v48, 7 }
 0x294   : > { %v1229_v15 = vadd.f32 %v1179_v50, %v1103_v4  ;;  %v1298_v24 = vsel %vm1169_vm4, %v8583_v33, %v1297_v13  ;;  %v1536_v38 = vsel %vm1407_vm5, %v8584_v7, %v1535_v17  ;;  %v8588_v62 = vunpack.i.l.bf16 %v6496_v25 }
 0x295   : > { %v1773_v37 = vsel %vm498_vm0, %v8585_v36, %v1772_v19  ;;  %v4366_v22 = vsel %vm4365_vm9, %v6758_v6, %v8586_v10  ;;  %v4367_v50 = vsel %vm4365_vm9, %v4350_v28, %v8587_v54  ;;  %v8589_v30 = vunpack.i.h.bf16 %v6496_v25 }
 0x296   : > { %v1341_v47 = vadd.f32 %v1298_v24, %v1229_v15  ;;  %v4383_v27 = vsel %vm4382_vm10, %v4366_v22, %v8588_v62  ;;  %v2010_v6 = vsel %vm741_vm2, %v2007_v55, %v2009_v60  ;;  %v6960_v12 = vsel %vm2119_vm6, %v2245_v1, %v2247_v61 }
 0x297   : > { %v4384_v13 = vsel %vm4382_vm10, %v4367_v50, %v8589_v30  ;;  %v815_v17 = vmul.f32 %v6445_v49, %v5351_v51  ;;  %v4351_v59 = vsel %vm4348_vm8, %v2528_v11, %v4824_v42  ;;  %v852_v19 = vmul.f32 %v6452_v45, %v5346_v44 }
 0x298   : > { %v4399_v28 = vpack.c.bf16 %v4384_v13, %v4383_v27  ;;  %v1467_v8 = vadd.f32 %v1417_v52, %v1341_v47  ;;  %v889_v25 = vmul.f32 %v6458_v16, %v5351_v51  ;;  %v4819_v56 = vunpack.i.l.bf16 %v6948_v32 }
 0x299   : > { %v6972_v55 = vmul.f32 %v6458_v16, %v5364_v63  ;;  %v1015_v1 = vmul.f32 %v6467_v21, %v5346_v44  ;;  %v6978_v52 = vmul.f32 %v6467_v21, %v5356_v57  ;;  %v6981_v4 = vsel %vm2357_vm7, %v2483_v35, %v2485_v41 }
 0x29a   : > { %4726 = vmatprep.subr.bf16.mxu1 %v4399_v28  ;;  %v1579_v42 = vadd.f32 %v1536_v38, %v1467_v8  ;;  %v4820_v48 = vunpack.i.h.bf16 %v6948_v32  ;;  %v942_v60 = vrot.slane %v889_v25, 1  ;;  %v866_v61 = vadd.f32 %v852_v19, %v815_v17 }
 0x29b   : > { %4727 = vmatpush3.bf16.xpose.msra.mxu1 %v4399_v28  ;;  %v943_v11 = vrot.slane %v6972_v55, 1  ;;  %v1061_v15 = vrot.slane %v1015_v1, 1  ;;  %v1062_v33 = vrot.slane %v6978_v52, 1  ;;  %v1127_v7 = vmul.f32 %v6487_v58, %v5351_v51 }
 0x29c   : > { %v1704_v24 = vadd.f32 %v6892_v18, %v1579_v42  ;;  %v6993_v35 = vmul.f32 %v6487_v58, %v5364_v63  ;;  %v1253_v38 = vmul.f32 %v6492_v14, %v5346_v44  ;;  %v6998_v36 = vsel %vm4365_vm9, %v4351_v59, %v4819_v56  ;;  %v8590_v59 = vld [vmem:[#allocation10_spill] sm:$0xff] }
 0x29d   : > { %v944_v22 = vsel %vm931_vm3, %v942_v60, %v943_v11  ;;  %v7006_v18 = vmul.f32 %v6492_v14, %v5356_v57  ;;  %v1180_v47 = vrot.slane %v1127_v7, 2  ;;  %v1063_v62 = vsel %vm931_vm3, %v1061_v15, %v1062_v33 }
 0x29e   : > { %v1816_v54 = vadd.f32 %v1773_v37, %v1704_v24  ;;  %v992_v50 = vadd.f32 %v944_v22, %v866_v61  ;;  %v8538_v41 = vrot.slane %v6993_v35, 2  ;;  %v1299_v27 = vrot.slane %v1253_v38, 2 }
 0x29f   : > { %v1300_v30 = vrot.slane %v7006_v18, 2  ;;  %v1365_v13 = vmul.f32 %v6514_v39, %v5351_v51  ;;  %v7017_v37 = vmul.f32 %v6514_v39, %v5364_v63  ;;  %v1017_v19 = vmul.f32 %v6467_v21, %v8590_v59 }
 0x2a0   : > { %v1941_v28 = vadd.f32 %v6897_v43, %v1816_v54  ;;  %v1104_v8 = vadd.f32 %v1063_v62, %v992_v50  ;;  %v1182_v25 = vsel %vm1169_vm4, %v1180_v47, %v8538_v41  ;;  %v1491_v1 = vmul.f32 %v6525_v20, %v5346_v44 }
 0x2a1   : > { %v1418_v56 = vrot.slane %v1365_v13, 3  ;;  %v8537_v42 = vrot.slane %v7017_v37, 3  ;;  %v7029_v60 = vmul.f32 %v6525_v20, %v5356_v57  ;;  %v816_v61 = vmul.f32 %v6445_v49, %v5364_v63 }
 0x2a2   : > { %v2053_v52 = vadd.f32 %v2010_v6, %v1941_v28  ;;  %v1230_v43 = vadd.f32 %v1182_v25, %v1104_v8  ;;  %v1301_v15 = vsel %vm1169_vm4, %v1299_v27, %v1300_v30  ;;  %v1537_v24 = vrot.slane %v1491_v1, 3 }
 0x2a3   : > { %v1603_v7 = vmul.f32 %v6550_v46, %v5351_v51  ;;  %v853_v38 = vmul.f32 %v6452_v45, %v5356_v57  ;;  %v1538_v54 = vrot.slane %v7029_v60, 3  ;;  %v1420_v50 = vsel %vm1407_vm5, %v1418_v56, %v8537_v42 }
 0x2a4   : > { %v2179_v6 = vadd.f32 %v6919_v34, %v2053_v52  ;;  %v1342_v22 = vadd.f32 %v1301_v15, %v1230_v43  ;;  %v7047_v47 = vmul.f32 %v6550_v46, %v5364_v63  ;;  %v1728_v27 = vmul.f32 %v6560_v5, %v5346_v44 }
 0x2a5   : > { %v1655_v62 = vrot.slane %v1603_v7, 4  ;;  %v1064_v13 = vrot.slane %v1017_v19, 1  ;;  %v1255_v34 = vmul.f32 %v6492_v14, %v8590_v59  ;;  %v1729_v8 = vmul.f32 %v6560_v5, %v5356_v57  ;;  %v8591_v19 = vld [vmem:[#allocation23_spill] sm:$0xff] }
 0x2a6   : > { %v1468_v28 = vadd.f32 %v1420_v50, %v1342_v22  ;;  %v2291_v25 = vadd.f32 %v6960_v12, %v2179_v6  ;;  %v1539_v56 = vsel %vm1407_vm5, %v1537_v24, %v1538_v54  ;;  %v8536_v1 = vrot.slane %v7047_v47, 4 }
 0x2a7   : > { %v1774_v52 = vrot.slane %v1728_v27, 4  ;;  %v1493_v43 = vmul.f32 %v6525_v20, %v8590_v59  ;;  %v1775_v15 = vrot.slane %v1729_v8, 4  ;;  %v1840_v7 = vmul.f32 %v8591_v19, %v5351_v51 }
 0x2a8   : > { %v1580_v60 = vadd.f32 %v1539_v56, %v1468_v28  ;;  %v1657_v22 = vsel %vm498_vm0, %v1655_v62, %v8536_v1  ;;  %v1730_v12 = vmul.f32 %v6560_v5, %v8590_v59  ;;  %v7069_v24 = vmul.f32 %v8591_v19, %v5364_v63 }
 0x2a9   : > { %v1965_v6 = vmul.f32 %v6593_v26, %v5346_v44  ;;  %v7073_v50 = vadd.f32 %v853_v38, %v816_v61  ;;  %v7076_v27 = vsel %vm931_vm3, %v1062_v33, %v1064_v13  ;;  %v1892_v8 = vrot.slane %v1840_v7, 5 }
 0x2aa   : > { %v1705_v28 = vadd.f32 %v1657_v22, %v1580_v60  ;;  %v2417_v56 = vadd.f32 %v6926_v40, %v2291_v25  ;;  %v1776_v62 = vsel %vm498_vm0, %v1774_v52, %v1775_v15  ;;  %v1893_v10 = vrot.slane %v7069_v24, 5 }
 0x2ab   : > { %v1966_v17 = vmul.f32 %v6593_v26, %v5356_v57  ;;  %v1302_v1 = vrot.slane %v1255_v34, 2  ;;  %v2011_v41 = vrot.slane %v1965_v6, 5  ;;  %v2077_v61 = vmul.f32 %v6609_v53, %v5351_v51 }
 0x2ac   : > { %v1817_v42 = vadd.f32 %v1776_v62, %v1705_v28  ;;  %v1540_v38 = vrot.slane %v1493_v43, 3  ;;  %v1777_v33 = vrot.slane %v1730_v12, 4  ;;  %v1894_v13 = vsel %vm741_vm2, %v1892_v8, %v1893_v10 }
 0x2ad   : > { %v2012_v40 = vrot.slane %v1966_v17, 5  ;;  %v7090_v52 = vmul.f32 %v6609_v53, %v5364_v63  ;;  %v2130_v60 = vrot.slane %v2077_v61, 6  ;;  %v2203_v34 = vmul.f32 %v6628_v2, %v5346_v44 }
 0x2ae   : > { %v1942_v25 = vadd.f32 %v1894_v13, %v1817_v42  ;;  %v2529_v7 = vadd.f32 %v6981_v4, %v2417_v56  ;;  %v1967_v43 = vmul.f32 %v6593_v26, %v8590_v59  ;;  %v2204_v12 = vmul.f32 %v6628_v2, %v5356_v57 }
 0x2af   : > { %v2013_v22 = vsel %vm741_vm2, %v2011_v41, %v2012_v40  ;;  %v2131_v42 = vrot.slane %v7090_v52, 6  ;;  %v2249_v6 = vrot.slane %v2203_v34, 6  ;;  %v2315_v28 = vmul.f32 %v6641_v31, %v5351_v51 }
 0x2b0   : > { %v2054_v17 = vadd.f32 %v2013_v22, %v1942_v25  ;;  %v4352_v8 = vsel %vm4348_vm8, %v2529_v7, %v4825_v3  ;;  %v2205_v4 = vmul.f32 %v6628_v2, %v8590_v59  ;;  %v2250_v56 = vrot.slane %v2204_v12, 6 }
 0x2b1   : > { %v7110_v41 = vmul.f32 %v6641_v31, %v5364_v63  ;;  %v1303_v62 = vsel %vm1169_vm4, %v1300_v30, %v1302_v1  ;;  %v2132_v61 = vsel %vm2119_vm6, %v2130_v60, %v2131_v42  ;;  %v2441_v51 = vmul.f32 %v6672_v23, %v5346_v44 }
 0x2b2   : > { %v2442_v29 = vmul.f32 %v6672_v23, %v5356_v57  ;;  %v7121_v3 = vsel %vm1407_vm5, %v1538_v54, %v1540_v38  ;;  %v2180_v13 = vadd.f32 %v2132_v61, %v2054_v17  ;;  %v2368_v25 = vrot.slane %v2315_v28, 7 }
 0x2b3   : > { %v2369_v63 = vrot.slane %v7110_v41, 7  ;;  %v4369_v18 = vsel %vm4365_vm9, %v4352_v8, %v4820_v48  ;;  %v7128_v30 = vsel %vm498_vm0, %v1775_v15, %v1777_v33  ;;  %v2251_v1 = vsel %vm2119_vm6, %v2249_v6, %v2250_v56  ;;  %v7142_v33 = vpop.permute.xlu0 %4837 }
 0x2b4   : > { %v2443_v52 = vmul.f32 %v6672_v23, %v8590_v59  ;;  %v2014_v60 = vrot.slane %v1967_v43, 5  ;;  %v2252_v34 = vrot.slane %v2205_v4, 6  ;;  %v2292_v54 = vadd.f32 %v2251_v1, %v2180_v13 }
 0x2b5   : > { %v891_v38 = vmul.f32 %v6458_v16, %v5367_v0  ;;  %v2487_v7 = vrot.slane %v2441_v51, 7  ;;  %v2488_v22 = vrot.slane %v2442_v29, 7  ;;  %v1129_v32 = vmul.f32 %v6487_v58, %v5367_v0 }
 0x2b6   : > { %v1367_v48 = vmul.f32 %v6514_v39, %v5367_v0  ;;  %v2370_v15 = vsel %vm2357_vm7, %v2368_v25, %v2369_v63  ;;  %v1605_v12 = vmul.f32 %v6550_v46, %v5367_v0  ;;  %v1842_v17 = vmul.f32 %v8591_v19, %v5367_v0 }
 0x2b7   : > { %v945_v43 = vrot.slane %v891_v38, 1  ;;  %v2418_v6 = vadd.f32 %v2370_v15, %v2292_v54  ;;  %v2490_v28 = vrot.slane %v2443_v52, 7  ;;  %v1183_v8 = vrot.slane %v1129_v32, 2 }
 0x2b8   : > { %v2079_v4 = vmul.f32 %v6609_v53, %v5367_v0  ;;  %v1421_v51 = vrot.slane %v1367_v48, 3  ;;  %v1658_v29 = vrot.slane %v1605_v12, 4  ;;  %v1895_v13 = vrot.slane %v1842_v17, 5 }
 0x2b9   : > { %v946_v61 = vsel %vm931_vm3, %v943_v11, %v945_v43  ;;  %v7154_v25 = vsel %vm741_vm2, %v2012_v40, %v2014_v60  ;;  %v4839_v1 = vunpack.i.l.bf16 %v7142_v33  ;;  %v2317_v52 = vmul.f32 %v6641_v31, %v5367_v0  ;;  %v7181_v43 = vpop.permute.xlu1 %4832 }
 0x2ba   : > { %v993_v38 = vadd.f32 %v946_v61, %v7073_v50  ;;  %v7161_v54 = vsel %vm2119_vm6, %v2250_v56, %v2252_v34  ;;  %v2489_v55 = vsel %vm2357_vm7, %v2487_v7, %v2488_v22  ;;  %v4840_v11 = vunpack.i.h.bf16 %v7142_v33 }
 0x2bb   : > { %v2133_v32 = vrot.slane %v2079_v4, 6  ;;  %v7166_v48 = vsel %vm2357_vm7, %v2488_v22, %v2490_v28  ;;  %v2530_v40 = vadd.f32 %v2489_v55, %v2418_v6  ;;  %v8592_v15 = vrot.slane %v6993_v35, 2 }
 0x2bc   : > { %v1105_v60 = vadd.f32 %v7076_v27, %v993_v38  ;;  %v8593_v0 = vrot.slane %v7017_v37, 3  ;;  %v8594_v34 = vrot.slane %v7047_v47, 4  ;;  %v1896_v22 = vsel %vm741_vm2, %v1893_v10, %v1895_v13 }
 0x2bd   : > { %v1184_v50 = vsel %vm1169_vm4, %v8592_v15, %v1183_v8  ;;  %v8595_v27 = vunpack.i.l.bf16 %v6984_v9  ;;  %v2371_v17 = vrot.slane %v2317_v52, 7  ;;  %v4353_v37 = vsel %vm4348_vm8, %v2530_v40, %v4839_v1  ;;  %v8597_v8 = vld [vmem:[#allocation12_spill] sm:$0xff] }
 0x2be   : > { %v1422_v56 = vsel %vm1407_vm5, %v8593_v0, %v1421_v51  ;;  %v1659_v7 = vsel %vm498_vm0, %v8594_v34, %v1658_v29  ;;  %v1231_v12 = vadd.f32 %v1184_v50, %v1105_v60  ;;  %v8596_v6 = vunpack.i.h.bf16 %v6984_v9 }
 0x2bf   : > { %v4385_v35 = vsel %vm4382_vm10, %v6998_v36, %v8595_v27  ;;  %v7192_v28 = vsel %vm2119_vm6, %v2131_v42, %v2133_v32  ;;  %v817_v10 = vmul.f32 %v6445_v49, %v5346_v44  ;;  %v854_v4 = vmul.f32 %v6452_v45, %v8597_v8  ;;  %v8598_v45 = vld [vmem:[#allocation15_spill] sm:$0xff] }
 0x2c0   : > { %v4386_v47 = vsel %vm4382_vm10, %v4369_v18, %v8596_v6  ;;  %v1343_v61 = vadd.f32 %v1303_v62, %v1231_v12  ;;  %v4835_v36 = vunpack.i.h.bf16 %v7181_v43  ;;  %v892_v51 = vmul.f32 %v6458_v16, %v5346_v44  ;;  %v7206_v18 = vpop.permute.xlu0 %4842 }
 0x2c1   : > { %v4400_v24 = vpack.c.bf16 %v4386_v47, %v4385_v35  ;;  %v7203_v9 = vmul.f32 %v6458_v16, %v5356_v57  ;;  %v4834_v42 = vunpack.i.l.bf16 %v7181_v43  ;;  %v868_v29 = vadd.f32 %v854_v4, %v817_v10 }
 0x2c2   : > { %v1018_v49 = vmul.f32 %v6467_v21, %v8597_v8  ;;  %v7212_v62 = vmul.f32 %v6467_v21, %v8598_v45  ;;  %v1469_v13 = vadd.f32 %v1422_v56, %v1343_v61  ;;  %v7217_v1 = vsel %vm2357_vm7, %v2369_v63, %v2371_v17  ;;  %v7250_v17 = vld [vmem:[%s8486_s5 + $0xa] ss:$0 sm:$0xff] }
 0x2c3   : > { %4728 = vmatprep.subr.bf16.mxu1 %v4400_v24  ;;  %v947_v16 = vrot.slane %v892_v51, 1  ;;  %v948_v38 = vrot.slane %v7203_v9, 1  ;;  %v1130_v32 = vmul.f32 %v6487_v58, %v5346_v44  ;;  %v7225_v21 = vmul.f32 %v6487_v58, %v5356_v57  ;;  %v7240_v58 = vld [vmem:[%s8486_s5 + $0x1] ss:$0 sm:$0xff] }
 0x2c4   : > { %4729 = vmatpush3.bf16.xpose.msra.mxu1 %v4400_v24  ;;  %v1066_v52 = vrot.slane %v1018_v49, 1  ;;  %v1067_v55 = vrot.slane %v7212_v62, 1  ;;  %v1581_v40 = vadd.f32 %v7121_v3, %v1469_v13  ;;  %v7232_v15 = vsel %vm4365_vm9, %v4353_v37, %v4834_v42 }
 0x2c5   : > { %v949_v60 = vsel %vm931_vm3, %v947_v16, %v948_v38  ;;  %v1185_v56 = vrot.slane %v1130_v32, 2  ;;  %v894_v3 = vmul.f32 %v7240_v58, %v8590_v59  ;;  %v1186_v27 = vrot.slane %v7225_v21, 2 }
 0x2c6   : > { %v994_v50 = vadd.f32 %v949_v60, %v868_v29  ;;  %v1068_v0 = vsel %vm931_vm3, %v1066_v52, %v1067_v55  ;;  %v1706_v34 = vadd.f32 %v1659_v7, %v1581_v40  ;;  %v1256_v35 = vmul.f32 %v6492_v14, %v8597_v8  ;;  %v7266_v14 = vld [vmem:[%s8486_s5] ss:$0 sm:$0xff]  ;;  %v7301_v60 = vld [vmem:[%s8486_s5 + $0x2] ss:$0 sm:$0xff] }
 0x2c7   : > { %v7254_v7 = vmul.f32 %v7250_v17, %v8598_v45  ;;  %v1368_v37 = vmul.f32 %v6514_v39, %v5346_v44  ;;  %v7260_v6 = vmul.f32 %v6514_v39, %v5356_v57  ;;  %v818_v24 = vmul.f32 %v7266_v14, %v5356_v57  ;;  %v7276_v39 = vld [vmem:[%s8486_s5 + $0x8] ss:$0 sm:$0xff] }
 0x2c8   : > { %v1106_v12 = vadd.f32 %v1068_v0, %v994_v50  ;;  %v1818_v47 = vadd.f32 %v7128_v30, %v1706_v34  ;;  %v1187_v10 = vsel %vm1169_vm4, %v1185_v56, %v1186_v27  ;;  %v1304_v4 = vrot.slane %v1256_v35, 2  ;;  %v7308_v56 = vld [vmem:[%s8486_s5 + $0x3] ss:$0 sm:$0xff] }
 0x2c9   : > { %v855_v30 = vmul.f32 %v7276_v39, %v8598_v45  ;;  %v1305_v51 = vrot.slane %v7254_v7, 2  ;;  %v1423_v9 = vrot.slane %v1368_v37, 3  ;;  %v1424_v29 = vrot.slane %v7260_v6, 3 }
 0x2ca   : > { %v1232_v61 = vadd.f32 %v1187_v10, %v1106_v12  ;;  %v1943_v42 = vadd.f32 %v1896_v22, %v1818_v47  ;;  %v1494_v49 = vmul.f32 %v6525_v20, %v8597_v8  ;;  %v7286_v13 = vmul.f32 %v6525_v20, %v8598_v45 }
 0x2cb   : > { %v950_v16 = vrot.slane %v894_v3, 1  ;;  %v1306_v52 = vsel %vm1169_vm4, %v1304_v4, %v1305_v51  ;;  %v1606_v32 = vmul.f32 %v6550_v46, %v5346_v44  ;;  %v7295_v22 = vmul.f32 %v6550_v46, %v5356_v57 }
 0x2cc   : > { %v2055_v40 = vadd.f32 %v7154_v25, %v1943_v42  ;;  %v1132_v20 = vmul.f32 %v7301_v60, %v8590_v59  ;;  %v1344_v50 = vadd.f32 %v1306_v52, %v1232_v61  ;;  %v1542_v0 = vrot.slane %v1494_v49, 3 }
 0x2cd   : > { %v1370_v46 = vmul.f32 %v7308_v56, %v8590_v59  ;;  %v1425_v25 = vsel %vm1407_vm5, %v1423_v9, %v1424_v29  ;;  %v1543_v34 = vrot.slane %v7286_v13, 3  ;;  %v1660_v3 = vrot.slane %v1606_v32, 4 }
 0x2ce   : > { %v869_v35 = vadd.f32 %v855_v30, %v818_v24  ;;  %v1470_v12 = vadd.f32 %v1425_v25, %v1344_v50  ;;  %v1661_v37 = vrot.slane %v7295_v22, 4  ;;  %v1731_v6 = vmul.f32 %v6560_v5, %v8597_v8 }
 0x2cf   : > { %v2181_v47 = vadd.f32 %v7192_v28, %v2055_v40  ;;  %v1544_v10 = vsel %vm1407_vm5, %v1542_v0, %v1543_v34  ;;  %v7323_v4 = vmul.f32 %v6560_v5, %v8598_v45  ;;  %v1843_v61 = vmul.f32 %v8591_v19, %v5346_v44  ;;  %v7337_v5 = vld [vmem:[%s8486_s5 + $0x4] ss:$0 sm:$0xff] }
 0x2d0   : > { %v951_v24 = vsel %vm931_vm3, %v948_v38, %v950_v16  ;;  %v1188_v30 = vrot.slane %v1132_v20, 2  ;;  %v1582_v9 = vadd.f32 %v1544_v10, %v1470_v12  ;;  %v1779_v42 = vrot.slane %v1731_v6, 4 }
 0x2d1   : > { %v1426_v49 = vrot.slane %v1370_v46, 3  ;;  %v1662_v52 = vsel %vm498_vm0, %v1660_v3, %v1661_v37  ;;  %v8540_v28 = vrot.slane %v7323_v4, 4  ;;  %v7332_v32 = vmul.f32 %v8591_v19, %v5356_v57 }
 0x2d2   : > { %v1608_v38 = vmul.f32 %v7337_v5, %v8590_v59  ;;  %v1707_v16 = vadd.f32 %v1662_v52, %v1582_v9  ;;  %v1897_v22 = vrot.slane %v1843_v61, 5  ;;  %v1968_v40 = vmul.f32 %v6593_v26, %v8597_v8  ;;  %v7395_v52 = vld [vmem:[%s8486_s5 + $0x6] ss:$0 sm:$0xff] }
 0x2d3   : > { %v2293_v20 = vadd.f32 %v7161_v54, %v2181_v47  ;;  %v1781_v19 = vsel %vm498_vm0, %v1779_v42, %v8540_v28  ;;  %v1898_v50 = vrot.slane %v7332_v32, 5  ;;  %v7350_v0 = vmul.f32 %v6593_v26, %v8598_v45 }
 0x2d4   : > { %v7352_v46 = vadd.f32 %v951_v24, %v869_v35  ;;  %v1819_v25 = vadd.f32 %v1781_v19, %v1707_v16  ;;  %v2016_v3 = vrot.slane %v1968_v40, 5  ;;  %v2080_v12 = vmul.f32 %v6609_v53, %v5346_v44 }
 0x2d5   : > { %v7359_v54 = vsel %vm1169_vm4, %v1186_v27, %v1188_v30  ;;  %v1899_v6 = vsel %vm741_vm2, %v1897_v22, %v1898_v50  ;;  %v8539_v47 = vrot.slane %v7350_v0, 5  ;;  %v7367_v26 = vmul.f32 %v6609_v53, %v5356_v57  ;;  %v7382_v53 = vld [vmem:[%s8486_s5 + $0x5] ss:$0 sm:$0xff] }
 0x2d6   : > { %v7370_v35 = vsel %vm1407_vm5, %v1424_v29, %v1426_v49  ;;  %v1663_v10 = vrot.slane %v1608_v38, 4  ;;  %v1944_v61 = vadd.f32 %v1899_v6, %v1819_v25  ;;  %v2135_v24 = vrot.slane %v2080_v12, 6 }
 0x2d7   : > { %v2419_v21 = vadd.f32 %v7217_v1, %v2293_v20  ;;  %v2018_v27 = vsel %vm741_vm2, %v2016_v3, %v8539_v47  ;;  %v2136_v30 = vrot.slane %v7367_v26, 6  ;;  %v2206_v9 = vmul.f32 %v6628_v2, %v8597_v8 }
 0x2d8   : > { %v1845_v29 = vmul.f32 %v7382_v53, %v8590_v59  ;;  %v2056_v42 = vadd.f32 %v2018_v27, %v1944_v61  ;;  %v7388_v1 = vmul.f32 %v6628_v2, %v8598_v45  ;;  %v2318_v49 = vmul.f32 %v6641_v31, %v5346_v44 }
 0x2d9   : > { %v2082_v38 = vmul.f32 %v7395_v52, %v8590_v59  ;;  %v2137_v16 = vsel %vm2119_vm6, %v2135_v24, %v2136_v30  ;;  %v2254_v22 = vrot.slane %v2206_v9, 6  ;;  %v2319_v40 = vmul.f32 %v6641_v31, %v5356_v57  ;;  %v7417_v31 = vld [vmem:[%s8486_s5 + $0x7] ss:$0 sm:$0xff] }
 0x2da   : > { %v7403_v2 = vsel %vm498_vm0, %v1661_v37, %v1663_v10  ;;  %v2182_v20 = vadd.f32 %v2137_v16, %v2056_v42  ;;  %v2255_v44 = vrot.slane %v7388_v1, 6  ;;  %v2373_v19 = vrot.slane %v2318_v49, 7  ;;  %v8599_v10 = vld [vmem:[#allocation16_spill] sm:$0xff]  ;;  %v7437_v42 = vld [vmem:[%s8486_s5 + $0xb] ss:$0 sm:$0xff] }
 0x2db   : > { %v2531_v25 = vadd.f32 %v7166_v48, %v2419_v21  ;;  %v2374_v3 = vrot.slane %v2319_v40, 7  ;;  %v2444_v12 = vmul.f32 %v6672_v23, %v8597_v8  ;;  %v7411_v6 = vmul.f32 %v6672_v23, %v8598_v45  ;;  %v7424_v48 = vld [vmem:[%s8486_s5 + $0x9] ss:$0 sm:$0xff]  ;;  %v7447_v49 = vld [vmem:[%s8486_s5 + $0xc] ss:$0 sm:$0xff] }
 0x2dc   : > { %v1900_v26 = vrot.slane %v1845_v29, 5  ;;  %v2256_v57 = vsel %vm2119_vm6, %v2254_v22, %v2255_v44  ;;  %v2320_v37 = vmul.f32 %v7417_v31, %v8590_v59  ;;  %v1020_v23 = vmul.f32 %v7424_v48, %v8599_v10  ;;  %v7454_v16 = vld [vmem:[%s8486_s5 + $0xd] ss:$0 sm:$0xff]  ;;  %v7461_v40 = vld [vmem:[%s8486_s5 + $0xe] ss:$0 sm:$0xff] }
 0x2dd   : > { %v4354_v61 = vsel %vm4348_vm8, %v2531_v25, %v4840_v11  ;;  %v2138_v24 = vrot.slane %v2082_v38, 6  ;;  %v2294_v21 = vadd.f32 %v2256_v57, %v2182_v20  ;;  %v2375_v27 = vsel %vm2357_vm7, %v2373_v19, %v2374_v3  ;;  %v7442_v11 = vpop.permute.xlu1 %4852 }
 0x2de   : > { %v2492_v9 = vrot.slane %v2444_v12, 7  ;;  %v1069_v29 = vrot.slane %v1020_v23, 1  ;;  %v1258_v59 = vmul.f32 %v7250_v17, %v8599_v10  ;;  %v1496_v1 = vmul.f32 %v7437_v42, %v8599_v10 }
 0x2df   : > { %v2493_v33 = vrot.slane %v7411_v6, 7  ;;  %v1733_v38 = vmul.f32 %v7447_v49, %v8599_v10  ;;  %v1970_v22 = vmul.f32 %v7454_v16, %v8599_v10  ;;  %v2208_v20 = vmul.f32 %v7461_v40, %v8599_v10 }
 0x2e0   : > { %v2376_v19 = vrot.slane %v2320_v37, 7  ;;  %v2420_v25 = vadd.f32 %v2375_v27, %v2294_v21  ;;  %v1070_v12 = vsel %vm931_vm3, %v1067_v55, %v1069_v29  ;;  %v1307_v57 = vrot.slane %v1258_v59, 2 }
 0x2e1   : > { %v4371_v23 = vsel %vm4365_vm9, %v4354_v61, %v4835_v36  ;;  %v1901_v47 = vsel %vm741_vm2, %v1898_v50, %v1900_v26  ;;  %v1107_v28 = vadd.f32 %v1070_v12, %v7352_v46  ;;  %v1545_v41 = vrot.slane %v1496_v1, 3  ;;  %v8605_v12 = vld [vmem:[#allocation13_spill] sm:$0xff] }
 0x2e2   : > { %v4854_v63 = vunpack.i.l.bf16 %v7442_v11  ;;  %v1308_v62 = vsel %vm1169_vm4, %v1305_v51, %v1307_v57  ;;  %v1782_v37 = vrot.slane %v1733_v38, 4  ;;  %v2019_v55 = vrot.slane %v1970_v22, 5  ;;  %v7493_v51 = vld [vmem:[%s8486_s5 + $0xf] ss:$0 sm:$0xff] }
 0x2e3   : > { %v7480_v21 = vsel %vm2119_vm6, %v2136_v30, %v2138_v24  ;;  %v2494_v43 = vsel %vm2357_vm7, %v2492_v9, %v2493_v33  ;;  %v1233_v36 = vadd.f32 %v7359_v54, %v1107_v28  ;;  %v2257_v32 = vrot.slane %v2208_v20, 6  ;;  %v8604_v38 = vld [vmem:[#allocation11_spill] sm:$0xff] }
 0x2e4   : > { %v7487_v50 = vsel %vm2357_vm7, %v2374_v3, %v2376_v19  ;;  %v2532_v46 = vadd.f32 %v2494_v43, %v2420_v25  ;;  %v4855_v7 = vunpack.i.h.bf16 %v7442_v11  ;;  %v2446_v30 = vmul.f32 %v7493_v51, %v8599_v10 }
 0x2e5   : > { %v1345_v26 = vadd.f32 %v1308_v62, %v1233_v36  ;;  %v1546_v28 = vsel %vm1407_vm5, %v1543_v34, %v1545_v41  ;;  %v8600_v54 = vunpack.i.l.bf16 %v7206_v18  ;;  %v8601_v61 = vunpack.i.h.bf16 %v7206_v18  ;;  %v7514_v41 = vpop.permute.xlu0 %4847 }
 0x2e6   : > { %v8602_v27 = vrot.slane %v7323_v4, 4  ;;  %v8603_v29 = vrot.slane %v7350_v0, 5  ;;  %v4355_v13 = vsel %vm4348_vm8, %v2532_v46, %v4854_v63  ;;  %v819_v18 = vmul.f32 %v7266_v14, %v8597_v8  ;;  %v7522_v0 = vpop.permute.xlu1 %4857 }
 0x2e7   : > { %v4387_v3 = vsel %vm4382_vm10, %v7232_v15, %v8600_v54  ;;  %v4388_v24 = vsel %vm4382_vm10, %v4371_v23, %v8601_v61  ;;  %v1471_v1 = vadd.f32 %v7370_v35, %v1345_v26  ;;  %v2258_v15 = vsel %vm2119_vm6, %v2255_v44, %v2257_v32 }
 0x2e8   : > { %v1783_v9 = vsel %vm498_vm0, %v8602_v27, %v1782_v37  ;;  %v2020_v59 = vsel %vm741_vm2, %v8603_v29, %v2019_v55  ;;  %v4401_v34 = vpack.c.bf16 %v4388_v24, %v4387_v3  ;;  %v856_v4 = vmul.f32 %v7276_v39, %v8604_v38 }
 0x2e9   : > { %v2495_v22 = vrot.slane %v2446_v30, 7  ;;  %v895_v63 = vmul.f32 %v7240_v58, %v8597_v8  ;;  %v7528_v20 = vmul.f32 %v7240_v58, %v8598_v45  ;;  %v1021_v35 = vmul.f32 %v7424_v48, %v8604_v38 }
 0x2ea   : > { %4730 = vmatprep.subr.bf16.mxu1 %v4401_v34  ;;  %v1583_v44 = vadd.f32 %v1546_v28, %v1471_v1  ;;  %v4850_v19 = vunpack.i.h.bf16 %v7514_v41  ;;  %v870_v25 = vadd.f32 %v856_v4, %v819_v18  ;;  %v7535_v57 = vmul.f32 %v7424_v48, %v8605_v12 }
 0x2eb   : > { %4731 = vmatpush3.bf16.xpose.msra.mxu1 %v4401_v34  ;;  %v4849_v23 = vunpack.i.l.bf16 %v7514_v41  ;;  %v952_v62 = vrot.slane %v895_v63, 1  ;;  %v953_v37 = vrot.slane %v7528_v20, 1  ;;  %v1071_v55 = vrot.slane %v1021_v35, 1 }
 0x2ec   : > { %v1708_v43 = vadd.f32 %v7403_v2, %v1583_v44  ;;  %v1072_v32 = vrot.slane %v7535_v57, 1  ;;  %v1133_v46 = vmul.f32 %v7301_v60, %v8597_v8  ;;  %v7549_v26 = vmul.f32 %v7301_v60, %v8598_v45 }
 0x2ed   : > { %v954_v30 = vsel %vm931_vm3, %v952_v62, %v953_v37  ;;  %v1259_v28 = vmul.f32 %v7250_v17, %v8604_v38  ;;  %v7555_v2 = vmul.f32 %v7250_v17, %v8605_v12  ;;  %v7560_v3 = vsel %vm2357_vm7, %v2493_v33, %v2495_v22  ;;  %v8606_v62 = vld [vmem:[#allocation14_spill] sm:$0xff] }
 0x2ee   : > { %v1820_v54 = vadd.f32 %v1783_v9, %v1708_v43  ;;  %v996_v61 = vadd.f32 %v954_v30, %v870_v25  ;;  %v1073_v24 = vsel %vm931_vm3, %v1071_v55, %v1072_v32  ;;  %v7566_v27 = vsel %vm4365_vm9, %v4355_v13, %v4849_v23 }
 0x2ef   : > { %v1190_v29 = vrot.slane %v1133_v46, 2  ;;  %v8543_v34 = vrot.slane %v7549_v26, 2  ;;  %v1309_v1 = vrot.slane %v1259_v28, 2  ;;  %v1310_v9 = vrot.slane %v7555_v2, 2 }
 0x2f0   : > { %v1945_v18 = vadd.f32 %v1901_v47, %v1820_v54  ;;  %v1108_v4 = vadd.f32 %v1073_v24, %v996_v61  ;;  %v1371_v6 = vmul.f32 %v7308_v56, %v8597_v8  ;;  %v7578_v13 = vmul.f32 %v7308_v56, %v8598_v45 }
 0x2f1   : > { %v1192_v22 = vsel %vm1169_vm4, %v1190_v29, %v8543_v34  ;;  %v1497_v63 = vmul.f32 %v7437_v42, %v8604_v38  ;;  %v1311_v44 = vsel %vm1169_vm4, %v1309_v1, %v1310_v9  ;;  %v820_v23 = vmul.f32 %v7266_v14, %v8598_v45 }
 0x2f2   : > { %v2057_v47 = vadd.f32 %v2020_v59, %v1945_v18  ;;  %v1234_v35 = vadd.f32 %v1192_v22, %v1108_v4  ;;  %v1428_v25 = vrot.slane %v1371_v6, 3  ;;  %v1023_v55 = vmul.f32 %v7424_v48, %v8606_v62 }
 0x2f3   : > { %v8542_v43 = vrot.slane %v7578_v13, 3  ;;  %v7592_v46 = vmul.f32 %v7437_v42, %v8605_v12  ;;  %v1547_v28 = vrot.slane %v1497_v63, 3  ;;  %v1609_v54 = vmul.f32 %v7337_v5, %v8597_v8 }
 0x2f4   : > { %v2183_v59 = vadd.f32 %v7480_v21, %v2057_v47  ;;  %v1346_v30 = vadd.f32 %v1311_v44, %v1234_v35  ;;  %v857_v61 = vmul.f32 %v7276_v39, %v8605_v12  ;;  %v7605_v1 = vmul.f32 %v7337_v5, %v8598_v45 }
 0x2f5   : > { %v1430_v24 = vsel %vm1407_vm5, %v1428_v25, %v8542_v43  ;;  %v1548_v29 = vrot.slane %v7592_v46, 3  ;;  %v1665_v4 = vrot.slane %v1609_v54, 4  ;;  %v1734_v6 = vmul.f32 %v7447_v49, %v8604_v38 }
 0x2f6   : > { %v2295_v18 = vadd.f32 %v2258_v15, %v2183_v59  ;;  %v1472_v21 = vadd.f32 %v1430_v24, %v1346_v30  ;;  %v1074_v22 = vrot.slane %v1023_v55, 1  ;;  %v8541_v47 = vrot.slane %v7605_v1, 4 }
 0x2f7   : > { %v1549_v63 = vsel %vm1407_vm5, %v1547_v28, %v1548_v29  ;;  %v1735_v35 = vmul.f32 %v7447_v49, %v8605_v12  ;;  %v1261_v44 = vmul.f32 %v7250_v17, %v8606_v62  ;;  %v1499_v25 = vmul.f32 %v7437_v42, %v8606_v62 }
 0x2f8   : > { %v1584_v15 = vadd.f32 %v1549_v63, %v1472_v21  ;;  %v1784_v46 = vrot.slane %v1734_v6, 4  ;;  %v1667_v59 = vsel %vm498_vm0, %v1665_v4, %v8541_v47  ;;  %v1846_v30 = vmul.f32 %v7382_v53, %v8597_v8 }
 0x2f9   : > { %v1785_v55 = vrot.slane %v1735_v35, 4  ;;  %v7624_v28 = vmul.f32 %v7382_v53, %v8598_v45  ;;  %v2421_v54 = vadd.f32 %v7487_v50, %v2295_v18  ;;  %v1736_v36 = vmul.f32 %v7447_v49, %v8606_v62 }
 0x2fa   : > { %v1709_v24 = vadd.f32 %v1667_v59, %v1584_v15  ;;  %v1971_v21 = vmul.f32 %v7454_v16, %v8604_v38  ;;  %v1902_v4 = vrot.slane %v1846_v30, 5  ;;  %v1972_v35 = vmul.f32 %v7454_v16, %v8605_v12 }
 0x2fb   : > { %v1786_v6 = vsel %vm498_vm0, %v1784_v46, %v1785_v55  ;;  %v1903_v63 = vrot.slane %v7624_v28, 5  ;;  %v871_v33 = vadd.f32 %v857_v61, %v820_v23  ;;  %v7638_v50 = vsel %vm931_vm3, %v1072_v32, %v1074_v22 }
 0x2fc   : > { %v1312_v18 = vrot.slane %v1261_v44, 2  ;;  %v1821_v15 = vadd.f32 %v1786_v6, %v1709_v24  ;;  %v1550_v59 = vrot.slane %v1499_v25, 3  ;;  %v2021_v46 = vrot.slane %v1971_v21, 5 }
 0x2fd   : > { %v1904_v47 = vsel %vm741_vm2, %v1902_v4, %v1903_v63  ;;  %v2022_v30 = vrot.slane %v1972_v35, 5  ;;  %v2533_v43 = vadd.f32 %v7560_v3, %v2421_v54  ;;  %v2083_v23 = vmul.f32 %v7395_v52, %v8597_v8 }
 0x2fe   : > { %v1946_v34 = vadd.f32 %v1904_v47, %v1821_v15  ;;  %v7648_v57 = vmul.f32 %v7395_v52, %v8598_v45  ;;  %v1787_v32 = vrot.slane %v1736_v36, 4  ;;  %v2209_v22 = vmul.f32 %v7461_v40, %v8604_v38 }
 0x2ff   : > { %v2023_v61 = vsel %vm741_vm2, %v2021_v46, %v2022_v30  ;;  %v2210_v44 = vmul.f32 %v7461_v40, %v8605_v12  ;;  %v1973_v3 = vmul.f32 %v7454_v16, %v8606_v62  ;;  %v2140_v25 = vrot.slane %v2083_v23, 6 }
 0x300   : > { %v2058_v47 = vadd.f32 %v2023_v61, %v1946_v34  ;;  %v2141_v54 = vrot.slane %v7648_v57, 6  ;;  %v2211_v24 = vmul.f32 %v7461_v40, %v8606_v62  ;;  %v2259_v21 = vrot.slane %v2209_v22, 6 }
 0x301   : > { %v2260_v36 = vrot.slane %v2210_v44, 6  ;;  %v2321_v6 = vmul.f32 %v7417_v31, %v8597_v8  ;;  %v7667_v35 = vmul.f32 %v7417_v31, %v8598_v45  ;;  %v2447_v34 = vmul.f32 %v7493_v51, %v8604_v38 }
 0x302   : > { %v2142_v4 = vsel %vm2119_vm6, %v2140_v25, %v2141_v54  ;;  %v2448_v15 = vmul.f32 %v7493_v51, %v8605_v12  ;;  %v1313_v46 = vsel %vm1169_vm4, %v1310_v9, %v1312_v18  ;;  %v7677_v8 = vsel %vm1407_vm5, %v1548_v29, %v1550_v59 }
 0x303   : > { %v2184_v23 = vadd.f32 %v2142_v4, %v2058_v47  ;;  %v2378_v61 = vrot.slane %v2321_v6, 7  ;;  %v4356_v45 = vsel %vm4348_vm8, %v2533_v43, %v4855_v7  ;;  %v2261_v22 = vsel %vm2119_vm6, %v2259_v21, %v2260_v36  ;;  %v7700_v6 = vpop.permute.xlu0 %4867 }
 0x304   : > { %v8544_v44 = vrot.slane %v7667_v35, 7  ;;  %v2449_v25 = vmul.f32 %v7493_v51, %v8606_v62  ;;  %v7687_v2 = vsel %vm498_vm0, %v1785_v55, %v1787_v32  ;;  %v2024_v9 = vrot.slane %v1973_v3, 5 }
 0x305   : > { %v2296_v18 = vadd.f32 %v2261_v22, %v2184_v23  ;;  %v897_v29 = vmul.f32 %v7240_v58, %v8599_v10  ;;  %v2262_v59 = vrot.slane %v2211_v24, 6  ;;  %v2497_v47 = vrot.slane %v2447_v34, 7 }
 0x306   : > { %v2498_v11 = vrot.slane %v2448_v15, 7  ;;  %v1135_v7 = vmul.f32 %v7301_v60, %v8599_v10  ;;  %v2380_v43 = vsel %vm2357_vm7, %v2378_v61, %v8544_v44  ;;  %v1373_v55 = vmul.f32 %v7308_v56, %v8599_v10 }
 0x307   : > { %v955_v21 = vrot.slane %v897_v29, 1  ;;  %v1611_v32 = vmul.f32 %v7337_v5, %v8599_v10  ;;  %v2500_v3 = vrot.slane %v2449_v25, 7  ;;  %v1848_v4 = vmul.f32 %v7382_v53, %v8599_v10 }
 0x308   : > { %v1193_v24 = vrot.slane %v1135_v7, 2  ;;  %v2085_v34 = vmul.f32 %v7395_v52, %v8599_v10  ;;  %v2422_v15 = vadd.f32 %v2380_v43, %v2296_v18  ;;  %v1431_v61 = vrot.slane %v1373_v55, 3  ;;  %v4926_v18 = vld [vmem:[%s8489_s8] sm:$0xff]  }
 0x309   : > { %v956_v23 = vsel %vm931_vm3, %v953_v37, %v955_v21  ;;  %v1668_v22 = vrot.slane %v1611_v32, 4  ;;  %v4373_v25 = vsel %vm4365_vm9, %v4356_v45, %v4850_v19  ;;  %v7713_v29 = vsel %vm741_vm2, %v2022_v30, %v2024_v9  ;;  %4742 = vmatprep.mubr.bf16.mxu1 %v4926_v18  ;;  %v7739_v32 = vpop.permute.xlu1 %4862 }
 0x30a   : > { %v7716_v7 = vsel %vm2119_vm6, %v2260_v36, %v2262_v59  ;;  %v997_v44 = vadd.f32 %v956_v23, %v871_v33  ;;  %v4869_v20 = vunpack.i.l.bf16 %v7700_v6  ;;  %v8607_v37 = vrot.slane %v7549_v26, 2  ;;  %v8612_v23 = vld [vmem:[#allocation18_spill] sm:$0xff] }
 0x30b   : > { %v1905_v41 = vrot.slane %v1848_v4, 5  ;;  %v2143_v21 = vrot.slane %v2085_v34, 6  ;;  %v2499_v19 = vsel %vm2357_vm7, %v2497_v47, %v2498_v11  ;;  %v7727_v30 = vsel %vm2357_vm7, %v2498_v11, %v2500_v3 }
 0x30c   : > { %v1194_v43 = vsel %vm1169_vm4, %v8607_v37, %v1193_v24  ;;  %v4870_v36 = vunpack.i.h.bf16 %v7700_v6  ;;  %v1109_v33 = vadd.f32 %v7638_v50, %v997_v44  ;;  %v2534_v45 = vadd.f32 %v2499_v19, %v2422_v15 }
 0x30d   : > { %v8608_v9 = vrot.slane %v7578_v13, 3  ;;  %v8609_v26 = vrot.slane %v7605_v1, 4  ;;  %v2323_v47 = vmul.f32 %v7417_v31, %v8599_v10  ;;  %v8610_v3 = vunpack.i.l.bf16 %v7522_v0 }
 0x30e   : > { %v1235_v11 = vadd.f32 %v1194_v43, %v1109_v33  ;;  %v8611_v44 = vunpack.i.h.bf16 %v7522_v0  ;;  %v821_v1 = vmul.f32 %v7266_v14, %v8604_v38  ;;  %v1906_v24 = vsel %vm741_vm2, %v1903_v63, %v1905_v41  ;;  %v7758_v0 = vpop.permute.xlu0 %4872 }
 0x30f   : > { %v1432_v59 = vsel %vm1407_vm5, %v8608_v9, %v1431_v61  ;;  %v1669_v55 = vsel %vm498_vm0, %v8609_v26, %v1668_v22  ;;  %v4389_v50 = vsel %vm4382_vm10, %v7566_v27, %v8610_v3  ;;  %v2144_v10 = vsel %vm2119_vm6, %v2141_v54, %v2143_v21  ;;  %v8613_v54 = vld [vmem:[#allocation21_spill] sm:$0xff] }
 0x310   : > { %v4390_v13 = vsel %vm4382_vm10, %v4373_v25, %v8611_v44  ;;  %v4357_v4 = vsel %vm4348_vm8, %v2534_v45, %v4869_v20  ;;  %v1347_v15 = vadd.f32 %v1313_v46, %v1235_v11  ;;  %v4865_v27 = vunpack.i.h.bf16 %v7739_v32 }
 0x311   : > { %v4402_v34 = vpack.c.bf16 %v4390_v13, %v4389_v50  ;;  %v858_v61 = vmul.f32 %v7276_v39, %v8612_v23  ;;  %v898_v28 = vmul.f32 %v7240_v58, %v8604_v38  ;;  %v2381_v22 = vrot.slane %v2323_v47, 7 }
 0x312   : > { %v899_v63 = vmul.f32 %v7240_v58, %v8605_v12  ;;  %v1024_v57 = vmul.f32 %v7424_v48, %v8612_v23  ;;  %v7770_v46 = vmul.f32 %v7424_v48, %v8613_v54  ;;  %v1473_v25 = vadd.f32 %v1432_v59, %v1347_v15 }
 0x313   : > { %4732 = vmatprep.subr.bf16.mxu1 %v4402_v34  ;;  %v4864_v18 = vunpack.i.l.bf16 %v7739_v32  ;;  %v872_v20 = vadd.f32 %v858_v61, %v821_v1  ;;  %v957_v37 = vrot.slane %v898_v28, 1  ;;  %v1136_v9 = vmul.f32 %v7301_v60, %v8604_v38 }
 0x314   : > { %4733 = vmatpush3.bf16.xpose.msra.mxu1 %v4402_v34  ;;  %v958_v41 = vrot.slane %v899_v63, 1  ;;  %v1076_v21 = vrot.slane %v1024_v57, 1  ;;  %v1077_v19 = vrot.slane %v7770_v46, 1  ;;  %v1585_v33 = vadd.f32 %v7677_v8, %v1473_v25 }
 0x315   : > { %v7781_v59 = vmul.f32 %v7301_v60, %v8605_v12  ;;  %v8614_v26 = vrot.slane %v7667_v35, 7  ;;  %v1262_v3 = vmul.f32 %v7250_v17, %v8612_v23  ;;  %v7795_v44 = vsel %vm4365_vm9, %v4357_v4, %v4864_v18 }
 0x316   : > { %v959_v11 = vsel %vm931_vm3, %v957_v37, %v958_v41  ;;  %v1078_v8 = vsel %vm931_vm3, %v1076_v21, %v1077_v19  ;;  %v1710_v50 = vadd.f32 %v1669_v55, %v1585_v33  ;;  %v1195_v1 = vrot.slane %v1136_v9, 2 }
 0x317   : > { %v7786_v47 = vsel %vm2357_vm7, %v8614_v26, %v2381_v22  ;;  %v998_v13 = vadd.f32 %v959_v11, %v872_v20  ;;  %v900_v35 = vmul.f32 %v7240_v58, %v8606_v62  ;;  %v1196_v34 = vrot.slane %v7781_v59, 2 }
 0x318   : > { %v7802_v15 = vmul.f32 %v7250_v17, %v8613_v54  ;;  %v1314_v61 = vrot.slane %v1262_v3, 2  ;;  %v1822_v28 = vadd.f32 %v7687_v2, %v1710_v50  ;;  %v1374_v55 = vmul.f32 %v7308_v56, %v8604_v38 }
 0x319   : > { %v1110_v22 = vadd.f32 %v1078_v8, %v998_v13  ;;  %v7809_v4 = vmul.f32 %v7308_v56, %v8605_v12  ;;  %v822_v63 = vmul.f32 %v7266_v14, %v8605_v12  ;;  %v859_v57 = vmul.f32 %v7276_v39, %v8613_v54 }
 0x31a   : > { %v1197_v25 = vsel %vm1169_vm4, %v1195_v1, %v1196_v34  ;;  %v1315_v18 = vrot.slane %v7802_v15, 2  ;;  %v1947_v20 = vadd.f32 %v1906_v24, %v1822_v28  ;;  %v1433_v37 = vrot.slane %v1374_v55, 3 }
 0x31b   : > { %v1236_v2 = vadd.f32 %v1197_v25, %v1110_v22  ;;  %v1434_v21 = vrot.slane %v7809_v4, 3  ;;  %v960_v33 = vrot.slane %v900_v35, 1  ;;  %v1500_v59 = vmul.f32 %v7437_v42, %v8612_v23 }
 0x31c   : > { %v1316_v9 = vsel %vm1169_vm4, %v1314_v61, %v1315_v18  ;;  %v7825_v26 = vmul.f32 %v7437_v42, %v8613_v54  ;;  %v2059_v11 = vadd.f32 %v7713_v29, %v1947_v20  ;;  %v1138_v24 = vmul.f32 %v7301_v60, %v8606_v62 }
 0x31d   : > { %v1348_v8 = vadd.f32 %v1316_v9, %v1236_v2  ;;  %v1612_v3 = vmul.f32 %v7337_v5, %v8604_v38  ;;  %v1435_v50 = vsel %vm1407_vm5, %v1433_v37, %v1434_v21  ;;  %v1552_v13 = vrot.slane %v1500_v59, 3 }
 0x31e   : > { %v1553_v1 = vrot.slane %v7825_v26, 3  ;;  %v1613_v35 = vmul.f32 %v7337_v5, %v8605_v12  ;;  %v2185_v61 = vadd.f32 %v2144_v10, %v2059_v11  ;;  %v873_v28 = vadd.f32 %v859_v57, %v822_v63 }
 0x31f   : > { %v1474_v29 = vadd.f32 %v1435_v50, %v1348_v8  ;;  %v1670_v22 = vrot.slane %v1612_v3, 4  ;;  %v1737_v20 = vmul.f32 %v7447_v49, %v8612_v23  ;;  %v7845_v2 = vmul.f32 %v7447_v49, %v8613_v54 }
 0x320   : > { %v1554_v55 = vsel %vm1407_vm5, %v1552_v13, %v1553_v1  ;;  %v1671_v25 = vrot.slane %v1613_v35, 4  ;;  %v961_v37 = vsel %vm931_vm3, %v958_v41, %v960_v33  ;;  %v1198_v9 = vrot.slane %v1138_v24, 2 }
 0x321   : > { %v1586_v59 = vadd.f32 %v1554_v55, %v1474_v29  ;;  %v1849_v10 = vmul.f32 %v7382_v53, %v8604_v38  ;;  %v1789_v57 = vrot.slane %v1737_v20, 4  ;;  %v8546_v11 = vrot.slane %v7845_v2, 4 }
 0x322   : > { %v1672_v63 = vsel %vm498_vm0, %v1670_v22, %v1671_v25  ;;  %v7854_v8 = vmul.f32 %v7382_v53, %v8605_v12  ;;  %v2297_v3 = vadd.f32 %v7716_v7, %v2185_v61  ;;  %v1376_v50 = vmul.f32 %v7308_v56, %v8606_v62 }
 0x323   : > { %v1614_v41 = vmul.f32 %v7337_v5, %v8606_v62  ;;  %v1711_v33 = vadd.f32 %v1672_v63, %v1586_v59  ;;  %v1791_v24 = vsel %vm498_vm0, %v1789_v57, %v8546_v11  ;;  %v1907_v13 = vrot.slane %v1849_v10, 5 }
 0x324   : > { %v1908_v35 = vrot.slane %v7854_v8, 5  ;;  %v1974_v29 = vmul.f32 %v7454_v16, %v8612_v23  ;;  %v7867_v22 = vadd.f32 %v961_v37, %v873_v28  ;;  %v7870_v7 = vsel %vm1169_vm4, %v1196_v34, %v1198_v9 }
 0x325   : > { %v1823_v61 = vadd.f32 %v1791_v24, %v1711_v33  ;;  %v7874_v55 = vmul.f32 %v7454_v16, %v8613_v54  ;;  %v2086_v10 = vmul.f32 %v7395_v52, %v8604_v38  ;;  %v2087_v63 = vmul.f32 %v7395_v52, %v8605_v12 }
 0x326   : > { %v1909_v20 = vsel %vm741_vm2, %v1907_v13, %v1908_v35  ;;  %v2026_v59 = vrot.slane %v1974_v29, 5  ;;  %v1436_v57 = vrot.slane %v1376_v50, 3  ;;  %v1673_v28 = vrot.slane %v1614_v41, 4 }
 0x327   : > { %v1948_v37 = vadd.f32 %v1909_v20, %v1823_v61  ;;  %v8545_v34 = vrot.slane %v7874_v55, 5  ;;  %v2423_v9 = vadd.f32 %v7786_v47, %v2297_v3  ;;  %v1851_v8 = vmul.f32 %v7382_v53, %v8606_v62 }
 0x328   : > { %v2145_v33 = vrot.slane %v2086_v10, 6  ;;  %v2146_v24 = vrot.slane %v2087_v63, 6  ;;  %v2212_v29 = vmul.f32 %v7461_v40, %v8612_v23  ;;  %v2213_v50 = vmul.f32 %v7461_v40, %v8613_v54 }
 0x329   : > { %v2028_v13 = vsel %vm741_vm2, %v2026_v59, %v8545_v34  ;;  %v2324_v41 = vmul.f32 %v7417_v31, %v8604_v38  ;;  %v2088_v47 = vmul.f32 %v7395_v52, %v8606_v62  ;;  %v2325_v20 = vmul.f32 %v7417_v31, %v8605_v12 }
 0x32a   : > { %v2060_v61 = vadd.f32 %v2028_v13, %v1948_v37  ;;  %v2147_v3 = vsel %vm2119_vm6, %v2145_v33, %v2146_v24  ;;  %v2264_v10 = vrot.slane %v2212_v29, 6  ;;  %v2265_v59 = vrot.slane %v2213_v50, 6 }
 0x32b   : > { %v2326_v63 = vmul.f32 %v7417_v31, %v8606_v62  ;;  %v2383_v43 = vrot.slane %v2324_v41, 7  ;;  %v2535_v45 = vadd.f32 %v7727_v30, %v2423_v9  ;;  %v2384_v11 = vrot.slane %v2325_v20, 7 }
 0x32c   : > { %v2186_v34 = vadd.f32 %v2147_v3, %v2060_v61  ;;  %v2450_v38 = vmul.f32 %v7493_v51, %v8612_v23  ;;  %v1437_v37 = vsel %vm1407_vm5, %v1434_v21, %v1436_v57  ;;  %v7908_v33 = vsel %vm498_vm0, %v1671_v25, %v1673_v28  ;;  %v8615_v21 = vld [vmem:[#allocation22_spill] sm:$0xff] }
 0x32d   : > { %v2266_v12 = vsel %vm2119_vm6, %v2264_v10, %v2265_v59  ;;  %v7913_v62 = vmul.f32 %v7493_v51, %v8613_v54  ;;  %v4358_v30 = vsel %vm4348_vm8, %v2535_v45, %v4870_v36  ;;  %v1910_v9 = vrot.slane %v1851_v8, 5 }
 0x32e   : > { %v2148_v13 = vrot.slane %v2088_v47, 6  ;;  %v2298_v29 = vadd.f32 %v2266_v12, %v2186_v34  ;;  %v2385_v4 = vsel %vm2357_vm7, %v2383_v43, %v2384_v11  ;;  %v2386_v50 = vrot.slane %v2326_v63, 7  ;;  %v7930_v43 = vpop.permute.xlu1 %4882 }
 0x32f   : > { %v1026_v25 = vmul.f32 %v7424_v48, %v8615_v21  ;;  %v1264_v57 = vmul.f32 %v7250_v17, %v8615_v21  ;;  %v2502_v28 = vrot.slane %v2450_v38, 7  ;;  %v1502_v41 = vmul.f32 %v7437_v42, %v8615_v21 }
 0x330   : > { %v1739_v6 = vmul.f32 %v7447_v49, %v8615_v21  ;;  %v1976_v36 = vmul.f32 %v7454_v16, %v8615_v21  ;;  %v2503_v45 = vrot.slane %v7913_v62, 7  ;;  %v2214_v61 = vmul.f32 %v7461_v40, %v8615_v21 }
 0x331   : > { %v1079_v34 = vrot.slane %v1026_v25, 1  ;;  %v1317_v8 = vrot.slane %v1264_v57, 2  ;;  %v7935_v47 = vsel %vm741_vm2, %v1908_v35, %v1910_v9  ;;  %v2424_v3 = vadd.f32 %v2385_v4, %v2298_v29  ;;  %v7967_v4 = vpop.permute.xlu0 %4877 }
 0x332   : > { %v1555_v20 = vrot.slane %v1502_v41, 3  ;;  %v1792_v10 = vrot.slane %v1739_v6, 4  ;;  %v7940_v63 = vsel %vm4365_vm9, %v4358_v30, %v4865_v27  ;;  %v2029_v12 = vrot.slane %v1976_v36, 5  ;;  %v7985_v6 = vpop.permute.xlu1 %4887 }
 0x333   : > { %v1080_v38 = vsel %vm931_vm3, %v1077_v19, %v1079_v34  ;;  %v2267_v62 = vrot.slane %v2214_v61, 6  ;;  %v7946_v25 = vsel %vm2119_vm6, %v2146_v24, %v2148_v13  ;;  %v4884_v35 = vunpack.i.l.bf16 %v7930_v43  ;;  %v8619_v34 = vld [vmem:[#allocation19_spill] sm:$0xff] }
 0x334   : > { %v1111_v9 = vadd.f32 %v1080_v38, %v7867_v22  ;;  %v2452_v29 = vmul.f32 %v7493_v51, %v8615_v21  ;;  %v7953_v32 = vsel %vm2357_vm7, %v2384_v11, %v2386_v50  ;;  %v2504_v27 = vsel %vm2357_vm7, %v2502_v28, %v2503_v45 }
 0x335   : > { %v4885_v46 = vunpack.i.h.bf16 %v7930_v43  ;;  %v1318_v19 = vsel %vm1169_vm4, %v1315_v18, %v1317_v8  ;;  %v2536_v24 = vadd.f32 %v2504_v27, %v2424_v3  ;;  %v1556_v22 = vsel %vm1407_vm5, %v1553_v1, %v1555_v20 }
 0x336   : > { %v1237_v30 = vadd.f32 %v7870_v7, %v1111_v9  ;;  %v8616_v13 = vrot.slane %v7845_v2, 4  ;;  %v8617_v50 = vrot.slane %v7874_v55, 5  ;;  %v7973_v15 = vsel %vm2119_vm6, %v2265_v59, %v2267_v62  ;;  %v8618_v7 = vld [vmem:[#allocation17_spill] sm:$0xff] }
 0x337   : > { %v823_v18 = vmul.f32 %v7266_v14, %v8612_v23  ;;  %v7979_v26 = vmul.f32 %v7276_v39, %v8618_v7  ;;  %v2505_v2 = vrot.slane %v2452_v29, 7  ;;  %v4359_v28 = vsel %vm4348_vm8, %v2536_v24, %v4884_v35 }
 0x338   : > { %v1793_v11 = vsel %vm498_vm0, %v8616_v13, %v1792_v10  ;;  %v2030_v57 = vsel %vm741_vm2, %v8617_v50, %v2029_v12  ;;  %v1349_v1 = vadd.f32 %v1318_v19, %v1237_v30  ;;  %v901_v41 = vmul.f32 %v7240_v58, %v8612_v23 }
 0x339   : > { %v4880_v55 = vunpack.i.h.bf16 %v7967_v4  ;;  %v7989_v59 = vmul.f32 %v7240_v58, %v8613_v54  ;;  %v1027_v36 = vmul.f32 %v7424_v48, %v8618_v7  ;;  %v7995_v8 = vmul.f32 %v7424_v48, %v8619_v34 }
 0x33a   : > { %v1475_v61 = vadd.f32 %v1437_v37, %v1349_v1  ;;  %v4879_v3 = vunpack.i.l.bf16 %v7967_v4  ;;  %v874_v20 = vadd.f32 %v7979_v26, %v823_v18  ;;  %v962_v10 = vrot.slane %v901_v41, 1 }
 0x33b   : > { %v963_v38 = vrot.slane %v7989_v59, 1  ;;  %v1081_v12 = vrot.slane %v1027_v36, 1  ;;  %v1082_v62 = vrot.slane %v7995_v8, 1  ;;  %v1139_v58 = vmul.f32 %v7301_v60, %v8612_v23 }
 0x33c   : > { %v1587_v35 = vadd.f32 %v1556_v22, %v1475_v61  ;;  %v8006_v29 = vmul.f32 %v7301_v60, %v8613_v54  ;;  %v1265_v37 = vmul.f32 %v7250_v17, %v8618_v7  ;;  %v8020_v30 = vmul.f32 %v7250_v17, %v8619_v34 }
 0x33d   : > { %v964_v27 = vsel %vm931_vm3, %v962_v10, %v963_v38  ;;  %v8016_v19 = vsel %vm931_vm3, %v1081_v12, %v1082_v62  ;;  %v1200_v24 = vrot.slane %v1139_v58, 2  ;;  %v8026_v18 = vsel %vm2357_vm7, %v2503_v45, %v2505_v2 }
 0x33e   : > { %v1712_v60 = vadd.f32 %v7908_v33, %v1587_v35  ;;  %v1000_v13 = vadd.f32 %v964_v27, %v874_v20  ;;  %v1201_v50 = vrot.slane %v8006_v29, 2  ;;  %v1319_v1 = vrot.slane %v1265_v37, 2  ;;  %v8620_v37 = vld [vmem:[#allocation20_spill] sm:$0xff] }
 0x33f   : > { %v1320_v41 = vrot.slane %v8020_v30, 2  ;;  %v1377_v36 = vmul.f32 %v7308_v56, %v8612_v23  ;;  %v8037_v20 = vmul.f32 %v7308_v56, %v8613_v54  ;;  %v824_v45 = vmul.f32 %v7266_v14, %v8613_v54 }
 0x340   : > { %v1824_v61 = vadd.f32 %v1793_v11, %v1712_v60  ;;  %v1112_v17 = vadd.f32 %v8016_v19, %v1000_v13  ;;  %v1202_v33 = vsel %vm1169_vm4, %v1200_v24, %v1201_v50  ;;  %v1503_v11 = vmul.f32 %v7437_v42, %v8618_v7 }
 0x341   : > { %v8044_v2 = vsel %vm1169_vm4, %v1319_v1, %v1320_v41  ;;  %v1438_v10 = vrot.slane %v1377_v36, 3  ;;  %v1439_v35 = vrot.slane %v8037_v20, 3  ;;  %v8052_v56 = vmul.f32 %v7437_v42, %v8619_v34 }
 0x342   : > { %v1949_v12 = vadd.f32 %v7935_v47, %v1824_v61  ;;  %v1238_v58 = vadd.f32 %v1202_v33, %v1112_v17  ;;  %v8056_v14 = vmul.f32 %v7276_v39, %v8619_v34  ;;  %v8060_v27 = vmul.f32 %v7424_v48, %v8620_v37 }
 0x343   : > { %v1557_v24 = vrot.slane %v1503_v11, 3  ;;  %v1615_v60 = vmul.f32 %v7337_v5, %v8612_v23  ;;  %v1440_v1 = vsel %vm1407_vm5, %v1438_v10, %v1439_v35  ;;  %v1558_v36 = vrot.slane %v8052_v56, 3 }
 0x344   : > { %v2061_v47 = vadd.f32 %v2030_v57, %v1949_v12  ;;  %v1350_v13 = vadd.f32 %v8044_v2, %v1238_v58  ;;  %v8070_v39 = vsel %vm4365_vm9, %v4359_v28, %v4879_v3  ;;  %v8074_v48 = vmul.f32 %v7337_v5, %v8613_v54 }
 0x345   : > { %v1675_v61 = vrot.slane %v1615_v60, 4  ;;  %v1740_v17 = vmul.f32 %v7447_v49, %v8618_v7  ;;  %v8080_v11 = vsel %vm1407_vm5, %v1557_v24, %v1558_v36  ;;  %v1741_v10 = vmul.f32 %v7447_v49, %v8619_v34  ;;  %v4956_v60 = vld [vmem:[%s8486_s5 + $0xa] ss:$0 sm:$0xff] }
 0x346   : > { %v2187_v57 = vadd.f32 %v7946_v25, %v2061_v47  ;;  %v1476_v33 = vadd.f32 %v1440_v1, %v1350_v13  ;;  %v8085_v28 = vadd.f32 %v8056_v14, %v824_v45  ;;  %v1084_v3 = vrot.slane %v8060_v27, 1 }
 0x347   : > { %v8547_v5 = vrot.slane %v8074_v48, 4  ;;  %v1794_v12 = vrot.slane %v1740_v17, 4  ;;  %v1795_v25 = vrot.slane %v1741_v10, 4  ;;  %v1852_v24 = vmul.f32 %v7382_v53, %v8612_v23 }
 0x348   : > { %v2299_v58 = vadd.f32 %v7973_v15, %v2187_v57  ;;  %v1588_v56 = vadd.f32 %v8080_v11, %v1476_v33  ;;  %v1267_v45 = vmul.f32 %v4956_v60, %v8620_v37  ;;  %v8102_v47 = vmul.f32 %v7382_v53, %v8613_v54 }
 0x349   : > { %v1677_v27 = vsel %vm498_vm0, %v1675_v61, %v8547_v5  ;;  %v1977_v15 = vmul.f32 %v7454_v16, %v8618_v7  ;;  %v1505_v13 = vmul.f32 %v7437_v42, %v8620_v37  ;;  %v8109_v17 = vsel %vm498_vm0, %v1794_v12, %v1795_v25 }
 0x34a   : > { %v1713_v1 = vadd.f32 %v1677_v27, %v1588_v56  ;;  %v1912_v57 = vrot.slane %v1852_v24, 5  ;;  %v2425_v33 = vadd.f32 %v7953_v32, %v2299_v58  ;;  %v1742_v61 = vmul.f32 %v7447_v49, %v8620_v37 }
 0x34b   : > { %v8550_v10 = vrot.slane %v8102_v47, 5  ;;  %v1978_v53 = vmul.f32 %v7454_v16, %v8619_v34  ;;  %v1979_v42 = vmul.f32 %v7454_v16, %v8620_v37  ;;  %v2031_v56 = vrot.slane %v1977_v15, 5 }
 0x34c   : > { %v1825_v60 = vadd.f32 %v8109_v17, %v1713_v1  ;;  %v2089_v12 = vmul.f32 %v7395_v52, %v8612_v23  ;;  %v1322_v24 = vrot.slane %v1267_v45, 2  ;;  %v8127_v58 = vmul.f32 %v7395_v52, %v8613_v54 }
 0x34d   : > { %v1914_v32 = vsel %vm741_vm2, %v1912_v57, %v8550_v10  ;;  %v2032_v49 = vrot.slane %v1978_v53, 5  ;;  %v1560_v27 = vrot.slane %v1505_v13, 3  ;;  %v2215_v16 = vmul.f32 %v7461_v40, %v8618_v7 }
 0x34e   : > { %v1950_v9 = vadd.f32 %v1914_v32, %v1825_v60  ;;  %v2150_v1 = vrot.slane %v2089_v12, 6  ;;  %v2537_v15 = vadd.f32 %v8026_v18, %v2425_v33  ;;  %v1797_v22 = vrot.slane %v1742_v61, 4 }
 0x34f   : > { %v8133_v45 = vsel %vm741_vm2, %v2031_v56, %v2032_v49  ;;  %v8548_v5 = vrot.slane %v8127_v58, 6  ;;  %v2034_v57 = vrot.slane %v1979_v42, 5  ;;  %v2216_v52 = vmul.f32 %v7461_v40, %v8619_v34 }
 0x350   : > { %v2062_v53 = vadd.f32 %v8133_v45, %v1950_v9  ;;  %v2269_v13 = vrot.slane %v2215_v16, 6  ;;  %v2217_v18 = vmul.f32 %v7461_v40, %v8620_v37  ;;  %v2327_v33 = vmul.f32 %v7417_v31, %v8612_v23  ;;  %v8213_v16 = vld [vmem:[%s8486_s5 + $0x4] ss:$0 sm:$0xff] }
 0x351   : > { %v2152_v60 = vsel %vm2119_vm6, %v2150_v1, %v8548_v5  ;;  %v8148_v61 = vmul.f32 %v7417_v31, %v8613_v54  ;;  %v4360_v9 = vsel %vm4348_vm8, %v2537_v15, %v4885_v46  ;;  %v8156_v42 = vsel %vm931_vm3, %v1082_v62, %v1084_v3 }
 0x352   : > { %v2188_v56 = vadd.f32 %v2152_v60, %v2062_v53  ;;  %v2270_v12 = vrot.slane %v2216_v52, 6  ;;  %v8161_v40 = vsel %vm1169_vm4, %v1320_v41, %v1322_v24  ;;  %v8164_v23 = vsel %vm1407_vm5, %v1558_v36, %v1560_v27  ;;  %v4957_v24 = vld [vmem:[%s8486_s5 + $0x1] ss:$0 sm:$0xff] }
 0x353   : > { %v2453_v31 = vmul.f32 %v7493_v51, %v8618_v7  ;;  %v8170_v54 = vmul.f32 %v7493_v51, %v8619_v34  ;;  %v8173_v43 = vsel %vm498_vm0, %v1795_v25, %v1797_v22  ;;  %v2388_v8 = vrot.slane %v2327_v33, 7  ;;  %v8192_v25 = vpop.permute.xlu0 %4897 }
 0x354   : > { %v8176_v46 = vsel %vm2119_vm6, %v2269_v13, %v2270_v12  ;;  %v8549_v62 = vrot.slane %v8148_v61, 7  ;;  %v8182_v30 = vsel %vm4365_vm9, %v4360_v9, %v4880_v55  ;;  %v8185_v41 = vsel %vm741_vm2, %v2032_v49, %v2034_v57  ;;  %v4958_v55 = vld [vmem:[%s8486_s5 + $0x2] ss:$0 sm:$0xff]  ;;  %v8205_v49 = vld [vmem:[%s8486_s5 + $0x3] ss:$0 sm:$0xff] }
 0x355   : > { %v2272_v36 = vrot.slane %v2217_v18, 6  ;;  %v2300_v3 = vadd.f32 %v8176_v46, %v2188_v56  ;;  %v8190_v22 = vmul.f32 %v7493_v51, %v8620_v37  ;;  %v903_v4 = vmul.f32 %v4957_v24, %v8615_v21  ;;  %v8220_v57 = vld [vmem:[%s8486_s5 + $0x5] ss:$0 sm:$0xff]  ;;  %v8230_v18 = vld [vmem:[%s8486_s5 + $0x6] ss:$0 sm:$0xff] }
 0x356   : > { %v1141_v32 = vmul.f32 %v4958_v55, %v8615_v21  ;;  %v1379_v51 = vmul.f32 %v8205_v49, %v8615_v21  ;;  %v2507_v27 = vrot.slane %v2453_v31, 7  ;;  %v2508_v1 = vrot.slane %v8170_v54, 7 }
 0x357   : > { %v1617_v15 = vmul.f32 %v8213_v16, %v8615_v21  ;;  %v1854_v53 = vmul.f32 %v8220_v57, %v8615_v21  ;;  %v2390_v52 = vsel %vm2357_vm7, %v2388_v8, %v8549_v62  ;;  %v965_v13 = vrot.slane %v903_v4, 1  ;;  %v8244_v62 = vld [vmem:[%s8486_s5 + $0x7] ss:$0 sm:$0xff] }
 0x358   : > { %v1203_v60 = vrot.slane %v1141_v32, 2  ;;  %v2091_v33 = vmul.f32 %v8230_v18, %v8615_v21  ;;  %v8235_v9 = vsel %vm2119_vm6, %v2270_v12, %v2272_v36  ;;  %v2426_v56 = vadd.f32 %v2390_v52, %v2300_v3 }
 0x359   : > { %v4900_v31 = vunpack.i.h.bf16 %v8192_v25  ;;  %v1441_v5 = vrot.slane %v1379_v51, 3  ;;  %v966_v8 = vsel %vm931_vm3, %v963_v38, %v965_v13  ;;  %v1678_v4 = vrot.slane %v1617_v15, 4 }
 0x35a   : > { %v1915_v32 = vrot.slane %v1854_v53, 5  ;;  %v8248_v10 = vmul.f32 %v8244_v62, %v8615_v21  ;;  %v8253_v12 = vsel %vm2357_vm7, %v2507_v27, %v2508_v1  ;;  %v2510_v59 = vrot.slane %v8190_v22, 7 }
 0x35b   : > { %v4899_v38 = vunpack.i.l.bf16 %v8192_v25  ;;  %v1001_v36 = vadd.f32 %v966_v8, %v8085_v28  ;;  %v1204_v3 = vsel %vm1169_vm4, %v1201_v50, %v1203_v60  ;;  %v2153_v51 = vrot.slane %v2091_v33, 6  ;;  %v4964_v33 = vld [vmem:[%s8486_s5] ss:$0 sm:$0xff] }
 0x35c   : > { %v8621_v15 = vunpack.i.l.bf16 %v7758_v0  ;;  %v8622_v53 = vunpack.i.h.bf16 %v7758_v0  ;;  %v8270_v52 = vadd.f32 %v8253_v12, %v2426_v56  ;;  %v1442_v29 = vsel %vm1407_vm5, %v1439_v35, %v1441_v5 }
 0x35d   : > { %v1113_v28 = vadd.f32 %v8156_v42, %v1001_v36  ;;  %v8623_v13 = vrot.slane %v8074_v48, 4  ;;  %v825_v56 = vmul.f32 %v4964_v33, %v8618_v7  ;;  %v826_v35 = vmul.f32 %v4964_v33, %v8619_v34 }
 0x35e   : > { %v4391_v21 = vsel %vm4382_vm10, %v7795_v44, %v8621_v15  ;;  %v4392_v27 = vsel %vm4382_vm10, %v7940_v63, %v8622_v53  ;;  %v8624_v44 = vrot.slane %v8102_v47, 5  ;;  %v2391_v63 = vrot.slane %v8248_v10, 7 }
 0x35f   : > { %v4403_v50 = vpack.c.bf16 %v4392_v27, %v4391_v21  ;;  %v1679_v60 = vsel %vm498_vm0, %v8623_v13, %v1678_v4  ;;  %v1239_v20 = vadd.f32 %v1204_v3, %v1113_v28  ;;  %v904_v48 = vmul.f32 %v4957_v24, %v8618_v7 }
 0x360   : > { %v1916_v0 = vsel %vm741_vm2, %v8624_v44, %v1915_v32  ;;  %v905_v5 = vmul.f32 %v4957_v24, %v8619_v34  ;;  %v8625_v47 = vrot.slane %v8127_v58, 6  ;;  %v876_v4 = vadd.f32 %v7979_v26, %v825_v56 }
 0x361   : > { %4734 = vmatprep.subr.bf16.mxu1 %v4403_v50  ;;  %v906_v32 = vmul.f32 %v4957_v24, %v8620_v37  ;;  %v1142_v36 = vmul.f32 %v4958_v55, %v8618_v7  ;;  %v1351_v3 = vadd.f32 %v8161_v40, %v1239_v20  ;;  %v877_v15 = vadd.f32 %v8056_v14, %v826_v35 }
 0x362   : > { %v8293_v8 = vsel %vm2119_vm6, %v8625_v47, %v2153_v51  ;;  %4735 = vmatpush3.bf16.xpose.msra.mxu1 %v4403_v50  ;;  %v967_v21 = vrot.slane %v904_v48, 1  ;;  %v968_v53 = vrot.slane %v905_v5, 1  ;;  %v1143_v28 = vmul.f32 %v4958_v55, %v8619_v34 }
 0x363   : > { %v970_v27 = vrot.slane %v906_v32, 1  ;;  %v1144_v58 = vmul.f32 %v4958_v55, %v8620_v37  ;;  %v1205_v51 = vrot.slane %v1142_v36, 2  ;;  %v1477_v13 = vadd.f32 %v1442_v29, %v1351_v3 }
 0x364   : > { %v969_v26 = vsel %vm931_vm3, %v967_v21, %v968_v53  ;;  %v1380_v24 = vmul.f32 %v8205_v49, %v8618_v7  ;;  %v1381_v50 = vmul.f32 %v8205_v49, %v8619_v34  ;;  %v1206_v33 = vrot.slane %v1143_v28, 2 }
 0x365   : > { %v971_v44 = vsel %vm931_vm3, %v968_v53, %v970_v27  ;;  %v1002_v14 = vadd.f32 %v969_v26, %v876_v4  ;;  %v1208_v56 = vrot.slane %v1144_v58, 2  ;;  %v1589_v20 = vadd.f32 %v8164_v23, %v1477_v13 }
 0x366   : > { %v1003_v35 = vadd.f32 %v971_v44, %v877_v15  ;;  %v1382_v55 = vmul.f32 %v8205_v49, %v8620_v37  ;;  %v1443_v29 = vrot.slane %v1380_v24, 3  ;;  %v1207_v5 = vsel %vm1169_vm4, %v1205_v51, %v1206_v33 }
 0x367   : > { %v1114_v48 = vadd.f32 %v8016_v19, %v1002_v14  ;;  %v1209_v47 = vsel %vm1169_vm4, %v1206_v33, %v1208_v56  ;;  %v1444_v32 = vrot.slane %v1381_v50, 3  ;;  %v1714_v36 = vadd.f32 %v1679_v60, %v1589_v20 }
 0x368   : > { %v1115_v3 = vadd.f32 %v8156_v42, %v1003_v35  ;;  %v1446_v4 = vrot.slane %v1382_v55, 3  ;;  %v1618_v21 = vmul.f32 %v8213_v16, %v8618_v7  ;;  %v1619_v49 = vmul.f32 %v8213_v16, %v8619_v34  ;;  %v4893_v35 = vpop.permute.xlu1 %4892 }
 0x369   : > { %v1240_v53 = vadd.f32 %v1207_v5, %v1114_v48  ;;  %v1445_v15 = vsel %vm1407_vm5, %v1443_v29, %v1444_v32  ;;  %v1620_v19 = vmul.f32 %v8213_v16, %v8620_v37  ;;  %v1826_v27 = vadd.f32 %v8173_v43, %v1714_v36 }
 0x36a   : > { %v1241_v28 = vadd.f32 %v1209_v47, %v1115_v3  ;;  %v1447_v60 = vsel %vm1407_vm5, %v1444_v32, %v1446_v4  ;;  %v1680_v58 = vrot.slane %v1618_v21, 4  ;;  %v1681_v51 = vrot.slane %v1619_v49, 4 }
 0x36b   : > { %v1352_v42 = vadd.f32 %v8044_v2, %v1240_v53  ;;  %v1683_v13 = vrot.slane %v1620_v19, 4  ;;  %v1855_v26 = vmul.f32 %v8220_v57, %v8618_v7  ;;  %v1951_v24 = vadd.f32 %v1916_v0, %v1826_v27 }
 0x36c   : > { %v1353_v50 = vadd.f32 %v8161_v40, %v1241_v28  ;;  %v1856_v44 = vmul.f32 %v8220_v57, %v8619_v34  ;;  %v1857_v16 = vmul.f32 %v8220_v57, %v8620_v37  ;;  %v1682_v33 = vsel %vm498_vm0, %v1680_v58, %v1681_v51 }
 0x36d   : > { %v1478_v14 = vadd.f32 %v1445_v15, %v1352_v42  ;;  %v1684_v56 = vsel %vm498_vm0, %v1681_v51, %v1683_v13  ;;  %v1917_v2 = vrot.slane %v1855_v26, 5  ;;  %v2063_v20 = vadd.f32 %v8185_v41, %v1951_v24  ;;  %v4908_v51 = vpop.permute.xlu1 %4907 }
 0x36e   : > { %v1479_v55 = vadd.f32 %v1447_v60, %v1353_v50  ;;  %v1918_v29 = vrot.slane %v1856_v44, 5  ;;  %v1920_v0 = vrot.slane %v1857_v16, 5  ;;  %v2092_v48 = vmul.f32 %v8230_v18, %v8618_v7 }
 0x36f   : > { %v1590_v40 = vadd.f32 %v8080_v11, %v1478_v14  ;;  %v2093_v57 = vmul.f32 %v8230_v18, %v8619_v34  ;;  %v2094_v5 = vmul.f32 %v8230_v18, %v8620_v37  ;;  %v8347_v47 = vsel %vm2357_vm7, %v2508_v1, %v2510_v59 }
 0x370   : > { %v2189_v32 = vadd.f32 %v8293_v8, %v2063_v20  ;;  %v4361_v11 = vsel %vm4348_vm8, %v8270_v52, %v4899_v38  ;;  %v1591_v36 = vadd.f32 %v8164_v23, %v1479_v55  ;;  %v8626_v18 = vrot.slane %v8148_v61, 7  ;;  %v4903_v8 = vpop.permute.xlu0 %4902 }
 0x371   : > { %v4894_v3 = vunpack.i.l.bf16 %v4893_v35  ;;  %v1715_v54 = vadd.f32 %v1682_v33, %v1590_v40  ;;  %v1919_v1 = vsel %vm741_vm2, %v1917_v2, %v1918_v29  ;;  %v2155_v21 = vrot.slane %v2092_v48, 6 }
 0x372   : > { %v2392_v22 = vsel %vm2357_vm7, %v8626_v18, %v2391_v63  ;;  %v2301_v59 = vadd.f32 %v8235_v9, %v2189_v32  ;;  %v1716_v4 = vadd.f32 %v1684_v56, %v1591_v36  ;;  %v2156_v53 = vrot.slane %v2093_v57, 6 }
 0x373   : > { %v1827_v38 = vadd.f32 %v8109_v17, %v1715_v54  ;;  %v1921_v23 = vsel %vm741_vm2, %v1918_v29, %v1920_v0  ;;  %v2158_v52 = vrot.slane %v2094_v5, 6  ;;  %v2330_v10 = vmul.f32 %v8244_v62, %v8618_v7  ;;  %v4918_v0 = vpop.permute.xlu1 %4917 }
 0x374   : > { %v2427_v61 = vadd.f32 %v2392_v22, %v2301_v59  ;;  %v4895_v63 = vunpack.i.h.bf16 %v4893_v35  ;;  %v1828_v15 = vadd.f32 %v8173_v43, %v1716_v4  ;;  %v2331_v49 = vmul.f32 %v8244_v62, %v8619_v34  ;;  %v4472_v35 = vld [vmem:[%s8490_s9] sm:$0xff]  ;;  %v4475_v22 = vld [vmem:[%s8490_s9 + $0x18] sm:$0xff] }
 0x375   : > { %v4905_v19 = vunpack.i.h.bf16 %v4903_v8  ;;  %v4904_v27 = vunpack.i.l.bf16 %v4903_v8  ;;  %v1952_v28 = vadd.f32 %v1919_v1, %v1827_v38  ;;  %v2332_v60 = vmul.f32 %v8244_v62, %v8620_v37 }
 0x376   : > { %v2539_v17 = vadd.f32 %v8347_v47, %v2427_v61  ;;  %v4378_v58 = vsel %vm4365_vm9, %v4361_v11, %v4894_v3  ;;  %v1953_v42 = vadd.f32 %v1921_v23, %v1828_v15  ;;  %v2157_v7 = vsel %vm2119_vm6, %v2155_v21, %v2156_v53  ;;  %v4474_v11 = vld [vmem:[%s8490_s9 + $0x10] sm:$0xff] }
 0x377   : > { %v2064_v13 = vadd.f32 %v8133_v45, %v1952_v28  ;;  %v2159_v43 = vsel %vm2119_vm6, %v2156_v53, %v2158_v52  ;;  %v2393_v26 = vrot.slane %v2330_v10, 7  ;;  %v8627_v34 = vunpack.i.l.bf16 %v7985_v6  ;;  %v4502_v23 = vld [vmem:[%s8491_s10 + $0x10] sm:$0xff]  ;;  %v4503_v52 = vld [vmem:[%s8491_s10 + $0x18] sm:$0xff]  ;;  %v4927_v10 = vld [vmem:[%s8489_s8 + $0x8] sm:$0xff]  }
 0x378   : > { %v4362_v37 = vsel %vm4348_vm8, %v2539_v17, %v4900_v31  ;;  %v2065_v62 = vadd.f32 %v8185_v41, %v1953_v42  ;;  %v2394_v50 = vrot.slane %v2331_v49, 7  ;;  %v8628_v44 = vunpack.i.h.bf16 %v7985_v6  ;;  %v4473_v41 = vld [vmem:[%s8490_s9 + $0x8] sm:$0xff]  ;;  %v4913_v6 = vpop.permute.xlu0 %4912 }
 0x379   : > { %v4393_v24 = vsel %vm4382_vm10, %v8070_v39, %v8627_v34  ;;  %v4379_v16 = vsel %vm4365_vm9, %v4362_v37, %v4895_v63  ;;  %v2190_v14 = vadd.f32 %v2157_v7, %v2064_v13  ;;  %v2396_v33 = vrot.slane %v2332_v60, 7 }
 0x37a   : > { %v4394_v45 = vsel %vm4382_vm10, %v8182_v30, %v8628_v44  ;;  %v2191_v2 = vadd.f32 %v2159_v43, %v2065_v62  ;;  %v4395_v39 = vsel %vm4382_vm10, %v4378_v58, %v4904_v27  ;;  %v4396_v25 = vsel %vm4382_vm10, %v4379_v16, %v4905_v19 }
 0x37b   : > { %v4404_v56 = vpack.c.bf16 %v4394_v45, %v4393_v24  ;;  %v2302_v31 = vadd.f32 %v8176_v46, %v2190_v14  ;;  %v4405_v20 = vpack.c.bf16 %v4396_v25, %v4395_v39  ;;  %v5069_v30 = vmov 0  }
 0x37c   : > { %4922 = vset.pattern.permute.xlu1 %v5069_v30  ;;  %v2303_v55 = vadd.f32 %v8235_v9, %v2191_v2  ;;  %v2395_v29 = vsel %vm2357_vm7, %v2393_v26, %v2394_v50  ;;  %4921 = vset.pattern.permute.xlu0 %v5069_v30  ;;  %v2397_v40 = vsel %vm2357_vm7, %v2394_v50, %v2396_v33  ;;  %v4909_v46 = vunpack.i.l.bf16 %v4908_v51 }
 0x37d   : > { %4736 = vmatprep.subr.bf16.mxu1 %v4404_v56  ;;  %v2428_v48 = vadd.f32 %v2395_v29, %v2302_v31  ;;  %4483 = vperm.xlu1 %4922, %v4473_v41   ;;  %v4910_v5 = vunpack.i.h.bf16 %v4908_v51  ;;  %v4914_v32 = vunpack.i.l.bf16 %v4913_v6  ;;  %v4915_v36 = vunpack.i.h.bf16 %v4913_v6 }
 0x37e   : > { %4737 = vmatpush3.bf16.xpose.msra.mxu1 %v4404_v56  ;;  %v2429_v57 = vadd.f32 %v2397_v40, %v2303_v55  ;;  %4478 = vperm.xlu0 %4921, %v4472_v35   ;;  %v4919_v18 = vunpack.i.l.bf16 %v4918_v0  ;;  %v4920_v54 = vunpack.i.h.bf16 %v4918_v0 }
 0x37f   : > { %4738 = vmatprep.subr.bf16.mxu1 %v4405_v20  ;;  %v2540_v9 = vadd.f32 %v8253_v12, %v2428_v48  ;;  %v4500_v12 = vld [vmem:[%s8491_s10] sm:$0xff] }
 0x380   : > { %v2541_v3 = vadd.f32 %v8347_v47, %v2429_v57  ;;  %v4501_v47 = vld [vmem:[%s8491_s10 + $0x8] sm:$0xff] }
 0x381   : > { %v4363_v1 = vsel %vm4348_vm8, %v2540_v9, %v4909_v46  ;;  %4488 = vperm.xlu1 %4922, %v4474_v11  }
 0x382   : > { %v4364_v59 = vsel %vm4348_vm8, %v2541_v3, %v4910_v5  ;;  %v4380_v8 = vsel %vm4365_vm9, %v4363_v1, %v4914_v32  ;;  %4493 = vperm.xlu0 %4921, %v4475_v22  }
 0x383   : > { %v4381_v4 = vsel %vm4365_vm9, %v4364_v59, %v4915_v36  ;;  %v4397_v21 = vsel %vm4382_vm10, %v4380_v8, %v4919_v18 }
 0x384   : > { %v4398_v53 = vsel %vm4382_vm10, %v4381_v4, %v4920_v54 }
 0x385   : > { %v4406_v38 = vpack.c.bf16 %v4398_v53, %v4397_v21  ;;  %4506 = vperm.xlu1 %4922, %v4500_v12  }
 0x386   : > { %4739 = vmatpush3.bf16.xpose.msra.mxu1 %v4405_v20  ;;  %4511 = vperm.xlu0 %4921, %v4501_v47  }
 0x387   : > { %4740 = vmatprep.subr.bf16.mxu1 %v4406_v38 }
 0x389   : > { %4516 = vperm.xlu1 %4922, %v4502_v23  }
 0x38a   : > { %4521 = vperm.xlu0 %4921, %v4503_v52  }
 0x38e   : > { %4741 = vmatpush3.bf16.xpose.msra.mxu1 %v4406_v38 }
 0x395   : > { %4743 = vmatmul.mubr.bf16.vlgmr.msra.gmra.mrb[0].mxu1 %v4927_v10 }
 0x3fc   : > { %v4484_v61 = vpop.permute.xlu1 %4483 }
 0x3fd   : > { %v4479_v63 = vpop.permute.xlu0 %4478 }
 0x400   : > { %v4489_v15 = vpop.permute.xlu1 %4488 }
 0x401   : > { %v4494_v49 = vpop.permute.xlu0 %4493 }
 0x404   : > { %v4507_v19 = vpop.permute.xlu1 %4506 }
 0x405   : > { %v4512_v27 = vpop.permute.xlu0 %4511 }
 0x408   : > { %v4517_v58 = vpop.permute.xlu1 %4516 }
 0x409   : > { %v4522_v26 = vpop.permute.xlu0 %4521 }
 0x468   : > { %v4744_v28 = vpop.f32.mrb[0].mxu1 }
 0x469   : > { %v4498_v60 = vmul.f32 %v4744_v28, %v4489_v15  ;;  %v4457_v17 = vpop.f32.mrb[1].mxu1 }
 0x46a   : > { %v4496_v42 = vmul.f32 %v4479_v63, %v4457_v17  ;;  %v4745_v7 = vpop.f32.mrb[2].mxu1 }
 0x46b   : > { %v4526_v51 = vadd.f32 %v4517_v58, %v4498_v60  ;;  %v4499_v13 = vmul.f32 %v4745_v7, %v4494_v49  ;;  %v4460_v43 = vpop.f32.mrb[3].mxu1 }
 0x46c   : > { %v4524_v34 = vadd.f32 %v4507_v19, %v4496_v42  ;;  %v4497_v24 = vmul.f32 %v4484_v61, %v4460_v43 }
 0x46d   : > { %v4530_v37 = vmax.f32 %v4526_v51, 0.0  ;;  %v4527_v62 = vadd.f32 %v4522_v26, %v4499_v13 }
 0x46e   : > { %v4528_v50 = vmax.f32 %v4524_v34, 0.0  ;;  %v4525_v44 = vadd.f32 %v4512_v27, %v4497_v24 }
 0x46f   : > { %4534 = vst [vmem:[%s404_s24 + $0x10] sm:$0xff] %v4530_v37  ;;  %v4531_v45 = vmax.f32 %v4527_v62, 0.0 }
 0x470   : > { %4532 = vst [vmem:[%s404_s24] sm:$0xff] %v4528_v50  ;;  %v4529_v16 = vmax.f32 %v4525_v44, 0.0 }
 0x471   : > { %4535 = vst [vmem:[%s404_s24 + $0x18] sm:$0xff] %v4531_v45 }
 0x472   : > { %4533 = vst [vmem:[%s404_s24 + $0x8] sm:$0xff] %v4529_v16 }
 0x473   : > { %5008 = shalt.err (!%p5005_p2)
}
 0x474   : > { %s5009_s27 = scalar_lea.hbm %s8437_s12, 512  ;;  %s5013_s25 = scalar_lea.hbm %s8492_s11, 1024 }
 0x475   : > { %p5010_p4 = scmp.ne.s32.totalorder %s8437_s12, %s5009_s27  ;;  %p5014_p9 = scmp.lt.u32.totalorder %s8437_s12, %s8492_s11 }
 0x476   : > { %p5015_p1 = scmp.lt.u32.totalorder %s5013_s25, %s5009_s27  ;;  %p5017_p6 = scmp.lt.u32.totalorder %s5009_s27, %s8437_s12 }
 0x477   : > { %p5011_p5 = pnand %p5010_p4, %p8629_p11 }
 0x478   : > { %p5016_p3 = por %p5015_p1, %p5014_p9 }
 0x479   : > { %p5012_p7 = pneg %p5011_p5 }
 0x47a   : > { %p5018_p12 = por %p5017_p6, %p5016_p3 }
 0x47c   : > { %p5019_p13 = pnand %p5018_p12, %p5012_p7 }
 0x47e   : > { %5022 = shalt.err (!%p5019_p13)
}
 0x47f   : > { %s5071_s13 = smov 128   ;;  %s5072_s14 = smov 8  }
 0x480   : > { %4749 = dma.vmem_to_hbm [thread:$0]  (%p8629_p11), %s8432_s15, 512, %s8437_s12, %s4537_s21, %s5071_s13, %s5071_s13, %s5072_s14  }
 0x481 PF: > { %s4565_s26 = sand.u32 1, %s5049_s17   ;;  %p8630_p8 = scmp.ne.s32.totalorder %s8556_s30, 0 }
 0x482   : > { %p8631_p10 = scmp.ge.s32.totalorder %s5061_s20, 2  ;;  %s4566_s27 = scalar_lea.sflag [#allocation4], %s4565_s26 }
 0x484   : > { %p4756_p0 = pnand %p8631_p10, %p8630_p8 }
 0x486   : > { %5044 = dma.done.wait (!%p4756_p0), %s4566_s27, 512  }
 0x487   : > { %5046 = vsyncadd (!%p4756_p0), %s4566_s27, 4294966784  ;;  %s8632_s24 = sld [smem:[#allocation8_spill]]  ;;  %s8633_s19 = sld [smem:[#allocation9_spill]] }
 0x488   : > { %p24_p2 = scmp.ge.s32.totalorder %s5158_s23, 4   ;;  %s8634_s17 = smov %s5053_s18 }
 0x489   : > { %s8636_s20 = smov %s5158_s23 }
 0x48a   :  { %26 = sbr.rel (!%p24_p2) target bundleno = 5 (0x5), region = 109 }
 0x48d   : > { %s8635_s18 = smov %s8632_s24 }
 0x491   :  { %4571 = vsyncpa [#allocation3], 1 }
 0x492   :  { %4573 = vsyncpa [#allocation3 + $0x1], 1 }
 0x493   :  { %4574 = vsyncpa [#allocation4], 1 }
 0x494   :  { %4576 = vsyncpa [#allocation4 + $0x1], 1 }

</bundles_post_ra>
